<compile_context>
chip_gen: v7x
topology: tpu7x:2x2x1
jax: 0.10.0
libtpu: 0.0.40
codegen_flags: <defaults>
</compile_context>

<pallas_src>
import functools
import math

import jax
import jax.numpy as jnp
import numpy as np
from jax.experimental import pallas as pl
from jax.experimental.pallas import tpu as pltpu

EPS = 1e-5        # nn.GroupNorm default eps
NUM_GROUPS = 32   # normalization() -> GroupNorm32(32, channels)


# ----------------------------- kernel ---------------------------------------


def attention_block_kernel(x_ref, gamma_ref, beta_ref, gmat_ref,
                           wqkv_ref, bqkv_ref, wproj_ref, bproj_ref,
                           o_ref, qkv_scr, h_scr, *, num_heads, tq):
    x_ct = x_ref[0]                                   # (C, T) f32, native layout
    C, T = x_ct.shape
    ch = C // num_heads
    nq = T // tq

    # One in-VMEM transpose (XLU) instead of a wrapper-level HBM transpose pass.
    x_tc = jnp.transpose(x_ct)                        # (T, C) f32

    # ---- GroupNorm32: centered two-pass stats in f32 (PyTorch parity) ----
    inv_t = 1.0 / T
    gmat = gmat_ref[...]                              # (C, C) group-averaging matrix
    m = jnp.sum(x_tc, axis=0, keepdims=True) * inv_t                     # (1, C)
    gm = jnp.dot(m, gmat, preferred_element_type=jnp.float32)            # group mean / chan
    xc = x_tc - gm
    s2 = jnp.sum(xc * xc, axis=0, keepdims=True) * inv_t                 # (1, C)
    gv = jnp.dot(s2, gmat, preferred_element_type=jnp.float32)           # group var / chan
    a_scale = jax.lax.rsqrt(gv + EPS) * gamma_ref[...]
    xn = xc * a_scale + beta_ref[...]                 # single FMA normalize pass

    # ---- qkv 1x1 conv (bf16 operands, f32 accumulate). Wrapper already
    # permuted the output channels to [Q | K | V] blocks and folded the
    # 1/ch^0.25 attention scale into the Q/K columns.
    qkv = jnp.dot(xn.astype(jnp.bfloat16), wqkv_ref[...],
                  preferred_element_type=jnp.float32) + bqkv_ref[...]    # (T, 3C)
    qkv_scr[...] = qkv.astype(jnp.bfloat16)

    # ---- attention + proj_out, tiled over query blocks so only a (tq, T)
    # score/prob tile is live at a time (bounds VMEM / vreg pressure).
    @pl.loop(0, nq)
    def _(qi):
        q0 = pl.multiple_of(qi * tq, tq)
        head_outs = []
        for h in range(num_heads):                    # static unrolled head loop
            q = qkv_scr[pl.ds(q0, tq), pl.ds(h * ch, ch)]            # (tq, ch) bf16
            k = qkv_scr[:, pl.ds(C + h * ch, ch)]                    # (T,  ch) bf16
            v = qkv_scr[:, pl.ds(2 * C + h * ch, ch)]                # (T,  ch) bf16
            # scores[t, s] = sum_c q[t, c] * k[s, c]
            scores = jax.lax.dot_general(
                q, k, (((1,), (1,)), ((), ())),
                preferred_element_type=jnp.float32)                  # (tq, T) f32
            smax = jnp.max(scores, axis=-1, keepdims=True)
            p = jnp.exp(scores - smax)                # f32 exp (portable to v5e)
            denom = jnp.sum(p, axis=-1, keepdims=True)
            acc = jnp.dot(p.astype(jnp.bfloat16), v,
                          preferred_element_type=jnp.float32)        # (tq, ch) f32
            # deferred softmax normalization: (tq, ch) multiply, not (tq, T)
            head_outs.append(acc * pl.reciprocal(denom, approx=True))
        attn = head_outs[0] if num_heads == 1 else jnp.concatenate(head_outs, axis=-1)
        # zero-initialized proj_out (generic weights supported)
        h_scr[pl.ds(q0, tq), :] = (
            jnp.dot(attn.astype(jnp.bfloat16), wproj_ref[...],
                    preferred_element_type=jnp.float32) + bproj_ref[...])

    # ---- residual skip + single transpose back to the native (C, T) layout ----
    o_ref[0] = (x_ref[0] + jnp.transpose(h_scr[...])).astype(o_ref.dtype)


# ----------------------------- wrapper ---------------------------------------


def _group_avg_matrix(C, groups):
    gs = C // groups
    ids = np.arange(C) // gs
    return jnp.asarray((ids[:, None] == ids[None, :]).astype(np.float32) / gs)


def _pick_tq(T, tq_hint):
    tq = min(tq_hint, T)
    for cand in range(tq, 0, -1):
        if T % cand == 0 and (cand % 8 == 0 or cand == T):
            return cand
    return T


@functools.partial(jax.jit, static_argnames=("num_heads", "tq"))
def attention_block_forward(x, params, num_heads=1, tq=256):
    """x: (B, C, *spatial) in the PyTorch NC... convention."""
    B, C = x.shape[0], x.shape[1]
    spatial = x.shape[2:]
    T = 1
    for s in spatial:
        T *= int(s)
    assert C % NUM_GROUPS == 0, "GroupNorm32 requires channels % 32 == 0"
    assert C % num_heads == 0
    ch = C // num_heads
    tq_eff = _pick_tq(T, tq)

    # Native (B, C, T) layout: reshape only, no HBM transpose pass in XLA.
    x3 = x.reshape(B, C, T).astype(jnp.float32)

    gamma = params["norm_w"].reshape(1, C).astype(jnp.float32)
    beta = params["norm_b"].reshape(1, C).astype(jnp.float32)
    gmat = _group_avg_matrix(C, NUM_GROUPS)

    # Conv1d(kernel_size=1) weights -> matmul matrices. Permute qkv output
    # channels from the legacy per-head interleave [q_h|k_h|v_h] to [Q|K|V]
    # blocks and fold the 1/ch^0.25 scale into the Q/K columns (equivalent to
    # scaling q and k after the conv).
    perm = np.array([h * 3 * ch + p * ch + c
                     for p in range(3)
                     for h in range(num_heads)
                     for c in range(ch)], dtype=np.int32)
    scale = 1.0 / math.sqrt(math.sqrt(ch))
    col_scale = np.concatenate([np.full(2 * C, scale, np.float32),
                                np.ones(C, np.float32)])
    wqkv = (jnp.transpose(params["qkv_w"][:, :, 0], (1, 0))[:, perm]
            * col_scale[None, :]).astype(jnp.bfloat16)                    # (C, 3C)
    bqkv = (params["qkv_b"][perm] * col_scale).reshape(1, 3 * C).astype(jnp.float32)
    wproj = jnp.transpose(params["proj_w"][:, :, 0], (1, 0)).astype(jnp.bfloat16)  # (C, C)
    bproj = params["proj_b"].reshape(1, C).astype(jnp.float32)

    kernel = functools.partial(attention_block_kernel,
                               num_heads=num_heads, tq=tq_eff)
    out = pl.pallas_call(
        kernel,
        out_shape=jax.ShapeDtypeStruct((B, C, T), jnp.float32),
        grid=(B,),
        in_specs=[
            pl.BlockSpec((1, C, T), lambda b: (b, 0, 0)),   # x (per-batch tile, native)
            pl.BlockSpec((1, C), lambda b: (0, 0)),          # GN gamma
            pl.BlockSpec((1, C), lambda b: (0, 0)),          # GN beta
            pl.BlockSpec((C, C), lambda b: (0, 0)),          # group-avg matrix
            pl.BlockSpec((C, 3 * C), lambda b: (0, 0)),      # qkv weight (VMEM-resident)
            pl.BlockSpec((1, 3 * C), lambda b: (0, 0)),      # qkv bias
            pl.BlockSpec((C, C), lambda b: (0, 0)),          # proj weight (VMEM-resident)
            pl.BlockSpec((1, C), lambda b: (0, 0)),          # proj bias
        ],
        out_specs=pl.BlockSpec((1, C, T), lambda b: (b, 0, 0)),
        scratch_shapes=[
            pltpu.VMEM((T, 3 * C), jnp.bfloat16),            # qkv (q/k pre-scaled)
            pltpu.VMEM((T, C), jnp.float32),                 # proj_out(attn) per-block results
        ],
        compiler_params=pltpu.CompilerParams(
            dimension_semantics=("parallel",),
            vmem_limit_bytes=64 * 1024 * 1024),
    )(x3, gamma, beta, gmat, wqkv, bqkv, wproj, bproj)

    return out.reshape(x.shape).astype(x.dtype)


# ----------------------------- pure-JAX reference -----------------------------


@functools.partial(jax.jit, static_argnames=("num_heads",))
def reference_forward(x, params, num_heads=1):
    """Step-by-step f32 replica of the PyTorch AttentionBlock forward."""
    hi = jax.lax.Precision.HIGHEST
    B, C = x.shape[0], x.shape[1]
    T = int(np.prod(x.shape[2:]))
    xr = x.reshape(B, C, T).astype(jnp.float32)

    g = NUM_GROUPS
    xg = xr.reshape(B, g, (C // g) * T)
    mean = jnp.mean(xg, axis=-1, keepdims=True)
    var = jnp.mean((xg - mean) ** 2, axis=-1, keepdims=True)
    xn = ((xg - mean) * jax.lax.rsqrt(var + EPS)).reshape(B, C, T)
    xn = xn * params["norm_w"][None, :, None] + params["norm_b"][None, :, None]

    qkv = jnp.einsum("oc,bct->bot", params["qkv_w"][:, :, 0], xn, precision=hi)
    qkv = qkv + params["qkv_b"][None, :, None]

    H = num_heads
    ch = C // H
    qkv = qkv.reshape(B * H, 3 * ch, T)
    q, k, v = qkv[:, :ch], qkv[:, ch:2 * ch], qkv[:, 2 * ch:]
    scale = 1.0 / math.sqrt(math.sqrt(ch))
    w = jnp.einsum("bct,bcs->bts", q * scale, k * scale, precision=hi)
    w = jax.nn.softmax(w, axis=-1)
    a = jnp.einsum("bts,bcs->bct", w, v, precision=hi).reshape(B, C, T)

    h = jnp.einsum("oc,bct->bot", params["proj_w"][:, :, 0], a, precision=hi)
    h = h + params["proj_b"][None, :, None]
    return (xr + h).reshape(x.shape)


# ----------------------------- parameters ------------------------------------


def init_params(key, channels):
    c = channels
    k1, k2 = jax.random.split(key, 2)
    bound = 1.0 / math.sqrt(c)   # PyTorch Conv1d default init bound (fan_in = c * 1)
    return {
        # GroupNorm32 default affine params.
        "norm_w": jnp.ones((c,), jnp.float32),
        "norm_b": jnp.zeros((c,), jnp.float32),
        # qkv = Conv1d(C, 3C, 1)
        "qkv_w": jax.random.uniform(k1, (3 * c, c, 1), jnp.float32, -bound, bound),
        "qkv_b": jax.random.uniform(k2, (3 * c,), jnp.float32, -bound, bound),
        # proj_out = zero_module(Conv1d(C, C, 1)) -> zero weights and bias.
        "proj_w": jnp.zeros((c, c, 1), jnp.float32),
        "proj_b": jnp.zeros((c,), jnp.float32),
    }


if __name__ == "__main__":
    # channels must be a multiple of 32 (GroupNorm32); C = 128 keeps every
    # matmul / store lane-dense. T = 16*16 = 256 spatial positions.
    B, C, H, W = 2, 128, 16, 16

    key = jax.random.PRNGKey(0)
    kx, kp, k1, k2, k3, k4, k5, k6 = jax.random.split(key, 8)
    x = jax.random.normal(kx, (B, C, H, W), jnp.float32)   # NCHW like PyTorch

    # --- test 1: default module init (zero proj_out) -> block is the identity map
    params = init_params(kp, C)
    out = attention_block_forward(x, params, num_heads=1)
    jax.block_until_ready(out)
    assert out.shape == (B, C, H, W)
    assert bool(jnp.all(jnp.isfinite(out)))
    assert bool(jnp.allclose(out, x, atol=1e-5)), "zero-proj identity check failed"

    # --- test 2: non-zero proj / non-trivial GN affine, num_heads=1, vs f32 reference
    bound = 1.0 / math.sqrt(C)
    params_nz = dict(params)
    params_nz["norm_w"] = 1.0 + 0.2 * jax.random.normal(k1, (C,), jnp.float32)
    params_nz["norm_b"] = 0.1 * jax.random.normal(k2, (C,), jnp.float32)
    params_nz["qkv_w"] = 2.0 * jax.random.uniform(k3, (3 * C, C, 1), jnp.float32, -bound, bound)
    params_nz["qkv_b"] = jax.random.uniform(k4, (3 * C,), jnp.float32, -bound, bound)
    params_nz["proj_w"] = jax.random.uniform(k5, (C, C, 1), jnp.float32, -bound, bound)
    params_nz["proj_b"] = jax.random.uniform(k6, (C,), jnp.float32, -bound, bound)

    out1 = attention_block_forward(x, params_nz, num_heads=1)
    ref1 = reference_forward(x, params_nz, num_heads=1)
    err1 = float(jnp.max(jnp.abs(out1 - ref1)))
    assert err1 < 8e-2, f"num_heads=1 mismatch vs f32 reference (bf16 MXU): {err1}"

    # --- test 3: num_heads=4 and tq=128 (2 query blocks) — exercises the legacy
    # head permutation / concat path and the query-block loop.
    out4 = attention_block_forward(x, params_nz, num_heads=4, tq=128)
    ref4 = reference_forward(x, params_nz, num_heads=4)
    err4 = float(jnp.max(jnp.abs(out4 - ref4)))
    assert err4 < 8e-2, f"num_heads=4 mismatch vs f32 reference (bf16 MXU): {err4}"

    jax.block_until_ready((out, out1, out4))
    print("KERNEL_OK")
</pallas_src>

<mosaic_0001>
module attributes {stable_mosaic.version = 11 : i64} {
  func.func @attention_block_kernel(%arg0: i32, %arg1: memref<1x128x256xf32, #tpu.memory_space<vmem>>, %arg2: memref<1x128xf32, #tpu.memory_space<vmem>>, %arg3: memref<1x128xf32, #tpu.memory_space<vmem>>, %arg4: memref<128x128xf32, #tpu.memory_space<vmem>>, %arg5: memref<128x384xbf16, #tpu.memory_space<vmem>>, %arg6: memref<1x384xf32, #tpu.memory_space<vmem>>, %arg7: memref<128x128xbf16, #tpu.memory_space<vmem>>, %arg8: memref<1x128xf32, #tpu.memory_space<vmem>>, %arg9: memref<1x128x256xf32, #tpu.memory_space<vmem>>, %arg10: memref<256x384xbf16, #tpu.memory_space<vmem>>, %arg11: memref<256x128xf32, #tpu.memory_space<vmem>>) attributes {dimension_semantics = [#tpu.dimension_semantics<parallel>], iteration_bounds = array<i64: 2>, scalar_prefetch = 0 : i64, scratch_operands = 2 : i64, tpu.core_type = #tpu.core_type<tc>, window_params = [{transform_indices = @transform_0, window_bounds = array<i64: 1, 128, 256>}, {pipeline_mode = #tpu.pipeline_mode<synchronous>, transform_indices = @transform_1, window_bounds = array<i64: 1, 128>}, {pipeline_mode = #tpu.pipeline_mode<synchronous>, transform_indices = @transform_2, window_bounds = array<i64: 1, 128>}, {pipeline_mode = #tpu.pipeline_mode<synchronous>, transform_indices = @transform_3, window_bounds = array<i64: 128, 128>}, {pipeline_mode = #tpu.pipeline_mode<synchronous>, transform_indices = @transform_4, window_bounds = array<i64: 128, 384>}, {pipeline_mode = #tpu.pipeline_mode<synchronous>, transform_indices = @transform_5, window_bounds = array<i64: 1, 384>}, {pipeline_mode = #tpu.pipeline_mode<synchronous>, transform_indices = @transform_6, window_bounds = array<i64: 128, 128>}, {pipeline_mode = #tpu.pipeline_mode<synchronous>, transform_indices = @transform_7, window_bounds = array<i64: 1, 128>}, {transform_indices = @transform_8, window_bounds = array<i64: 1, 128, 256>}]} {
    %c0 = arith.constant 0 : index
    %c0_0 = arith.constant 0 : index
    %c0_1 = arith.constant 0 : index
    %0 = vector.load %arg1[%c0, %c0_0, %c0_1] : memref<1x128x256xf32, #tpu.memory_space<vmem>>, vector<1x128x256xf32>
    %1 = vector.shape_cast %0 : vector<1x128x256xf32> to vector<128x256xf32>
    %2 = tpu.transpose %1, [1, 0] : vector<128x256xf32> -> vector<256x128xf32>
    %c0_2 = arith.constant 0 : index
    %c0_3 = arith.constant 0 : index
    %3 = vector.load %arg4[%c0_2, %c0_3] : memref<128x128xf32, #tpu.memory_space<vmem>>, vector<128x128xf32>
    %cst = arith.constant dense<0.000000e+00> : vector<128xf32>
    %4 = vector.multi_reduction <add>, %2, %cst [0] : vector<256x128xf32> to vector<128xf32>
    %5 = vector.shape_cast %4 : vector<128xf32> to vector<1x128xf32>
    %cst_4 = arith.constant 3.906250e-03 : f32
    %6 = vector.broadcast %cst_4 : f32 to vector<1x128xf32>
    %7 = arith.mulf %5, %6 : vector<1x128xf32>
    %cst_5 = arith.constant dense<0.000000e+00> : vector<1x128xf32>
    %8 = tpu.matmul %7, %3, %cst_5 {dimension_numbers = #tpu.dot_dimension_numbers<[1], [0], [0], [1], [0, 0, 1, 1], [], []>} : vector<1x128xf32>, vector<128x128xf32>, vector<1x128xf32> -> vector<1x128xf32>
    %9 = vector.broadcast %8 : vector<1x128xf32> to vector<256x128xf32>
    %10 = arith.subf %2, %9 : vector<256x128xf32>
    %11 = arith.mulf %10, %10 : vector<256x128xf32>
    %cst_6 = arith.constant dense<0.000000e+00> : vector<128xf32>
    %12 = vector.multi_reduction <add>, %11, %cst_6 [0] : vector<256x128xf32> to vector<128xf32>
    %13 = vector.shape_cast %12 : vector<128xf32> to vector<1x128xf32>
    %cst_7 = arith.constant 3.906250e-03 : f32
    %14 = vector.broadcast %cst_7 : f32 to vector<1x128xf32>
    %15 = arith.mulf %13, %14 : vector<1x128xf32>
    %cst_8 = arith.constant dense<0.000000e+00> : vector<1x128xf32>
    %16 = tpu.matmul %15, %3, %cst_8 {dimension_numbers = #tpu.dot_dimension_numbers<[1], [0], [0], [1], [0, 0, 1, 1], [], []>} : vector<1x128xf32>, vector<128x128xf32>, vector<1x128xf32> -> vector<1x128xf32>
    %cst_9 = arith.constant 9.99999974E-6 : f32
    %17 = vector.broadcast %cst_9 : f32 to vector<1x128xf32>
    %18 = arith.addf %16, %17 : vector<1x128xf32>
    %19 = math.rsqrt %18 : vector<1x128xf32>
    %c0_10 = arith.constant 0 : index
    %c0_11 = arith.constant 0 : index
    %20 = vector.load %arg2[%c0_10, %c0_11] : memref<1x128xf32, #tpu.memory_space<vmem>>, vector<1x128xf32>
    %21 = arith.mulf %19, %20 : vector<1x128xf32>
    %22 = vector.broadcast %21 : vector<1x128xf32> to vector<256x128xf32>
    %23 = arith.mulf %10, %22 : vector<256x128xf32>
    %c0_12 = arith.constant 0 : index
    %c0_13 = arith.constant 0 : index
    %24 = vector.load %arg3[%c0_12, %c0_13] : memref<1x128xf32, #tpu.memory_space<vmem>>, vector<1x128xf32>
    %25 = vector.broadcast %24 : vector<1x128xf32> to vector<256x128xf32>
    %26 = arith.addf %23, %25 : vector<256x128xf32>
    %27 = arith.truncf %26 : vector<256x128xf32> to vector<256x128xbf16>
    %c0_14 = arith.constant 0 : index
    %c0_15 = arith.constant 0 : index
    %28 = vector.load %arg5[%c0_14, %c0_15] : memref<128x384xbf16, #tpu.memory_space<vmem>>, vector<128x384xbf16>
    %cst_16 = arith.constant dense<0.000000e+00> : vector<256x384xf32>
    %29 = tpu.matmul %27, %28, %cst_16 {dimension_numbers = #tpu.dot_dimension_numbers<[1], [0], [0], [1], [0, 0, 1, 1], [], []>} : vector<256x128xbf16>, vector<128x384xbf16>, vector<256x384xf32> -> vector<256x384xf32>
    %c0_17 = arith.constant 0 : index
    %c0_18 = arith.constant 0 : index
    %30 = vector.load %arg6[%c0_17, %c0_18] : memref<1x384xf32, #tpu.memory_space<vmem>>, vector<1x384xf32>
    %31 = vector.broadcast %30 : vector<1x384xf32> to vector<256x384xf32>
    %32 = arith.addf %29, %31 : vector<256x384xf32>
    %33 = arith.truncf %32 : vector<256x384xf32> to vector<256x384xbf16>
    %c0_19 = arith.constant 0 : index
    %c0_20 = arith.constant 0 : index
    %34 = vector.load %arg10[%c0_19, %c0_20] : memref<256x384xbf16, #tpu.memory_space<vmem>>, vector<256x384xbf16>
    tpu.vector_store %arg10[%c0_19, %c0_20], %33 {strides = array<i32>} : memref<256x384xbf16, #tpu.memory_space<vmem>>, vector<256x384xbf16>,
    %c0_i32 = arith.constant 0 : i32
    %c1_i32 = arith.constant 1 : i32
    %35 = arith.muli %c0_i32, %c1_i32 : i32
    %c0_i32_21 = arith.constant 0 : i32
    %36 = arith.addi %c0_i32_21, %35 : i32
    %c256_i32 = arith.constant 256 : i32
    %37 = arith.muli %36, %c256_i32 : i32
    %38 = tpu.assume_multiple %37, 256 : i32
    %39 = arith.index_cast %38 : i32 to index
    %c0_22 = arith.constant 0 : index
    %40 = vector.load %arg10[%39, %c0_22] : memref<256x384xbf16, #tpu.memory_space<vmem>>, vector<256x128xbf16>
    %c0_23 = arith.constant 0 : index
    %c128 = arith.constant 128 : index
    %41 = vector.load %arg10[%c0_23, %c128] : memref<256x384xbf16, #tpu.memory_space<vmem>>, vector<256x128xbf16>
    %c0_24 = arith.constant 0 : index
    %c256 = arith.constant 256 : index
    %42 = vector.load %arg10[%c0_24, %c256] : memref<256x384xbf16, #tpu.memory_space<vmem>>, vector<256x128xbf16>
    %cst_25 = arith.constant dense<0.000000e+00> : vector<256x256xf32>
    %43 = tpu.matmul %40, %41, %cst_25 {dimension_numbers = #tpu.dot_dimension_numbers<[1], [1], [0], [0], [0, 0, 1, 0], [], []>} : vector<256x128xbf16>, vector<256x128xbf16>, vector<256x256xf32> -> vector<256x256xf32>
    %cst_26 = arith.constant dense<0xFF800000> : vector<256xf32>
    %44 = vector.multi_reduction <maximumf>, %43, %cst_26 [1] : vector<256x256xf32> to vector<256xf32>
    %45 = vector.shape_cast %44 : vector<256xf32> to vector<256x1xf32>
    %46 = vector.broadcast %45 : vector<256x1xf32> to vector<256x256xf32>
    %47 = arith.subf %43, %46 : vector<256x256xf32>
    %48 = math.exp %47 : vector<256x256xf32>
    %cst_27 = arith.constant dense<0.000000e+00> : vector<256xf32>
    %49 = vector.multi_reduction <add>, %48, %cst_27 [1] : vector<256x256xf32> to vector<256xf32>
    %50 = vector.shape_cast %49 : vector<256xf32> to vector<256x1xf32>
    %51 = arith.truncf %48 : vector<256x256xf32> to vector<256x256xbf16>
    %cst_28 = arith.constant dense<0.000000e+00> : vector<256x128xf32>
    %52 = tpu.matmul %51, %42, %cst_28 {dimension_numbers = #tpu.dot_dimension_numbers<[1], [0], [0], [1], [0, 0, 1, 1], [], []>} : vector<256x256xbf16>, vector<256x128xbf16>, vector<256x128xf32> -> vector<256x128xf32>
    %53 = tpu.reciprocal %50 {approx = true} : vector<256x1xf32> -> vector<256x1xf32>
    %54 = vector.broadcast %53 : vector<256x1xf32> to vector<256x128xf32>
    %55 = arith.mulf %52, %54 : vector<256x128xf32>
    %56 = arith.truncf %55 : vector<256x128xf32> to vector<256x128xbf16>
    %c0_29 = arith.constant 0 : index
    %c0_30 = arith.constant 0 : index
    %57 = vector.load %arg7[%c0_29, %c0_30] : memref<128x128xbf16, #tpu.memory_space<vmem>>, vector<128x128xbf16>
    %cst_31 = arith.constant dense<0.000000e+00> : vector<256x128xf32>
    %58 = tpu.matmul %56, %57, %cst_31 {dimension_numbers = #tpu.dot_dimension_numbers<[1], [0], [0], [1], [0, 0, 1, 1], [], []>} : vector<256x128xbf16>, vector<128x128xbf16>, vector<256x128xf32> -> vector<256x128xf32>
    %c0_32 = arith.constant 0 : index
    %c0_33 = arith.constant 0 : index
    %59 = vector.load %arg8[%c0_32, %c0_33] : memref<1x128xf32, #tpu.memory_space<vmem>>, vector<1x128xf32>
    %60 = vector.broadcast %59 : vector<1x128xf32> to vector<256x128xf32>
    %61 = arith.addf %58, %60 : vector<256x128xf32>
    %62 = arith.index_cast %38 : i32 to index
    %c0_34 = arith.constant 0 : index
    %63 = vector.load %arg11[%62, %c0_34] : memref<256x128xf32, #tpu.memory_space<vmem>>, vector<256x128xf32>
    tpu.vector_store %arg11[%62, %c0_34], %61 {strides = array<i32>} : memref<256x128xf32, #tpu.memory_space<vmem>>, vector<256x128xf32>,
    %c1_i32_35 = arith.constant 1 : i32
    %c0_36 = arith.constant 0 : index
    %c0_37 = arith.constant 0 : index
    %c0_38 = arith.constant 0 : index
    %64 = vector.load %arg1[%c0_36, %c0_37, %c0_38] : memref<1x128x256xf32, #tpu.memory_space<vmem>>, vector<1x128x256xf32>
    %65 = vector.shape_cast %64 : vector<1x128x256xf32> to vector<128x256xf32>
    %c0_39 = arith.constant 0 : index
    %c0_40 = arith.constant 0 : index
    %66 = vector.load %arg11[%c0_39, %c0_40] : memref<256x128xf32, #tpu.memory_space<vmem>>, vector<256x128xf32>
    %67 = tpu.transpose %66, [1, 0] : vector<256x128xf32> -> vector<128x256xf32>
    %68 = arith.addf %65, %67 : vector<128x256xf32>
    %c0_41 = arith.constant 0 : index
    %c0_42 = arith.constant 0 : index
    %c0_43 = arith.constant 0 : index
    %69 = vector.load %arg9[%c0_41, %c0_42, %c0_43] : memref<1x128x256xf32, #tpu.memory_space<vmem>>, vector<1x128x256xf32>
    %70 = vector.shape_cast %69 : vector<1x128x256xf32> to vector<128x256xf32>
    %71 = vector.shape_cast %68 : vector<128x256xf32> to vector<1x128x256xf32>
    tpu.vector_store %arg9[%c0_41, %c0_42, %c0_43], %71 {strides = array<i32>} : memref<1x128x256xf32, #tpu.memory_space<vmem>>, vector<1x128x256xf32>,
    return
  }
  func.func @transform_0(%arg0: i32) -> (i32, i32, i32) {
    %c0_i32 = arith.constant 0 : i32
    %c0_i32_0 = arith.constant 0 : i32
    %c0_i32_1 = arith.constant 0 : i32
    return %arg0, %c0_i32, %c0_i32_0 : i32, i32, i32
  }
  func.func @transform_1(%arg0: i32) -> (i32, i32) {
    %c0_i32 = arith.constant 0 : i32
    %c0_i32_0 = arith.constant 0 : i32
    %c0_i32_1 = arith.constant 0 : i32
    return %c0_i32, %c0_i32_0 : i32, i32
  }
  func.func @transform_2(%arg0: i32) -> (i32, i32) {
    %c0_i32 = arith.constant 0 : i32
    %c0_i32_0 = arith.constant 0 : i32
    %c0_i32_1 = arith.constant 0 : i32
    return %c0_i32, %c0_i32_0 : i32, i32
  }
  func.func @transform_3(%arg0: i32) -> (i32, i32) {
    %c0_i32 = arith.constant 0 : i32
    %c0_i32_0 = arith.constant 0 : i32
    %c0_i32_1 = arith.constant 0 : i32
    return %c0_i32, %c0_i32_0 : i32, i32
  }
  func.func @transform_4(%arg0: i32) -> (i32, i32) {
    %c0_i32 = arith.constant 0 : i32
    %c0_i32_0 = arith.constant 0 : i32
    %c0_i32_1 = arith.constant 0 : i32
    return %c0_i32, %c0_i32_0 : i32, i32
  }
  func.func @transform_5(%arg0: i32) -> (i32, i32) {
    %c0_i32 = arith.constant 0 : i32
    %c0_i32_0 = arith.constant 0 : i32
    %c0_i32_1 = arith.constant 0 : i32
    return %c0_i32, %c0_i32_0 : i32, i32
  }
  func.func @transform_6(%arg0: i32) -> (i32, i32) {
    %c0_i32 = arith.constant 0 : i32
    %c0_i32_0 = arith.constant 0 : i32
    %c0_i32_1 = arith.constant 0 : i32
    return %c0_i32, %c0_i32_0 : i32, i32
  }
  func.func @transform_7(%arg0: i32) -> (i32, i32) {
    %c0_i32 = arith.constant 0 : i32
    %c0_i32_0 = arith.constant 0 : i32
    %c0_i32_1 = arith.constant 0 : i32
    return %c0_i32, %c0_i32_0 : i32, i32
  }
  func.func @transform_8(%arg0: i32) -> (i32, i32, i32) {
    %c0_i32 = arith.constant 0 : i32
    %c0_i32_0 = arith.constant 0 : i32
    %c0_i32_1 = arith.constant 0 : i32
    return %arg0, %c0_i32, %c0_i32_0 : i32, i32, i32
  }
}

</mosaic_0001>

<bundles_post_ra>
// kernel: mul.12
= control target key start
LH: loop header
LB: loop body
LE: loop exit
PB: predicated region body
PF: predicated region fallthrough
CT: control target
= control target key end

     0   :  { %s34_s0 = inlined_call_operand.vmem [shape: f32[384], index: 0, kind: input, shape index: {}]   ;;  %s35_s1 = inlined_call_operand.vmem [shape: f32[384], index: 1, kind: input, shape index: {}]   ;;  %s36_s2 = inlined_call_operand.vmem [shape: f32[384], index: 2, kind: output, shape index: {}]  }
   0x1   :  { %v3_v0 = vld [vmem:[%s34_s0] sm:$0x7] }
   0x2   :  { %v4_v1 = vld [vmem:[%s35_s1] sm:$0x7] }
   0x3   :  { %v7_v2 = vmul.f32 %v4_v1, %v3_v0 }
   0x5   :  { %9 = vst [vmem:[%s36_s2] sm:$0xf] %v7_v2 }

// kernel: attention_block_forward.1
= control target key start
LH: loop header
LB: loop body
LE: loop exit
PB: predicated region body
PF: predicated region fallthrough
CT: control target
= control target key end

     0   :  { %13 = vsyncpa [#allocation5], 0  ;;  %s5766_s0 = inlined_call_operand.hbm [shape: f32[2,128,256], index: 0, kind: input, shape index: {}]   ;;  %s5767_s1 = inlined_call_operand.hbm [shape: f32[1,128], index: 1, kind: input, shape index: {}]   ;;  %s5768_s2 = inlined_call_operand.hbm [shape: f32[1,128], index: 2, kind: input, shape index: {}]   ;;  %s5769_s3 = inlined_call_operand.hbm [shape: f32[128,128], index: 3, kind: input, shape index: {}]   ;;  %s5770_s4 = inlined_call_operand.hbm [shape: bf16[128,384], index: 4, kind: input, shape index: {}]   ;;  %s5771_s5 = inlined_call_operand.hbm [shape: f32[1,384], index: 5, kind: input, shape index: {}]   ;;  %s5772_s6 = inlined_call_operand.hbm [shape: bf16[128,128], index: 6, kind: input, shape index: {}]   ;;  %s5773_s7 = inlined_call_operand.hbm [shape: f32[1,128], index: 7, kind: input, shape index: {}]   ;;  %s5774_s8 = inlined_call_operand.hbm [shape: f32[2,128,256], index: 8, kind: output, shape index: {}]  }
   0x1   :  { %15 = vsyncpa [#allocation5 + $0x1], 0 }
   0x2   :  { %16 = vsyncpa [#allocation8], 0 }
   0x3   :  { %17 = vsyncpa [#allocation11], 0 }
   0x4   :  { %18 = vsyncpa [#allocation14], 0 }
   0x5   :  { %19 = vsyncpa [#allocation17], 0 }
   0x6   :  { %20 = vsyncpa [#allocation6], 0 }
   0x7   :  { %22 = vsyncpa [#allocation6 + $0x1], 0  ;;  %s4310_s27 = smov 0   ;;  %s4312_s28 = smov 0  }
   0x8   :  { %s4314_s29 = smov 0   ;;  %s4316_s30 = smov 0  }
   0x9 LB: > { %s4242_s9 = smov [#allocation7]   ;;  %s4331_s11 = sadd.s32 4294967295, %s4240_s30   ;;  %s4240_s30 = sphi %s4316_s30, %s5840_s30   ;;  %s4236_s29 = sphi %s4314_s29, %s5839_s29   ;;  %s4232_s28 = sphi %s4312_s28, %s5838_s28   ;;  %s4228_s27 = sphi %s4310_s27, %s5837_s27  }
   0xa   : > { %s245_s10 = sshll.u32 %s4242_s9, 4  ;;  %p3048_p0 = scmp.ge.s32.totalorder %s4240_s30, 1  ;;  %s4336_s10 = int_to_ptr.vmem [resolvable:$true] %s245_s10 }
   0xb   : > { %p5775_p1 = scmp.eq.s32.totalorder %s4331_s11, 0  ;;  %p232_p2 = scmp.lt.s32.totalorder %s4240_s30, 3 }
   0xc   : > { %s4243_s13 = smov [#allocation10]   ;;  %s4244_s16 = smov [#allocation13]  }
   0xd   : > { %p4338_p3 = pnand %p3048_p0, %p232_p2  ;;  %s266_s14 = sshll.u32 %s4243_s13, 4  ;;  %s4345_s14 = int_to_ptr.vmem [resolvable:$true] %s266_s14 }
   0xe   : > { %s293_s17 = sshll.u32 %s4244_s16, 4  ;;  %s3932_s20 = scalar_lea.hbm %s5767_s1, 16  ;;  %s4353_s17 = int_to_ptr.vmem [resolvable:$true] %s293_s17 }
   0xf   : > { %s5791_s12 = scalar_select %p4338_p3, 1, 0 }
  0x10   : > { %p3599_p5 = pneg %p4338_p3  ;;  %p3933_p7 = scmp.ne.s32.totalorder %s5767_s1, %s3932_s20 }
  0x11   : > { %p3939_p11 = scmp.lt.u32.totalorder %s3932_s20, %s5767_s1 }
  0x12   : > { %p4349_p6 = pnand %p3599_p5, %p5775_p1 }
  0x14   : > { %p4363_p8 = pneg %p4349_p6 }
  0x16   : > { %p3935_p9 = pnand %p4363_p8, %p3933_p7 }
  0x18   : > { %p3936_p10 = pneg %p3935_p9 }
  0x1a   : > { %p3941_p12 = pnand %p3939_p11, %p3936_p10 }
  0x1c   : > { %3944 = shalt.err (!%p3941_p12)
}
  0x1d   : > { %s3945_s26 = scalar_lea.vmem %s4336_s10, 16  ;;  %s3952_s9 = scalar_lea.vmem %s4336_s10, 32 }
  0x1e   : > { %p3946_p13 = scmp.ne.s32.totalorder %s4336_s10, %s3945_s26  ;;  %p3953_p5 = scmp.lt.s32.totalorder %s4336_s10, %s4336_s10 }
  0x1f   : > { %p3954_p7 = scmp.lt.s32.totalorder %s3952_s9, %s3945_s26 }
  0x20   : > { %p3948_p0 = pnand %p3946_p13, %p4363_p8 }
  0x21   : > { %p3955_p9 = por %p3954_p7, %p3953_p5 }
  0x22   : > { %p3949_p2 = pneg %p3948_p0 }
  0x24   : > { %p3956_p4 = pnand %p3955_p9, %p3949_p2 }
  0x26   : > { %3959 = shalt.err (!%p3956_p4)
}
  0x27   : > { %3602 = dma.hbm_to_vmem [thread:$0]  (!%p4349_p6), %s5767_s1, 16, %s4336_s10, [#allocation8]  }
  0x28   : > { %s3960_s20 = scalar_lea.hbm %s5769_s3, 2048 }
  0x29   : > { %p3961_p10 = scmp.ne.s32.totalorder %s5769_s3, %s3960_s20  ;;  %p3967_p4 = scmp.lt.u32.totalorder %s3960_s20, %s5769_s3 }
  0x2b   : > { %p3963_p11 = pnand %p3961_p10, %p4363_p8 }
  0x2d   : > { %p3964_p12 = pneg %p3963_p11 }
  0x2f   : > { %p3969_p13 = pnand %p3967_p4, %p3964_p12 }
  0x31   : > { %3972 = shalt.err (!%p3969_p13)
}
  0x32   : > { %s3973_s10 = scalar_lea.vmem %s4345_s14, 2048  ;;  %p3981_p7 = scmp.lt.s32.totalorder %s4345_s14, %s4345_s14 }
  0x33   : > { %p3974_p0 = scmp.ne.s32.totalorder %s4345_s14, %s3973_s10  ;;  %p3982_p9 = scmp.lt.s32.totalorder %s3973_s10, %s3973_s10 }
  0x35   : > { %p3976_p2 = pnand %p3974_p0, %p4363_p8  ;;  %p3983_p10 = por %p3982_p9, %p3981_p7 }
  0x37   : > { %p3977_p5 = pneg %p3976_p2 }
  0x39   : > { %p3984_p11 = pnand %p3983_p10, %p3977_p5 }
  0x3b   : > { %3987 = shalt.err (!%p3984_p11)
}
  0x3c   : > { %s4245_s26 = smov 128   ;;  %s4246_s9 = smov 8  }
  0x3d   : > { %3608 = dma.hbm_to_vmem [thread:$0]  (!%p4349_p6), %s5769_s3, 2048, %s4345_s14, [#allocation11], %s4245_s26, %s4245_s26, %s4246_s9  }
  0x3e   : > { %s3988_s20 = scalar_lea.hbm %s5771_s5, 48 }
  0x3f   : > { %p3989_p12 = scmp.ne.s32.totalorder %s5771_s5, %s3988_s20  ;;  %p3995_p0 = scmp.lt.u32.totalorder %s3988_s20, %s5771_s5 }
  0x41   : > { %p3991_p4 = pnand %p3989_p12, %p4363_p8 }
  0x43   : > { %p3992_p13 = pneg %p3991_p4 }
  0x45   : > { %p3997_p2 = pnand %p3995_p0, %p3992_p13 }
  0x47   : > { %4000 = shalt.err (!%p3997_p2)
}
  0x48   : > { %s4001_s14 = scalar_lea.vmem %s4353_s17, 48  ;;  %s4008_s10 = scalar_lea.vmem %s4353_s17, 64 }
  0x49   : > { %p4002_p5 = scmp.ne.s32.totalorder %s4353_s17, %s4001_s14  ;;  %p4009_p10 = scmp.lt.s32.totalorder %s4353_s17, %s4353_s17 }
  0x4a   : > { %p4010_p11 = scmp.lt.s32.totalorder %s4008_s10, %s4001_s14 }
  0x4b   : > { %p4004_p7 = pnand %p4002_p5, %p4363_p8 }
  0x4c   : > { %p4011_p12 = por %p4010_p11, %p4009_p10 }
  0x4d   : > { %p4005_p9 = pneg %p4004_p7 }
  0x4f   : > { %p4012_p4 = pnand %p4011_p12, %p4005_p9 }
  0x51   : > { %4015 = shalt.err (!%p4012_p4)
}
  0x52   : > { %3614 = dma.hbm_to_vmem [thread:$0]  (!%p4349_p6), %s5771_s5, 48, %s4353_s17, [#allocation14]  }
  0x53   : > { %s4247_s13 = smov [#allocation9]   ;;  %s4248_s18 = smov [#allocation12]  }
  0x54   : > { %s256_s16 = sshll.u32 %s4247_s13, 4  ;;  %s279_s19 = sshll.u32 %s4248_s18, 4  ;;  %s257_s16 = int_to_ptr.vmem [resolvable:$true] %s256_s16  ;;  %s280_s19 = int_to_ptr.vmem [resolvable:$true] %s279_s19 }
  0x55   : > { %s4016_s22 = scalar_lea.hbm %s5768_s2, 16 }
  0x56   : > { %p4017_p13 = scmp.ne.s32.totalorder %s5768_s2, %s4016_s22  ;;  %p4023_p5 = scmp.lt.u32.totalorder %s4016_s22, %s5768_s2 }
  0x58   : > { %p4019_p0 = pnand %p4017_p13, %p4363_p8 }
  0x5a   : > { %p4020_p2 = pneg %p4019_p0 }
  0x5c   : > { %p4025_p7 = pnand %p4023_p5, %p4020_p2 }
  0x5e   : > { %4028 = shalt.err (!%p4025_p7)
}
  0x5f   : > { %s4029_s17 = scalar_lea.vmem %s257_s16, 16  ;;  %s4036_s26 = scalar_lea.vmem %s257_s16, 32 }
  0x60   : > { %p4030_p9 = scmp.ne.s32.totalorder %s257_s16, %s4029_s17  ;;  %p4037_p12 = scmp.lt.s32.totalorder %s257_s16, %s257_s16 }
  0x61   : > { %p4038_p4 = scmp.lt.s32.totalorder %s4036_s26, %s4029_s17 }
  0x62   : > { %p4032_p10 = pnand %p4030_p9, %p4363_p8 }
  0x63   : > { %p4039_p1 = por %p4038_p4, %p4037_p12 }
  0x64   : > { %p4033_p11 = pneg %p4032_p10 }
  0x66   : > { %p4040_p3 = pnand %p4039_p1, %p4033_p11 }
  0x68   : > { %4043 = shalt.err (!%p4040_p3)
}
  0x69   : > { %3605 = dma.hbm_to_vmem [thread:$0]  (!%p4349_p6), %s5768_s2, 16, %s257_s16, [#allocation8]  }
  0x6a   : > { %s4044_s21 = scalar_lea.hbm %s5770_s4, 3072 }
  0x6b   : > { %p4045_p13 = scmp.ne.s32.totalorder %s5770_s4, %s4044_s21  ;;  %p4051_p3 = scmp.lt.u32.totalorder %s4044_s21, %s5770_s4 }
  0x6d   : > { %p4047_p0 = pnand %p4045_p13, %p4363_p8 }
  0x6f   : > { %p4048_p1 = pneg %p4047_p0 }
  0x71   : > { %p4053_p2 = pnand %p4051_p3, %p4048_p1 }
  0x73   : > { %4056 = shalt.err (!%p4053_p2)
}
  0x74   : > { %s4057_s10 = scalar_lea.vmem %s280_s19, 3072  ;;  %p4065_p10 = scmp.lt.s32.totalorder %s280_s19, %s280_s19 }
  0x75   : > { %p4058_p5 = scmp.ne.s32.totalorder %s280_s19, %s4057_s10  ;;  %p4066_p11 = scmp.lt.s32.totalorder %s4057_s10, %s4057_s10 }
  0x77   : > { %p4060_p7 = pnand %p4058_p5, %p4363_p8  ;;  %p4067_p12 = por %p4066_p11, %p4065_p10 }
  0x79   : > { %p4061_p9 = pneg %p4060_p7 }
  0x7b   : > { %p4068_p4 = pnand %p4067_p12, %p4061_p9 }
  0x7d   : > { %4071 = shalt.err (!%p4068_p4)
}
  0x7e   : > { %s4249_s16 = smov 192   ;;  %s4250_s17 = smov 12  }
  0x7f   : > { %3611 = dma.hbm_to_vmem [thread:$0]  (!%p4349_p6), %s5770_s4, 3072, %s280_s19, [#allocation11], %s4249_s16, %s4249_s16, %s4250_s17  }
  0x80   : > { %s4251_s13 = smov [#allocation15]   ;;  %s4072_s22 = scalar_lea.hbm %s5772_s6, 1024 }
  0x81   : > { %s303_s18 = sshll.u32 %s4251_s13, 4  ;;  %p4073_p13 = scmp.ne.s32.totalorder %s5772_s6, %s4072_s22  ;;  %s304_s18 = int_to_ptr.vmem [resolvable:$true] %s303_s18 }
  0x82   : > { %p4079_p3 = scmp.lt.u32.totalorder %s4072_s22, %s5772_s6 }
  0x83   : > { %p4075_p0 = pnand %p4073_p13, %p4363_p8 }
  0x85   : > { %p4076_p1 = pneg %p4075_p0 }
  0x87   : > { %p4081_p2 = pnand %p4079_p3, %p4076_p1 }
  0x89   : > { %4084 = shalt.err (!%p4081_p2)
}
  0x8a   : > { %s4085_s19 = scalar_lea.vmem %s304_s18, 1024  ;;  %p4093_p10 = scmp.lt.s32.totalorder %s304_s18, %s304_s18 }
  0x8b   : > { %p4086_p5 = scmp.ne.s32.totalorder %s304_s18, %s4085_s19  ;;  %p4094_p11 = scmp.lt.s32.totalorder %s4085_s19, %s4085_s19 }
  0x8d   : > { %p4088_p7 = pnand %p4086_p5, %p4363_p8  ;;  %p4095_p12 = por %p4094_p11, %p4093_p10 }
  0x8f   : > { %p4089_p9 = pneg %p4088_p7 }
  0x91   : > { %p4096_p4 = pnand %p4095_p12, %p4089_p9 }
  0x93   : > { %4099 = shalt.err (!%p4096_p4)
}
  0x94   : > { %s4252_s16 = smov 64   ;;  %s4253_s17 = smov 4  }
  0x95   : > { %3617 = dma.hbm_to_vmem [thread:$0]  (!%p4349_p6), %s5772_s6, 1024, %s304_s18, [#allocation14], %s4252_s16, %s4252_s16, %s4253_s17  }
  0x96   : > { %s4254_s13 = smov [#allocation16]   ;;  %s4100_s24 = scalar_lea.hbm %s5773_s7, 16 }
  0x97   : > { %s317_s20 = sshll.u32 %s4254_s13, 4  ;;  %p4101_p13 = scmp.ne.s32.totalorder %s5773_s7, %s4100_s24  ;;  %s318_s20 = int_to_ptr.vmem [resolvable:$true] %s317_s20 }
  0x98   : > { %p4107_p3 = scmp.lt.u32.totalorder %s4100_s24, %s5773_s7 }
  0x99   : > { %p4103_p0 = pnand %p4101_p13, %p4363_p8 }
  0x9b   : > { %p4104_p1 = pneg %p4103_p0 }
  0x9d   : > { %p4109_p2 = pnand %p4107_p3, %p4104_p1 }
  0x9f   : > { %4112 = shalt.err (!%p4109_p2)
}
  0xa0   : > { %s4113_s18 = scalar_lea.vmem %s318_s20, 16  ;;  %s4120_s16 = scalar_lea.vmem %s318_s20, 32 }
  0xa1   : > { %p4114_p5 = scmp.ne.s32.totalorder %s318_s20, %s4113_s18  ;;  %p4121_p10 = scmp.lt.s32.totalorder %s318_s20, %s318_s20 }
  0xa2   : > { %p4122_p11 = scmp.lt.s32.totalorder %s4120_s16, %s4113_s18 }
  0xa3   : > { %p4116_p7 = pnand %p4114_p5, %p4363_p8 }
  0xa4   : > { %p4123_p12 = por %p4122_p11, %p4121_p10 }
  0xa5   : > { %p4117_p9 = pneg %p4116_p7 }
  0xa7   : > { %p4124_p4 = pnand %p4123_p12, %p4117_p9 }
  0xa9   : > { %4127 = shalt.err (!%p4124_p4)
}
  0xaa   : > { %3620 = dma.hbm_to_vmem [thread:$0]  (!%p4349_p6), %s5773_s7, 16, %s318_s20, [#allocation17]  }
  0xab   : > { %s3047_s23 = sadd.s32 4294967294, %s4240_s30   ;;  %s4506_s15 = sadd.s32 1, %s4240_s30  }
  0xac   : > { %s35_s9 = sadd.s32 1, %s4236_s29  ;;  %s32_s13 = ssub.s32 %s4240_s30, %s4506_s15 }
  0xad   : > { %p42_p8 = scmp.ne.s32.totalorder %s4236_s29, %s4232_s28  ;;  %p33_p13 = scmp.eq.s32.totalorder %s32_s13, 0 }
  0xae   : > { %p43_p0 = scmp.eq.s32.totalorder %s4240_s30, 0  ;;  %p48_p1 = scmp.ne.s32.totalorder %s4232_s28, %s4228_s27 }
  0xaf   : > { %p219_p3 = scmp.eq.s32.totalorder %s4331_s11, 1  ;;  %p5794_p5 = scmp.eq.s32.totalorder %s4331_s11, 0 }
  0xb0   : > { %s4518_s21 = scalar_select %p33_p13, %s4236_s29, %s35_s9  }
  0xb1   : > { %p44_p2 = por %p43_p0, %p42_p8  ;;  %p4522_p7 = por %p5794_p5, %p48_p1 }
  0xb2   : > { %p4526_p6 = por %p219_p3, %p42_p8  ;;  %p225_p9 = scmp.eq.s32.totalorder %s3047_s23, 1 }
  0xb3   : > { %p3636_p10 = scmp.lt.s32.totalorder %s4240_s30, 2  ;;  %s328_s24 = sand.u32 1, %s4236_s29  }
  0xb4   : > { %s5796_s20 = scalar_select %p4526_p6, 1, 0 }
  0xb5   : > { %p4532_p11 = por %p225_p9, %p48_p1  ;;  %s3057_s14 = sshll.u32 %s328_s24, 8 }
  0xb6   : > { %s3109_s10 = sshll.u32 %s4240_s30, 12  ;;  %s332_s17 = scalar_lea.vmem [#allocation4], %s3057_s14 }
  0xb7   : > { %s5797_s25 = scalar_select %p4532_p11, 1, 0 }
  0xb8   : > { %s4540_s16 = scalar_lea.hbm %s5766_s0, %s3109_s10  ;;  %s339_s26 = sshll.u32 %s332_s17, 4  ;;  %s4546_s26 = int_to_ptr.vmem [resolvable:$true] %s339_s26 }
  0xb9   : > { %p4542_p12 = pnand %p3636_p10, %p44_p2  ;;  %s4548_s9 = scalar_lea.sflag [#allocation5], %s328_s24 }
  0xba   : > { %s4128_s13 = scalar_lea.hbm %s4540_s16, 4096  ;;  %s4133_s19 = scalar_lea.hbm %s5766_s0, 8192 }
  0xbb   : > { %p4129_p4 = scmp.ne.s32.totalorder %s4540_s16, %s4128_s13  ;;  %p4130_p8 = pneg %p4542_p12 }
  0xbc   : > { %p4134_p1 = scmp.lt.u32.totalorder %s4540_s16, %s5766_s0  ;;  %p4135_p3 = scmp.lt.u32.totalorder %s4133_s19, %s4128_s13 }
  0xbd   : > { %p4131_p13 = pnand %p4130_p8, %p4129_p4  ;;  %p4137_p5 = scmp.lt.u32.totalorder %s4128_s13, %s4540_s16 }
  0xbe   : > { %p4136_p2 = por %p4135_p3, %p4134_p1 }
  0xbf   : > { %p4132_p0 = pneg %p4131_p13 }
  0xc0   : > { %p4138_p9 = por %p4137_p5, %p4136_p2 }
  0xc2   : > { %p4139_p10 = pnand %p4138_p9, %p4132_p0 }
  0xc4   : > { %4142 = shalt.err (!%p4139_p10)
}
  0xc5   : > { %s4143_s24 = scalar_lea.vmem %s4546_s26, 4096  ;;  %s4255_s14 = smov [#allocation4]  }
  0xc6   : > { %p4144_p4 = scmp.ne.s32.totalorder %s4546_s26, %s4143_s24  ;;  %s4148_s10 = sshll.u32 %s4255_s14, 4  ;;  %s4149_s10 = int_to_ptr.vmem [resolvable:$false] %s4148_s10 }
  0xc7   : > { %s4150_s18 = scalar_lea.vmem %s4149_s10, 8192  ;;  %p4151_p6 = scmp.lt.s32.totalorder %s4546_s26, %s4149_s10 }
  0xc8   : > { %p4146_p13 = pnand %p4144_p4, %p4130_p8  ;;  %p4152_p1 = scmp.lt.s32.totalorder %s4150_s18, %s4143_s24 }
  0xca   : > { %p4147_p11 = pneg %p4146_p13  ;;  %p4153_p3 = por %p4152_p1, %p4151_p6 }
  0xcc   : > { %p4154_p2 = pnand %p4153_p3, %p4147_p11 }
  0xce   : > { %4157 = shalt.err (!%p4154_p2)
}
  0xcf   : > { %s4256_s13 = smov 256   ;;  %s4257_s19 = smov 16  }
  0xd0   : > { %3624 = dma.hbm_to_vmem [thread:$0]  (!%p4542_p12), %s4540_s16, 4096, %s4546_s26, %s4548_s9, %s4256_s13, %s4256_s13, %s4257_s19  }
  0xd1   : > { %p5799_p8 = scmp.ne.s32.totalorder %s5791_s12, 0 }
  0xd3   : > { %351 = sbr.rel (%p5799_p8) target bundleno = 2443 (0x98b), region = 52 }
  0xda   : > { %s4579_s17 = sand.u32 1, %s4232_s28  }
  0xdb   : > { %s3061_s24 = sshll.u32 %s4579_s17, 8  ;;  %s354_s14 = scalar_lea.sflag [#allocation5], %s4579_s17 }
  0xdc   : > { %s4585_s10 = scalar_lea.vmem [#allocation4], %s3061_s24 }
  0xdd   : > { %4203 = dma.done.wait (%p4522_p7), %s354_s14, 4096  }
  0xde   : > { %4205 = vsyncadd (%p4522_p7), %s354_s14, 4294963200  ;;  %p5800_p6 = scmp.eq.s32.totalorder %s4331_s11, 0 }
  0xe0   : > { %4207 = dma.done.wait (%p5800_p6), [#allocation8], 32   ;;  %p5801_p11 = pmov %p5800_p6 }
  0xe1   : > { %p5802_p12 = pmov %p5800_p6 }
  0xe2   : > { %4209 = vsyncadd (%p5801_p11), [#allocation8], 4294967264 }
  0xe3   : > { %4211 = dma.done.wait (%p5802_p12), [#allocation11], 5120   ;;  %p5803_p0 = pmov %p5800_p6 }
  0xe5   : > { %4213 = vsyncadd (%p5803_p0), [#allocation11], 4294962176  ;;  %p5804_p5 = pmov %p5803_p0 }
  0xe6   : > { %p5805_p9 = pmov %p5803_p0 }
  0xe7   : > { %4215 = dma.done.wait (%p5804_p5), [#allocation14], 1072  }
  0xe8   : > { %4217 = vsyncadd (%p5805_p9), [#allocation14], 4294966224  ;;  %p5806_p7 = pmov %p5803_p0 }
  0xe9   : > { %p5807_p10 = pmov %p5803_p0 }
  0xea   : > { %4219 = dma.done.wait (%p5806_p7), [#allocation17], 16  }
  0xeb   : > { %4221 = vsyncadd (%p5807_p10), [#allocation17], 4294967280  ;;  %v419_v0 = vld [vmem:[%s4585_s10] sm:$0xff]  ;;  %v421_v1 = vld [vmem:[%s4585_s10 + $0x10] sm:$0xff]  ;;  %v4258_v35 = vmov 0.0|0.0   ;;  %vm4259_vm0 = vmmov 0  }
  0xec   : > { %451 = vxpose.xlu0.b32.start [1/16] %v419_v0, 128  ;;  %v420_v2 = vld [vmem:[%s4585_s10 + $0x8] sm:$0xff]  ;;  %v422_v3 = vld [vmem:[%s4585_s10 + $0x18] sm:$0xff]  ;;  %v423_v4 = vld [vmem:[%s4585_s10 + $0x20] sm:$0xff]  ;;  %3519 = vmatprep.subr.bf16.mxu0 %v4258_v35  ;;  %v4260_v56 = vmov 0.0   ;;  %s5651_s12 = scalar_lea.vmem [#allocation18], %s3061_s24  ;;  %s3110_s22 = sshll.u32 %s4331_s11, 12 }
  0xed   : > { %483 = vxpose.xlu1.b32.start [1/16] %v420_v2, 128  ;;  %v424_v5 = vld [vmem:[%s4585_s10 + $0x28] sm:$0xff]  ;;  %v425_v6 = vld [vmem:[%s4585_s10 + $0x30] sm:$0xff]  ;;  %v426_v7 = vld [vmem:[%s4585_s10 + $0x38] sm:$0xff]  ;;  %3543 = vmatprep.subr.bf16.mxu1 %v4258_v35  ;;  %s2907_s16 = sshll.u32 %s5651_s12, 4  ;;  %s5719_s9 = scalar_lea.hbm %s5774_s8, %s3110_s22  ;;  %s5721_s16 = int_to_ptr.vmem [resolvable:$true] %s2907_s16 }
  0xee   : > { %v427_v8 = vld [vmem:[%s4585_s10 + $0x40] sm:$0xff]  ;;  %v428_v9 = vld [vmem:[%s4585_s10 + $0x48] sm:$0xff]  ;;  %v429_v10 = vld [vmem:[%s4585_s10 + $0x50] sm:$0xff]  ;;  %3385 = vmatprep.mubr.msk.f32.mxu0 %vm4259_vm0, %v4260_v56  ;;  %3420 = vmatprep.mubr.msk.f32.mxu1 %vm4259_vm0, %v4260_v56  ;;  %s2894_s18 = scalar_lea.sflag [#allocation6], %s4579_s17  ;;  %s4158_s13 = scalar_lea.vmem %s5721_s16, 4096 }
  0xef   : > { %v430_v11 = vld [vmem:[%s4585_s10 + $0x58] sm:$0xff]  ;;  %v431_v12 = vld [vmem:[%s4585_s10 + $0x60] sm:$0xff]  ;;  %v432_v13 = vld [vmem:[%s4585_s10 + $0x68] sm:$0xff]  ;;  %p4159_p4 = scmp.ne.s32.totalorder %s5721_s16, %s4158_s13  ;;  %p5834_p13 = scmp.ne.s32.totalorder %s5796_s20, 0 }
  0xf0   : > { %452 = vxpose.xlu0.b32.cont [2/16] %v421_v1, 128  ;;  %v433_v14 = vld [vmem:[%s4585_s10 + $0x70] sm:$0xff]  ;;  %v434_v15 = vld [vmem:[%s4585_s10 + $0x78] sm:$0xff]  ;;  %v435_v16 = vld [vmem:[%s4585_s10 + $0x80] sm:$0xff]  ;;  %s4262_s11 = smov [#allocation18]  }
  0xf1   : > { %484 = vxpose.xlu1.b32.cont [2/16] %v422_v3, 128  ;;  %v436_v17 = vld [vmem:[%s4585_s10 + $0x88] sm:$0xff]  ;;  %v437_v18 = vld [vmem:[%s4585_s10 + $0x90] sm:$0xff]  ;;  %v438_v19 = vld [vmem:[%s4585_s10 + $0x98] sm:$0xff]  ;;  %p4160_p1 = pnand %p4159_p4, %p5834_p13  ;;  %s4162_s19 = sshll.u32 %s4262_s11, 4  ;;  %s4163_s19 = int_to_ptr.vmem [resolvable:$false] %s4162_s19 }
  0xf2   : > { %v439_v20 = vld [vmem:[%s4585_s10 + $0xa0] sm:$0xff]  ;;  %v440_v21 = vld [vmem:[%s4585_s10 + $0xa8] sm:$0xff]  ;;  %v441_v22 = vld [vmem:[%s4585_s10 + $0xb0] sm:$0xff]  ;;  %s4164_s24 = scalar_lea.vmem %s4163_s19, 8192  ;;  %p4165_p2 = scmp.lt.s32.totalorder %s5721_s16, %s4163_s19 }
  0xf3   : > { %v442_v23 = vld [vmem:[%s4585_s10 + $0xb8] sm:$0xff]  ;;  %v443_v24 = vld [vmem:[%s4585_s10 + $0xc0] sm:$0xff]  ;;  %v444_v25 = vld [vmem:[%s4585_s10 + $0xc8] sm:$0xff]  ;;  %p4161_p3 = pneg %p4160_p1  ;;  %p4166_p8 = scmp.lt.s32.totalorder %s4164_s24, %s4158_s13 }
  0xf4   : > { %453 = vxpose.xlu0.b32.cont [3/16] %v423_v4, 128  ;;  %v445_v26 = vld [vmem:[%s4585_s10 + $0xd0] sm:$0xff]  ;;  %v446_v27 = vld [vmem:[%s4585_s10 + $0xd8] sm:$0xff]  ;;  %v447_v28 = vld [vmem:[%s4585_s10 + $0xe0] sm:$0xff] }
  0xf5   : > { %485 = vxpose.xlu1.b32.cont [3/16] %v424_v5, 128  ;;  %v448_v29 = vld [vmem:[%s4585_s10 + $0xe8] sm:$0xff]  ;;  %v449_v30 = vld [vmem:[%s4585_s10 + $0xf0] sm:$0xff]  ;;  %v450_v31 = vld [vmem:[%s4585_s10 + $0xf8] sm:$0xff]  ;;  %p4167_p6 = por %p4166_p8, %p4165_p2 }
  0xf6   : > { %v515_v32 = vld [vmem:[#allocation10] sm:$0xff]  ;;  %v516_v33 = vld [vmem:[#allocation10 + $0x8] sm:$0xff]  ;;  %v517_v36 = vld [vmem:[#allocation10 + $0x10] sm:$0xff] }
  0xf7   : > { %v3520_v34 = vpack.c.bf16 %v516_v33, %v515_v32  ;;  %v518_v37 = vld [vmem:[#allocation10 + $0x18] sm:$0xff]  ;;  %v519_v39 = vld [vmem:[#allocation10 + $0x20] sm:$0xff]  ;;  %v520_v40 = vld [vmem:[#allocation10 + $0x28] sm:$0xff]  ;;  %p4168_p11 = pnand %p4167_p6, %p4161_p3 }
  0xf8   : > { %454 = vxpose.xlu0.b32.cont [4/16] %v425_v6, 128  ;;  %v3523_v38 = vpack.c.bf16 %v518_v37, %v517_v36  ;;  %v3526_v41 = vpack.c.bf16 %v520_v40, %v519_v39  ;;  %v521_v42 = vld [vmem:[#allocation10 + $0x30] sm:$0xff]  ;;  %v522_v43 = vld [vmem:[#allocation10 + $0x38] sm:$0xff]  ;;  %v523_v45 = vld [vmem:[#allocation10 + $0x40] sm:$0xff] }
  0xf9   : > { %486 = vxpose.xlu1.b32.cont [4/16] %v426_v7, 128  ;;  %3521 = vmatpush3.bf16.msra.mxu0 %v3520_v34  ;;  %v3529_v44 = vpack.c.bf16 %v522_v43, %v521_v42  ;;  %v524_v46 = vld [vmem:[#allocation10 + $0x48] sm:$0xff]  ;;  %v525_v48 = vld [vmem:[#allocation10 + $0x50] sm:$0xff]  ;;  %v526_v49 = vld [vmem:[#allocation10 + $0x58] sm:$0xff] }
  0xfa   : > { %3545 = vmatpush3.bf16.msra.mxu1 %v3520_v34  ;;  %3522 = vmatprep.subr.bf16.mxu0 %v4258_v35  ;;  %v3532_v47 = vpack.c.bf16 %v524_v46, %v523_v45  ;;  %v3535_v50 = vpack.c.bf16 %v526_v49, %v525_v48  ;;  %v527_v51 = vld [vmem:[#allocation10 + $0x60] sm:$0xff]  ;;  %v528_v52 = vld [vmem:[#allocation10 + $0x68] sm:$0xff]  ;;  %v529_v53 = vld [vmem:[#allocation10 + $0x70] sm:$0xff] }
  0xfb   : > { %3546 = vmatprep.subr.bf16.mxu1 %v4258_v35  ;;  %v3538_v54 = vpack.c.bf16 %v528_v52, %v527_v51  ;;  %v530_v55 = vld [vmem:[#allocation10 + $0x78] sm:$0xff] }
  0xfc   : > { %455 = vxpose.xlu0.b32.cont [5/16] %v427_v8, 128  ;;  %v3541_v57 = vpack.c.bf16 %v530_v55, %v529_v53 }
  0xfd   : > { %487 = vxpose.xlu1.b32.cont [5/16] %v428_v9, 128  ;;  %3524 = vmatpush3.bf16.msra.mxu0 %v3523_v38 }
  0xfe   : > { %3548 = vmatpush3.bf16.msra.mxu1 %v3523_v38  ;;  %3525 = vmatprep.subr.bf16.mxu0 %v4258_v35 }
  0xff   : > { %3549 = vmatprep.subr.bf16.mxu1 %v4258_v35 }
 0x100   : > { %456 = vxpose.xlu0.b32.cont [6/16] %v429_v10, 128 }
 0x101   : > { %488 = vxpose.xlu1.b32.cont [6/16] %v430_v11, 128  ;;  %3527 = vmatpush3.bf16.msra.mxu0 %v3526_v41 }
 0x102   : > { %3551 = vmatpush3.bf16.msra.mxu1 %v3526_v41  ;;  %3528 = vmatprep.subr.bf16.mxu0 %v4258_v35 }
 0x103   : > { %3552 = vmatprep.subr.bf16.mxu1 %v4258_v35 }
 0x104   : > { %457 = vxpose.xlu0.b32.cont [7/16] %v431_v12, 128 }
 0x105   : > { %489 = vxpose.xlu1.b32.cont [7/16] %v432_v13, 128  ;;  %3530 = vmatpush3.bf16.msra.mxu0 %v3529_v44 }
 0x106   : > { %3554 = vmatpush3.bf16.msra.mxu1 %v3529_v44  ;;  %3531 = vmatprep.subr.bf16.mxu0 %v4258_v35 }
 0x107   : > { %3555 = vmatprep.subr.bf16.mxu1 %v4258_v35 }
 0x108   : > { %458 = vxpose.xlu0.b32.cont [8/16] %v433_v14, 128 }
 0x109   : > { %490 = vxpose.xlu1.b32.cont [8/16] %v434_v15, 128  ;;  %3533 = vmatpush3.bf16.msra.mxu0 %v3532_v47 }
 0x10a   : > { %3557 = vmatpush3.bf16.msra.mxu1 %v3532_v47  ;;  %3534 = vmatprep.subr.bf16.mxu0 %v4258_v35 }
 0x10b   : > { %3558 = vmatprep.subr.bf16.mxu1 %v4258_v35 }
 0x10c   : > { %459 = vxpose.xlu0.b32.cont [9/16] %v435_v16, 128 }
 0x10d   : > { %491 = vxpose.xlu1.b32.cont [9/16] %v436_v17, 128  ;;  %3536 = vmatpush3.bf16.msra.mxu0 %v3535_v50 }
 0x10e   : > { %3560 = vmatpush3.bf16.msra.mxu1 %v3535_v50  ;;  %3537 = vmatprep.subr.bf16.mxu0 %v4258_v35 }
 0x10f   : > { %3561 = vmatprep.subr.bf16.mxu1 %v4258_v35 }
 0x110   : > { %460 = vxpose.xlu0.b32.cont [10/16] %v437_v18, 128 }
 0x111   : > { %492 = vxpose.xlu1.b32.cont [10/16] %v438_v19, 128  ;;  %3539 = vmatpush3.bf16.msra.mxu0 %v3538_v54 }
 0x112   : > { %3563 = vmatpush3.bf16.msra.mxu1 %v3538_v54  ;;  %3540 = vmatprep.subr.bf16.mxu0 %v4258_v35 }
 0x113   : > { %3564 = vmatprep.subr.bf16.mxu1 %v4258_v35 }
 0x114   : > { %461 = vxpose.xlu0.b32.cont [11/16] %v439_v20, 128 }
 0x115   : > { %493 = vxpose.xlu1.b32.cont [11/16] %v440_v21, 128  ;;  %3542 = vmatpush3.bf16.msra.mxu0 %v3541_v57 }
 0x116   : > { %3566 = vmatpush3.bf16.msra.mxu1 %v3541_v57 }
 0x118   : > { %462 = vxpose.xlu0.b32.cont [12/16] %v441_v22, 128 }
 0x119   : > { %494 = vxpose.xlu1.b32.cont [12/16] %v442_v23, 128 }
 0x11c   : > { %463 = vxpose.xlu0.b32.cont [13/16] %v443_v24, 128 }
 0x11d   : > { %495 = vxpose.xlu1.b32.cont [13/16] %v444_v25, 128 }
 0x120   : > { %464 = vxpose.xlu0.b32.cont [14/16] %v445_v26, 128 }
 0x121   : > { %496 = vxpose.xlu1.b32.cont [14/16] %v446_v27, 128 }
 0x124   : > { %465 = vxpose.xlu0.b32.cont [15/16] %v447_v28, 128 }
 0x125   : > { %497 = vxpose.xlu1.b32.cont [15/16] %v448_v29, 128 }
 0x128   : > { %466 = vxpose.xlu0.b32.end [16/16] %v449_v30, 128 }
 0x129   : > { %498 = vxpose.xlu1.b32.end [16/16] %v450_v31, 128 }
 0x16c   : > { %v4639_v58 = vpop.trf.xlu0 }
 0x16d   : > { %v4641_v59 = vpop.trf.xlu1 }
 0x170   : > { %v4643_v60 = vpop.trf.xlu0 }
 0x171   : > { %v4645_v61 = vpop.trf.xlu1  ;;  %v531_v9 = vadd.f32 %v4643_v60, %v4639_v58 }
 0x174   : > { %v4647_v62 = vpop.trf.xlu0 }
 0x175   : > { %v4651_v0 = vpop.trf.xlu1  ;;  %v532_v10 = vadd.f32 %v531_v9, %v4647_v62 }
 0x178   : > { %v4649_v63 = vpop.trf.xlu0 }
 0x179   : > { %v4655_v2 = vpop.trf.xlu1  ;;  %v533_v13 = vadd.f32 %v532_v10, %v4649_v63 }
 0x17c   : > { %v4653_v1 = vpop.trf.xlu0 }
 0x17d   : > { %v4661_v5 = vpop.trf.xlu1  ;;  %v534_v14 = vadd.f32 %v533_v13, %v4653_v1 }
 0x180   : > { %v4657_v3 = vpop.trf.xlu0 }
 0x181   : > { %v4665_v7 = vpop.trf.xlu1  ;;  %v535_v16 = vadd.f32 %v534_v14, %v4657_v3 }
 0x184   : > { %v4659_v4 = vpop.trf.xlu0 }
 0x185   : > { %v4674_v12 = vpop.trf.xlu1  ;;  %v536_v18 = vadd.f32 %v535_v16, %v4659_v4 }
 0x188   : > { %v4663_v6 = vpop.trf.xlu0 }
 0x189   : > { %v4681_v17 = vpop.trf.xlu1  ;;  %v537_v20 = vadd.f32 %v536_v18, %v4663_v6 }
 0x18c   : > { %v4667_v8 = vpop.trf.xlu0 }
 0x18d   : > { %v538_v21 = vadd.f32 %v537_v20, %v4667_v8  ;;  %v4690_v23 = vpop.trf.xlu1  ;;  %v3698_v20 = vld [vmem:[#allocation12] ss:$12 sps:$4 sm:$0xff]  }
 0x190   : > { %v4672_v11 = vpop.trf.xlu0 }
 0x191   : > { %v539_v24 = vadd.f32 %v538_v21, %v4672_v11  ;;  %v4697_v28 = vpop.trf.xlu1  ;;  %v3700_v21 = vld [vmem:[#allocation12 + $0x4] ss:$12 sps:$4 sm:$0xff]  }
 0x192   : > { %1086 = vmatprep.subr.bf16.mxu0 %v3700_v21 }
 0x194   : > { %v4678_v15 = vpop.trf.xlu0 }
 0x195   : > { %v540_v25 = vadd.f32 %v539_v24, %v4678_v15  ;;  %v4706_v34 = vpop.trf.xlu1  ;;  %v4735_v24 = vld [vmem:[#allocation12 + $0x8] ss:$12 sps:$4 sm:$0xff]  }
 0x196   : > { %3423 = vmatprep.subr.bf16.mxu1 %v4735_v24 }
 0x198   : > { %v4684_v19 = vpop.trf.xlu0 }
 0x199   : > { %v541_v27 = vadd.f32 %v540_v25, %v4684_v19  ;;  %v4711_v38 = vpop.trf.xlu1  ;;  %v3704_v25 = vld [vmem:[#allocation12 + $0x1c] ss:$12 sps:$4 sm:$0xff]  }
 0x19c   : > { %v4688_v22 = vpop.trf.xlu0 }
 0x19d   : > { %v542_v29 = vadd.f32 %v541_v27, %v4688_v22  ;;  %v4716_v42 = vpop.trf.xlu1  ;;  %v3702_v27 = vld [vmem:[#allocation12 + $0x18] ss:$12 sps:$4 sm:$0xff]  }
 0x1a0   : > { %v4694_v26 = vpop.trf.xlu0 }
 0x1a1   : > { %v543_v31 = vadd.f32 %v542_v29, %v4694_v26  ;;  %v4721_v46 = vpop.trf.xlu1  ;;  %v639_v29 = vlaneseq }
 0x1a4   : > { %v4700_v30 = vpop.trf.xlu0 }
 0x1a5   : > { %v544_v32 = vadd.f32 %v543_v31, %v4700_v30  ;;  %v4726_v50 = vpop.trf.xlu1  ;;  %v4738_v31 = vshrl.u32 %v639_v29, 7 }
 0x1a8   : > { %v4704_v33 = vpop.trf.xlu0 }
 0x1a9   : > { %v545_v35 = vadd.f32 %v544_v32, %v4704_v33  ;;  %v4731_v54 = vpop.trf.xlu1 }
 0x1ab   : > { %v546_v36 = vadd.f32 %v545_v35, %v4641_v59 }
 0x1ad   : > { %v547_v37 = vadd.f32 %v546_v36, %v4645_v61  ;;  %v4741_v36 = vsub.s32 0, %v4738_v31 }
 0x1af   : > { %v548_v39 = vadd.f32 %v547_v37, %v4651_v0 }
 0x1b1   : > { %v549_v40 = vadd.f32 %v548_v39, %v4655_v2 }
 0x1b3   : > { %v550_v41 = vadd.f32 %v549_v40, %v4661_v5 }
 0x1b5   : > { %v551_v43 = vadd.f32 %v550_v41, %v4665_v7 }
 0x1b7   : > { %v552_v44 = vadd.f32 %v551_v43, %v4674_v12 }
 0x1b9   : > { %v553_v45 = vadd.f32 %v552_v44, %v4681_v17 }
 0x1bb   : > { %v554_v47 = vadd.f32 %v553_v45, %v4690_v23 }
 0x1bd   : > { %v555_v48 = vadd.f32 %v554_v47, %v4697_v28 }
 0x1bf   : > { %v556_v49 = vadd.f32 %v555_v48, %v4706_v34 }
 0x1c1   : > { %v557_v51 = vadd.f32 %v556_v49, %v4711_v38 }
 0x1c3   : > { %v558_v52 = vadd.f32 %v557_v51, %v4716_v42 }
 0x1c5   : > { %v559_v53 = vadd.f32 %v558_v52, %v4721_v46 }
 0x1c7   : > { %v560_v55 = vadd.f32 %v559_v53, %v4726_v50 }
 0x1c9   : > { %v561_v56 = vadd.f32 %v560_v55, %v4731_v54 }
 0x1cb   : > { %v562_v57 = vrot.slane %v561_v56, 4 }
 0x1cd   : > { %v563_v9 = vadd.f32 %v562_v57, %v561_v56 }
 0x1cf   : > { %v564_v10 = vrot.slane %v563_v9, 2 }
 0x1d1   : > { %v565_v13 = vadd.f32 %v564_v10, %v563_v9 }
 0x1d3   : > { %v566_v14 = vrot.slane %v565_v13, 1 }
 0x1d5   : > { %v567_v16 = vadd.f32 %v566_v14, %v565_v13 }
 0x1d7   : > { %v568_v18 = vmul.f32 0.00390625, %v567_v16 }
 0x1d9   : > { %3386 = vmatmul.mubr.f32.vlgmr.msra.gmra.mrb[0].mxu0 %v568_v18 }
 0x1da   : > { %1087 = vmatpush1.bf16.msra.mxu0 %v3698_v20 }
 0x1db   : > { %1088 = vmatprep.subr.bf16.mxu0 %v3704_v25 }
 0x1de   : > { %1089 = vmatpush1.bf16.msra.mxu0 %v3702_v27 }
 0x2ac   : > { %v635_v32 = vpop.f32.mrb[0].mxu0 }
 0x2ad   : > { %v3387_v35 = vpop.f32.mrb[1].mxu0  ;;  %v4744_v37 = vrot.slane %v635_v32, %v4741_v36 }
 0x2af   : > { %v4748_v39 = vsub.f32 %v4639_v58, %v4744_v37  ;;  %v4752_v40 = vsub.f32 %v4643_v60, %v4744_v37  ;;  %v4756_v41 = vsub.f32 %v4647_v62, %v4744_v37  ;;  %v4764_v45 = vsub.f32 %v4649_v63, %v4744_v37 }
 0x2b0   : > { %v4768_v58 = vsub.f32 %v4653_v1, %v4744_v37  ;;  %v4774_v62 = vsub.f32 %v4657_v3, %v4744_v37  ;;  %v4780_v63 = vsub.f32 %v4659_v4, %v4744_v37  ;;  %v4786_v52 = vsub.f32 %v4663_v6, %v4744_v37 }
 0x2b1   : > { %v675_v43 = vmul.f32 %v4748_v39, %v4748_v39  ;;  %v676_v44 = vmul.f32 %v4752_v40, %v4752_v40  ;;  %v677_v60 = vmul.f32 %v4756_v41, %v4756_v41  ;;  %v678_v48 = vmul.f32 %v4764_v45, %v4764_v45 }
 0x2b2   : > { %v679_v1 = vmul.f32 %v4768_v58, %v4768_v58  ;;  %v680_v3 = vmul.f32 %v4774_v62, %v4774_v62  ;;  %v4792_v55 = vsub.f32 %v4667_v8, %v4744_v37  ;;  %v681_v4 = vmul.f32 %v4780_v63, %v4780_v63 }
 0x2b3   : > { %v707_v47 = vadd.f32 %v676_v44, %v675_v43  ;;  %v4798_v57 = vsub.f32 %v4672_v11, %v4744_v37  ;;  %v682_v6 = vmul.f32 %v4786_v52, %v4786_v52  ;;  %v4804_v10 = vsub.f32 %v4678_v15, %v4744_v37 }
 0x2b4   : > { %v683_v8 = vmul.f32 %v4792_v55, %v4792_v55  ;;  %v4810_v14 = vsub.f32 %v4684_v19, %v4744_v37  ;;  %v4816_v18 = vsub.f32 %v4688_v22, %v4744_v37  ;;  %v4822_v21 = vsub.f32 %v4694_v26, %v4744_v37 }
 0x2b5   : > { %v708_v49 = vadd.f32 %v707_v47, %v677_v60  ;;  %v684_v11 = vmul.f32 %v4798_v57, %v4798_v57  ;;  %v685_v15 = vmul.f32 %v4804_v10, %v4804_v10  ;;  %v4828_v27 = vsub.f32 %v4700_v30, %v4744_v37 }
 0x2b6   : > { %v686_v19 = vmul.f32 %v4810_v14, %v4810_v14  ;;  %v687_v22 = vmul.f32 %v4816_v18, %v4816_v18  ;;  %v4834_v32 = vsub.f32 %v4704_v33, %v4744_v37  ;;  %v688_v26 = vmul.f32 %v4822_v21, %v4822_v21 }
 0x2b7   : > { %v709_v51 = vadd.f32 %v708_v49, %v678_v48  ;;  %v4840_v43 = vsub.f32 %v4641_v59, %v4744_v37  ;;  %v689_v30 = vmul.f32 %v4828_v27, %v4828_v27  ;;  %v4846_v60 = vsub.f32 %v4645_v61, %v4744_v37 }
 0x2b8   : > { %v690_v33 = vmul.f32 %v4834_v32, %v4834_v32  ;;  %v4852_v48 = vsub.f32 %v4651_v0, %v4744_v37 }
 0x2b9   : > { %v710_v53 = vadd.f32 %v709_v51, %v679_v1  ;;  %v691_v59 = vmul.f32 %v4840_v43, %v4840_v43  ;;  %v4858_v1 = vsub.f32 %v4655_v2, %v4744_v37  ;;  %v692_v61 = vmul.f32 %v4846_v60, %v4846_v60 }
 0x2ba   : > { %v693_v0 = vmul.f32 %v4852_v48, %v4852_v48 }
 0x2bb   : > { %v711_v56 = vadd.f32 %v710_v53, %v680_v3  ;;  %v4864_v3 = vsub.f32 %v4661_v5, %v4744_v37  ;;  %v694_v2 = vmul.f32 %v4858_v1, %v4858_v1 }
 0x2bd   : > { %v712_v9 = vadd.f32 %v711_v56, %v681_v4  ;;  %v4870_v4 = vsub.f32 %v4665_v7, %v4744_v37  ;;  %v695_v5 = vmul.f32 %v4864_v3, %v4864_v3 }
 0x2bf   : > { %v713_v13 = vadd.f32 %v712_v9, %v682_v6  ;;  %v4876_v6 = vsub.f32 %v4674_v12, %v4744_v37  ;;  %v696_v7 = vmul.f32 %v4870_v4, %v4870_v4 }
 0x2c1   : > { %v714_v16 = vadd.f32 %v713_v13, %v683_v8  ;;  %v4882_v8 = vsub.f32 %v4681_v17, %v4744_v37  ;;  %v697_v12 = vmul.f32 %v4876_v6, %v4876_v6 }
 0x2c3   : > { %v715_v20 = vadd.f32 %v714_v16, %v684_v11  ;;  %v4888_v11 = vsub.f32 %v4690_v23, %v4744_v37  ;;  %v698_v17 = vmul.f32 %v4882_v8, %v4882_v8 }
 0x2c5   : > { %v716_v25 = vadd.f32 %v715_v20, %v685_v15  ;;  %v4894_v15 = vsub.f32 %v4697_v28, %v4744_v37  ;;  %v699_v23 = vmul.f32 %v4888_v11, %v4888_v11 }
 0x2c7   : > { %v717_v29 = vadd.f32 %v716_v25, %v686_v19  ;;  %v4900_v19 = vsub.f32 %v4706_v34, %v4744_v37  ;;  %v700_v28 = vmul.f32 %v4894_v15, %v4894_v15 }
 0x2c9   : > { %v718_v35 = vadd.f32 %v717_v29, %v687_v22  ;;  %v4906_v22 = vsub.f32 %v4711_v38, %v4744_v37  ;;  %v701_v34 = vmul.f32 %v4900_v19, %v4900_v19 }
 0x2cb   : > { %v719_v44 = vadd.f32 %v718_v35, %v688_v26  ;;  %v4912_v26 = vsub.f32 %v4716_v42, %v4744_v37  ;;  %v702_v38 = vmul.f32 %v4906_v22, %v4906_v22 }
 0x2cd   : > { %v720_v47 = vadd.f32 %v719_v44, %v689_v30  ;;  %v4918_v30 = vsub.f32 %v4721_v46, %v4744_v37  ;;  %v703_v42 = vmul.f32 %v4912_v26, %v4912_v26 }
 0x2cf   : > { %v721_v49 = vadd.f32 %v720_v47, %v690_v33  ;;  %v4924_v33 = vsub.f32 %v4726_v50, %v4744_v37  ;;  %v704_v46 = vmul.f32 %v4918_v30, %v4918_v30 }
 0x2d1   : > { %v722_v51 = vadd.f32 %v721_v49, %v691_v59  ;;  %v4930_v59 = vsub.f32 %v4731_v54, %v4744_v37 }
 0x2d3   : > { %v723_v53 = vadd.f32 %v722_v51, %v692_v61  ;;  %v705_v61 = vmul.f32 %v4924_v33, %v4924_v33  ;;  %v706_v50 = vmul.f32 %v4930_v59, %v4930_v59 }
 0x2d5   : > { %v724_v56 = vadd.f32 %v723_v53, %v693_v0 }
 0x2d7   : > { %v725_v9 = vadd.f32 %v724_v56, %v694_v2 }
 0x2d9   : > { %v726_v13 = vadd.f32 %v725_v9, %v695_v5 }
 0x2db   : > { %v727_v16 = vadd.f32 %v726_v13, %v696_v7  ;;  %v3705_v13 = vld [vmem:[#allocation12 + $0x20] ss:$12 sps:$4 sm:$0xff]  }
 0x2dd   : > { %v728_v20 = vadd.f32 %v727_v16, %v697_v12  ;;  %v3708_v12 = vld [vmem:[#allocation12 + $0x34] ss:$12 sps:$4 sm:$0xff]   ;;  %v3706_v16 = vld [vmem:[#allocation12 + $0x30] ss:$12 sps:$4 sm:$0xff]  }
 0x2de   : > { %1090 = vmatprep.subr.bf16.mxu0 %v3708_v12  ;;  %v4951_v12 = vld [vmem:[#allocation9] ss:$0 sm:$0xff] }
 0x2df   : > { %v729_v25 = vadd.f32 %v728_v20, %v698_v17  ;;  %v3709_v17 = vld [vmem:[#allocation12 + $0x38] ss:$12 sps:$4 sm:$0xff]   ;;  %1091 = vmatpush1.bf16.msra.mxu0 %v3706_v16 }
 0x2e0   : > { %v3712_v20 = vld [vmem:[#allocation12 + $0x4c] ss:$12 sps:$4 sm:$0xff]  }
 0x2e1   : > { %v730_v29 = vadd.f32 %v729_v25, %v699_v23  ;;  %v3710_v23 = vld [vmem:[#allocation12 + $0x48] ss:$12 sps:$4 sm:$0xff]   ;;  %v3713_v25 = vld [vmem:[#allocation12 + $0x50] ss:$12 sps:$4 sm:$0xff]   ;;  %1092 = vmatprep.subr.bf16.mxu0 %v3712_v20 }
 0x2e3   : > { %v731_v35 = vadd.f32 %v730_v29, %v700_v28  ;;  %1093 = vmatpush1.bf16.msra.mxu0 %v3710_v23  ;;  %v3716_v28 = vld [vmem:[#allocation12 + $0x64] ss:$12 sps:$4 sm:$0xff]   ;;  %v3714_v29 = vld [vmem:[#allocation12 + $0x60] ss:$12 sps:$4 sm:$0xff]  }
 0x2e4   : > { %1094 = vmatprep.subr.bf16.mxu0 %v3716_v28 }
 0x2e5   : > { %v732_v44 = vadd.f32 %v731_v35, %v701_v34  ;;  %v3717_v34 = vld [vmem:[#allocation12 + $0x68] ss:$12 sps:$4 sm:$0xff]   ;;  %v3718_v35 = vld [vmem:[#allocation12 + $0x78] ss:$12 sps:$4 sm:$0xff]  }
 0x2e7   : > { %v733_v47 = vadd.f32 %v732_v44, %v702_v38  ;;  %1095 = vmatpush1.bf16.msra.mxu0 %v3714_v29  ;;  %v3721_v38 = vld [vmem:[#allocation12 + $0x80] ss:$12 sps:$4 sm:$0xff]  }
 0x2e8   : > { %v3724_v44 = vld [vmem:[#allocation12 + $0x94] ss:$12 sps:$4 sm:$0xff]  }
 0x2e9   : > { %v734_v49 = vadd.f32 %v733_v47, %v703_v42  ;;  %v3722_v42 = vld [vmem:[#allocation12 + $0x90] ss:$12 sps:$4 sm:$0xff]   ;;  %v3725_v47 = vld [vmem:[#allocation12 + $0x98] ss:$12 sps:$4 sm:$0xff]  }
 0x2eb   : > { %v735_v51 = vadd.f32 %v734_v49, %v704_v46  ;;  %v3728_v46 = vld [vmem:[#allocation12 + $0xac] ss:$12 sps:$4 sm:$0xff]   ;;  %v3726_v49 = vld [vmem:[#allocation12 + $0xa8] ss:$12 sps:$4 sm:$0xff]  }
 0x2ed   : > { %v736_v0 = vadd.f32 %v735_v51, %v705_v61  ;;  %v3729_v61 = vld [vmem:[#allocation12 + $0xb0] ss:$12 sps:$4 sm:$0xff]   ;;  %v4261_v51 = vmov 0  }
 0x2ee   : > { %1118 = vmatprep.mubr.bf16.mxu0 %v4261_v51 }
 0x2ef   : > { %v737_v53 = vadd.f32 %v736_v0, %v706_v50 }
 0x2f1   : > { %v738_v2 = vrot.slane %v737_v53, 4 }
 0x2f3   : > { %v739_v56 = vadd.f32 %v738_v2, %v737_v53 }
 0x2f5   : > { %v740_v5 = vrot.slane %v739_v56, 2 }
 0x2f7   : > { %v741_v9 = vadd.f32 %v740_v5, %v739_v56  ;;  %v816_v56 = vld [vmem:[#allocation7] sm:$0x1] }
 0x2f9   : > { %v742_v7 = vrot.slane %v741_v9, 1 }
 0x2fb   : > { %v743_v54 = vadd.f32 %v742_v7, %v741_v9 }
 0x2fd   : > { %v744_v37 = vmul.f32 0.00390625, %v743_v54 }
 0x2ff   : > { %3421 = vmatmul.mubr.f32.vlgmr.msra.gmra.mrb[0].mxu1 %v744_v37 }
 0x300   : > { %3424 = vmatpush3.bf16.msra.mxu1 %v4735_v24  ;;  %v3720_v24 = vld [vmem:[#allocation12 + $0x7c] ss:$12 sps:$4 sm:$0xff]  }
 0x301   : > { %3425 = vmatprep.subr.bf16.mxu1 %v3705_v13  ;;  %1096 = vmatprep.subr.bf16.mxu0 %v3720_v24 }
 0x302   : > { %1097 = vmatpush1.bf16.msra.mxu0 %v3718_v35 }
 0x303   : > { %1098 = vmatprep.subr.bf16.mxu0 %v3724_v44 }
 0x304   : > { %3426 = vmatpush3.bf16.msra.mxu1 %v3705_v13 }
 0x305   : > { %3427 = vmatprep.subr.bf16.mxu1 %v3709_v17 }
 0x306   : > { %1099 = vmatpush1.bf16.msra.mxu0 %v3722_v42 }
 0x307   : > { %1100 = vmatprep.subr.bf16.mxu0 %v3728_v46 }
 0x308   : > { %3428 = vmatpush3.bf16.msra.mxu1 %v3709_v17 }
 0x309   : > { %3429 = vmatprep.subr.bf16.mxu1 %v3713_v25 }
 0x30a   : > { %1101 = vmatpush1.bf16.msra.mxu0 %v3726_v49 }
 0x30c   : > { %3430 = vmatpush3.bf16.msra.mxu1 %v3713_v25 }
 0x30d   : > { %3431 = vmatprep.subr.bf16.mxu1 %v3717_v34 }
 0x310   : > { %3432 = vmatpush3.bf16.msra.mxu1 %v3717_v34 }
 0x311   : > { %3433 = vmatprep.subr.bf16.mxu1 %v3721_v38 }
 0x314   : > { %3434 = vmatpush3.bf16.msra.mxu1 %v3721_v38 }
 0x315   : > { %3435 = vmatprep.subr.bf16.mxu1 %v3725_v47 }
 0x318   : > { %3436 = vmatpush3.bf16.msra.mxu1 %v3725_v47 }
 0x319   : > { %3437 = vmatprep.subr.bf16.mxu1 %v3729_v61 }
 0x31c   : > { %3438 = vmatpush3.bf16.msra.mxu1 %v3729_v61 }
 0x3d2   : > { %v811_v50 = vpop.f32.mrb[0].mxu1 }
 0x3d3   : > { %v812_v0 = vadd.f32 1e-05, %v811_v50  ;;  %v3422_v53 = vpop.f32.mrb[1].mxu1 }
 0x3d5   : > { %3738 = vrsqrt.f32 %v812_v0 }
 0x3df   : > { %v3739_v2 = vpop.eup %3738 }
 0x3e0   : > { %v817_v5 = vmul.f32 %v3739_v2, %v816_v56 }
 0x3e2   : > { %v4941_v9 = vrot.slane %v817_v5, %v4741_v36 }
 0x3e4   : > { %v822_v7 = vmul.f32 %v4941_v9, %v4748_v39  ;;  %v823_v54 = vmul.f32 %v4941_v9, %v4752_v40  ;;  %v824_v37 = vmul.f32 %v4941_v9, %v4756_v41  ;;  %v825_v13 = vmul.f32 %v4941_v9, %v4764_v45 }
 0x3e5   : > { %v826_v16 = vmul.f32 %v4941_v9, %v4768_v58  ;;  %v827_v17 = vmul.f32 %v4941_v9, %v4774_v62  ;;  %v828_v58 = vmul.f32 %v4941_v9, %v4780_v63  ;;  %v829_v62 = vmul.f32 %v4941_v9, %v4786_v52 }
 0x3e6   : > { %v861_v20 = vadd.f32 %v4951_v12, %v822_v7  ;;  %v862_v39 = vadd.f32 %v4951_v12, %v823_v54  ;;  %v863_v40 = vadd.f32 %v4951_v12, %v824_v37  ;;  %v864_v23 = vadd.f32 %v4951_v12, %v825_v13 }
 0x3e7   : > { %v865_v41 = vadd.f32 %v4951_v12, %v826_v16  ;;  %v866_v45 = vadd.f32 %v4951_v12, %v827_v17  ;;  %v830_v29 = vmul.f32 %v4941_v9, %v4792_v55  ;;  %v831_v34 = vmul.f32 %v4941_v9, %v4798_v57 }
 0x3e8   : > { %v893_v25 = vpack.c.bf16 %v862_v39, %v861_v20  ;;  %v894_v28 = vpack.c.bf16 %v864_v23, %v863_v40  ;;  %v867_v35 = vadd.f32 %v4951_v12, %v828_v58  ;;  %v868_v63 = vadd.f32 %v4951_v12, %v829_v62 }
 0x3e9   : > { %v895_v24 = vpack.c.bf16 %v866_v45, %v865_v41  ;;  %v869_v38 = vadd.f32 %v4951_v12, %v830_v29  ;;  %v870_v52 = vadd.f32 %v4951_v12, %v831_v34  ;;  %v832_v55 = vmul.f32 %v4941_v9, %v4804_v10 }
 0x3ea   : > { %1119 = vmatmul.mubr.bf16.vlgmr.msra.gmra.mrb[4].mxu0 %v893_v25  ;;  %3439 = vmatprep.mubr.bf16.mxu1 %v893_v25  ;;  %v833_v57 = vmul.f32 %v4941_v9, %v4810_v14  ;;  %v896_v44 = vpack.c.bf16 %v868_v63, %v867_v35  ;;  %v834_v42 = vmul.f32 %v4941_v9, %v4816_v18 }
 0x3eb   : > { %3440 = vmatmul.mubr.bf16.vlgmr.msra.gmra.mrb[4].mxu1 %v894_v28  ;;  %1128 = vmatprep.mubr.bf16.mxu0 %v4261_v51  ;;  %v835_v47 = vmul.f32 %v4941_v9, %v4822_v21  ;;  %v897_v46 = vpack.c.bf16 %v870_v52, %v869_v38  ;;  %v871_v49 = vadd.f32 %v4951_v12, %v832_v55 }
 0x3ec   : > { %3443 = vmatprep.mubr.bf16.mxu1 %v895_v24  ;;  %v872_v10 = vadd.f32 %v4951_v12, %v833_v57  ;;  %v873_v61 = vadd.f32 %v4951_v12, %v834_v42  ;;  %v836_v18 = vmul.f32 %v4941_v9, %v4828_v27  ;;  %v837_v21 = vmul.f32 %v4941_v9, %v4834_v32 }
 0x3ed   : > { %v874_v14 = vadd.f32 %v4951_v12, %v835_v47  ;;  %v838_v0 = vmul.f32 %v4941_v9, %v4840_v43  ;;  %v839_v53 = vmul.f32 %v4941_v9, %v4846_v60  ;;  %v840_v43 = vmul.f32 %v4941_v9, %v4852_v48 }
 0x3ee   : > { %v898_v50 = vpack.c.bf16 %v872_v10, %v871_v49  ;;  %v875_v56 = vadd.f32 %v4951_v12, %v836_v18  ;;  %v876_v27 = vadd.f32 %v4951_v12, %v837_v21  ;;  %v841_v60 = vmul.f32 %v4941_v9, %v4858_v1 }
 0x3ef   : > { %v899_v2 = vpack.c.bf16 %v874_v14, %v873_v61  ;;  %v877_v5 = vadd.f32 %v4951_v12, %v838_v0  ;;  %v878_v32 = vadd.f32 %v4951_v12, %v839_v53  ;;  %v842_v54 = vmul.f32 %v4941_v9, %v4864_v3 }
 0x3f0   : > { %v900_v7 = vpack.c.bf16 %v876_v27, %v875_v56  ;;  %v843_v37 = vmul.f32 %v4941_v9, %v4870_v4  ;;  %v879_v16 = vadd.f32 %v4951_v12, %v840_v43  ;;  %v880_v48 = vadd.f32 %v4951_v12, %v841_v60 }
 0x3f1   : > { %v901_v13 = vpack.c.bf16 %v878_v32, %v877_v5  ;;  %v881_v17 = vadd.f32 %v4951_v12, %v842_v54  ;;  %v844_v3 = vmul.f32 %v4941_v9, %v4876_v6  ;;  %v845_v4 = vmul.f32 %v4941_v9, %v4882_v8 }
 0x3f2   : > { %1129 = vmatmul.mubr.bf16.gmra.mrb[8].mxu0 %v894_v28  ;;  %v882_v1 = vadd.f32 %v4951_v12, %v843_v37  ;;  %v902_v20 = vpack.c.bf16 %v880_v48, %v879_v16  ;;  %v846_v39 = vmul.f32 %v4941_v9, %v4888_v11  ;;  %v847_v40 = vmul.f32 %v4941_v9, %v4894_v15 }
 0x3f3   : > { %3444 = vmatmul.mubr.bf16.gmra.mrb[8].mxu1 %v896_v44  ;;  %1138 = vmatprep.mubr.bf16.mxu0 %v4261_v51  ;;  %v883_v41 = vadd.f32 %v4951_v12, %v844_v3  ;;  %v884_v6 = vadd.f32 %v4951_v12, %v845_v4  ;;  %v848_v11 = vmul.f32 %v4941_v9, %v4900_v19 }
 0x3f4   : > { %3447 = vmatprep.mubr.bf16.mxu1 %v897_v46  ;;  %v903_v23 = vpack.c.bf16 %v882_v1, %v881_v17  ;;  %v885_v45 = vadd.f32 %v4951_v12, %v846_v39  ;;  %v886_v8 = vadd.f32 %v4951_v12, %v847_v40  ;;  %v849_v15 = vmul.f32 %v4941_v9, %v4906_v22 }
 0x3f5   : > { %v904_v25 = vpack.c.bf16 %v884_v6, %v883_v41  ;;  %v850_v28 = vmul.f32 %v4941_v9, %v4912_v26  ;;  %v851_v58 = vmul.f32 %v4941_v9, %v4918_v30  ;;  %v887_v29 = vadd.f32 %v4951_v12, %v848_v11 }
 0x3f6   : > { %v905_v62 = vpack.c.bf16 %v886_v8, %v885_v45  ;;  %v888_v19 = vadd.f32 %v4951_v12, %v849_v15  ;;  %v852_v26 = vmul.f32 %v4941_v9, %v4924_v33  ;;  %v853_v30 = vmul.f32 %v4941_v9, %v4930_v59  ;;  %v941_v33 = vld [vmem:[#allocation13] sm:$0x7] }
 0x3f7   : > { %v889_v34 = vadd.f32 %v4951_v12, %v850_v28  ;;  %v890_v22 = vadd.f32 %v4951_v12, %v851_v58  ;;  %v949_v59 = vsub.s32 1, %v4738_v31  ;;  %v953_v9 = vsub.s32 2, %v4738_v31 }
 0x3f8   : > { %v891_v63 = vadd.f32 %v4951_v12, %v852_v26  ;;  %v892_v38 = vadd.f32 %v4951_v12, %v853_v30  ;;  %v5059_v12 = vrot.slane %v941_v33, %v4741_v36 }
 0x3f9   : > { %v907_v35 = vpack.c.bf16 %v890_v22, %v889_v34  ;;  %v5061_v57 = vrot.slane %v941_v33, %v949_v59 }
 0x3fa   : > { %1139 = vmatmul.mubr.bf16.gmra.mrb[12].mxu0 %v895_v24  ;;  %v906_v24 = vpack.c.bf16 %v888_v19, %v887_v29  ;;  %v908_v52 = vpack.c.bf16 %v892_v38, %v891_v63 }
 0x3fb   : > { %3448 = vmatmul.mubr.bf16.gmra.mrb[12].mxu1 %v898_v50  ;;  %1148 = vmatprep.mubr.bf16.mxu0 %v4261_v51 }
 0x3fc   : > { %3451 = vmatprep.mubr.bf16.mxu1 %v899_v2 }
 0x402   : > { %1149 = vmatmul.mubr.bf16.gmra.mrb[16].mxu0 %v896_v44  ;;  %v5063_v44 = vrot.slane %v941_v33, %v953_v9 }
 0x403   : > { %3452 = vmatmul.mubr.bf16.gmra.mrb[16].mxu1 %v900_v7  ;;  %1158 = vmatprep.mubr.bf16.mxu0 %v4261_v51 }
 0x404   : > { %3455 = vmatprep.mubr.bf16.mxu1 %v901_v13 }
 0x40a   : > { %1159 = vmatmul.mubr.bf16.gmra.mrb[20].mxu0 %v897_v46 }
 0x40b   : > { %3456 = vmatmul.mubr.bf16.gmra.mrb[20].mxu1 %v902_v20  ;;  %1168 = vmatprep.mubr.bf16.mxu0 %v4261_v51 }
 0x40c   : > { %3459 = vmatprep.mubr.bf16.mxu1 %v903_v23 }
 0x412   : > { %1169 = vmatmul.mubr.bf16.gmra.mrb[24].mxu0 %v898_v50 }
 0x413   : > { %3460 = vmatmul.mubr.bf16.gmra.mrb[24].mxu1 %v904_v25  ;;  %1178 = vmatprep.mubr.bf16.mxu0 %v4261_v51 }
 0x414   : > { %3463 = vmatprep.mubr.bf16.mxu1 %v905_v62 }
 0x41a   : > { %1179 = vmatmul.mubr.bf16.gmra.mrb[28].mxu0 %v899_v2 }
 0x41b   : > { %3464 = vmatmul.mubr.bf16.gmra.mrb[28].mxu1 %v906_v24  ;;  %1188 = vmatprep.mubr.bf16.mxu0 %v4261_v51 }
 0x41c   : > { %3467 = vmatprep.mubr.bf16.mxu1 %v907_v35 }
 0x422   : > { %1189 = vmatmul.mubr.bf16.gmra.mrb[32].mxu0 %v900_v7 }
 0x423   : > { %3468 = vmatmul.mubr.bf16.gmra.mrb[32].mxu1 %v908_v52  ;;  %1198 = vmatprep.mubr.bf16.mxu0 %v4261_v51 }
 0x42a   : > { %1199 = vmatmul.mubr.bf16.gmra.mrb[36].mxu0 %v901_v13 }
 0x42b   : > { %1208 = vmatprep.mubr.bf16.mxu0 %v4261_v51 }
 0x432   : > { %1209 = vmatmul.mubr.bf16.gmra.mrb[40].mxu0 %v902_v20 }
 0x433   : > { %1218 = vmatprep.mubr.bf16.mxu0 %v4261_v51 }
 0x43a   : > { %1219 = vmatmul.mubr.bf16.gmra.mrb[44].mxu0 %v903_v23 }
 0x43b   : > { %1228 = vmatprep.mubr.bf16.mxu0 %v4261_v51 }
 0x442   : > { %1229 = vmatmul.mubr.bf16.gmra.mrb[48].mxu0 %v904_v25 }
 0x443   : > { %1238 = vmatprep.mubr.bf16.mxu0 %v4261_v51 }
 0x44a   : > { %1239 = vmatmul.mubr.bf16.gmra.mrb[52].mxu0 %v905_v62 }
 0x44b   : > { %1248 = vmatprep.mubr.bf16.mxu0 %v4261_v51 }
 0x452   : > { %1249 = vmatmul.mubr.bf16.gmra.mrb[56].mxu0 %v906_v24 }
 0x453   : > { %1258 = vmatprep.mubr.bf16.mxu0 %v4261_v51 }
 0x45a   : > { %1259 = vmatmul.mubr.bf16.gmra.mrb[60].mxu0 %v907_v35 }
 0x45b   : > { %1268 = vmatprep.mubr.bf16.mxu0 %v4261_v51 }
 0x462   : > { %1269 = vmatmul.mubr.bf16.gmra.mrb[64].mxu0 %v908_v52 }
 0x4bd   : > { %v1120_v55 = vpop.f32.mrb[4].mxu0 }
 0x4be   : > { %v1122_v42 = vpop.f32.mrb[5].mxu0  ;;  %v3441_v47 = vpop.f32.mrb[4].mxu1  ;;  %v1121_v51 = vadd.f32 %v1120_v55, %v5059_v12 }
 0x4bf   : > { %v1124_v46 = vpop.f32.mrb[6].mxu0  ;;  %v1313_v49 = vpop.f32.mrb[5].mxu1  ;;  %v5068_v31 = vadd.f32 %v1122_v42, %v5061_v57  ;;  %v5071_v36 = vadd.f32 %v3441_v47, %v5063_v44 }
 0x4c0   : > { %v1125_v10 = vadd.f32 %v1124_v46, %v5059_v12  ;;  %v1126_v61 = vpop.f32.mrb[7].mxu0  ;;  %v3442_v14 = vpop.f32.mrb[6].mxu1  ;;  %v5082_v53 = vadd.f32 %v1313_v49, %v5063_v44 }
 0x4c1   : > { %v5074_v18 = vadd.f32 %v1126_v61, %v5061_v57  ;;  %v5077_v21 = vadd.f32 %v3442_v14, %v5063_v44  ;;  %v1316_v50 = vpop.f32.mrb[7].mxu1 }
 0x4c2   : > { %v5079_v0 = vpack.c.bf16 %v1125_v10, %v1121_v51  ;;  %v5085_v2 = vadd.f32 %v1316_v50, %v5063_v44 }
 0x4c3   : > { %v1441_v56 = vpack.c.bf16 %v5074_v18, %v5068_v31  ;;  %v1445_v27 = vpack.c.bf16 %v5077_v21, %v5071_v36 }
 0x4c4   : > { %v1442_v5 = vpack.c.bf16 %v5085_v2, %v5082_v53  ;;  %3185 = vmatprep.mubr.bf16.mxu1 %v5079_v0 }
 0x4c5   : > { %v1130_v32 = vpop.f32.mrb[8].mxu0 }
 0x4c6   : > { %v1132_v43 = vpop.f32.mrb[9].mxu0  ;;  %v3445_v60 = vpop.f32.mrb[8].mxu1  ;;  %v1131_v37 = vadd.f32 %v1130_v32, %v5059_v12 }
 0x4c7   : > { %v1134_v7 = vpop.f32.mrb[10].mxu0  ;;  %v1329_v54 = vpop.f32.mrb[9].mxu1  ;;  %v5097_v17 = vadd.f32 %v1132_v43, %v5061_v57  ;;  %v5100_v1 = vadd.f32 %v3445_v60, %v5063_v44 }
 0x4c8   : > { %v1135_v13 = vadd.f32 %v1134_v7, %v5059_v12  ;;  %v1136_v16 = vpop.f32.mrb[11].mxu0  ;;  %v3446_v48 = vpop.f32.mrb[10].mxu1  ;;  %v5111_v40 = vadd.f32 %v1329_v54, %v5063_v44 }
 0x4c9   : > { %v5103_v3 = vadd.f32 %v1136_v16, %v5061_v57  ;;  %v5106_v4 = vadd.f32 %v3446_v48, %v5063_v44  ;;  %v1332_v20 = vpop.f32.mrb[11].mxu1 }
 0x4ca   : > { %v5108_v39 = vpack.c.bf16 %v1135_v13, %v1131_v37  ;;  %v5114_v23 = vadd.f32 %v1332_v20, %v5063_v44 }
 0x4cb   : > { %v1444_v41 = vpack.c.bf16 %v5103_v3, %v5097_v17  ;;  %v1451_v6 = vpack.c.bf16 %v5106_v4, %v5100_v1 }
 0x4cc   : > { %v1448_v45 = vpack.c.bf16 %v5114_v23, %v5111_v40 }
 0x4cd   : > { %v1140_v8 = vpop.f32.mrb[12].mxu0 }
 0x4ce   : > { %v1142_v11 = vpop.f32.mrb[13].mxu0  ;;  %v3449_v15 = vpop.f32.mrb[12].mxu1  ;;  %v1141_v58 = vadd.f32 %v1140_v8, %v5059_v12 }
 0x4cf   : > { %v1144_v25 = vpop.f32.mrb[14].mxu0  ;;  %v1345_v28 = vpop.f32.mrb[13].mxu1  ;;  %v5125_v34 = vadd.f32 %v1142_v11, %v5061_v57  ;;  %v5128_v22 = vadd.f32 %v3449_v15, %v5063_v44 }
 0x4d0   : > { %v1145_v62 = vadd.f32 %v1144_v25, %v5059_v12  ;;  %v1146_v29 = vpop.f32.mrb[15].mxu0  ;;  %v3450_v19 = vpop.f32.mrb[14].mxu1  ;;  %v5139_v63 = vadd.f32 %v1345_v28, %v5063_v44 }
 0x4d1   : > { %v5131_v26 = vadd.f32 %v1146_v29, %v5061_v57  ;;  %v5134_v30 = vadd.f32 %v3450_v19, %v5063_v44  ;;  %v1348_v24 = vpop.f32.mrb[15].mxu1 }
 0x4d2   : > { %v5136_v35 = vpack.c.bf16 %v1145_v62, %v1141_v58  ;;  %v5142_v38 = vadd.f32 %v1348_v24, %v5063_v44 }
 0x4d3   : > { %v1447_v52 = vpack.c.bf16 %v5131_v26, %v5125_v34  ;;  %v1457_v33 = vpack.c.bf16 %v5134_v30, %v5128_v22 }
 0x4d4   : > { %v1454_v59 = vpack.c.bf16 %v5142_v38, %v5139_v63 }
 0x4d5   : > { %v1150_v9 = vpop.f32.mrb[16].mxu0 }
 0x4d6   : > { %v1152_v55 = vpop.f32.mrb[17].mxu0  ;;  %v3453_v42 = vpop.f32.mrb[16].mxu1  ;;  %v1151_v49 = vadd.f32 %v1150_v9, %v5059_v12 }
 0x4d7   : > { %v1154_v47 = vpop.f32.mrb[18].mxu0  ;;  %v1361_v46 = vpop.f32.mrb[17].mxu1  ;;  %v5153_v14 = vadd.f32 %v1152_v55, %v5061_v57  ;;  %v5156_v50 = vadd.f32 %v3453_v42, %v5063_v44 }
 0x4d8   : > { %v1155_v51 = vadd.f32 %v1154_v47, %v5059_v12  ;;  %v1156_v10 = vpop.f32.mrb[19].mxu0  ;;  %v3454_v61 = vpop.f32.mrb[18].mxu1  ;;  %v5167_v54 = vadd.f32 %v1361_v46, %v5063_v44 }
 0x4d9   : > { %v5159_v32 = vadd.f32 %v1156_v10, %v5061_v57  ;;  %v5162_v43 = vadd.f32 %v3454_v61, %v5063_v44  ;;  %v1364_v60 = vpop.f32.mrb[19].mxu1 }
 0x4da   : > { %v5164_v7 = vpack.c.bf16 %v1155_v51, %v1151_v49  ;;  %v5170_v37 = vadd.f32 %v1364_v60, %v5063_v44 }
 0x4db   : > { %v1450_v13 = vpack.c.bf16 %v5159_v32, %v5153_v14  ;;  %v1463_v16 = vpack.c.bf16 %v5162_v43, %v5156_v50 }
 0x4dc   : > { %v1460_v48 = vpack.c.bf16 %v5170_v37, %v5167_v54 }
 0x4dd   : > { %v1160_v20 = vpop.f32.mrb[20].mxu0 }
 0x4de   : > { %v1162_v8 = vpop.f32.mrb[21].mxu0  ;;  %v3457_v11 = vpop.f32.mrb[20].mxu1  ;;  %v1161_v28 = vadd.f32 %v1160_v20, %v5059_v12 }
 0x4df   : > { %v1164_v15 = vpop.f32.mrb[22].mxu0  ;;  %v1377_v25 = vpop.f32.mrb[21].mxu1  ;;  %v5181_v19 = vadd.f32 %v1162_v8, %v5061_v57  ;;  %v1386_v24 = vadd.f32 %v3457_v11, %v5063_v44 }
 0x4e0   : > { %v1165_v58 = vadd.f32 %v1164_v15, %v5059_v12  ;;  %v1166_v62 = vpop.f32.mrb[23].mxu0  ;;  %v3458_v29 = vpop.f32.mrb[22].mxu1  ;;  %v1378_v46 = vadd.f32 %v1377_v25, %v5063_v44 }
 0x4e1   : > { %v5185_v9 = vadd.f32 %v1166_v62, %v5061_v57  ;;  %v1389_v55 = vadd.f32 %v3458_v29, %v5063_v44  ;;  %v1380_v42 = vpop.f32.mrb[23].mxu1 }
 0x4e2   : > { %v5188_v47 = vpack.c.bf16 %v1165_v58, %v1161_v28  ;;  %v1381_v49 = vadd.f32 %v1380_v42, %v5063_v44 }
 0x4e3   : > { %v1453_v51 = vpack.c.bf16 %v5185_v9, %v5181_v19  ;;  %v1469_v10 = vpack.c.bf16 %v1389_v55, %v1386_v24 }
 0x4e4   : > { %v1466_v61 = vpack.c.bf16 %v1381_v49, %v1378_v46 }
 0x4e5   : > { %v1170_v60 = vpop.f32.mrb[24].mxu0 }
 0x4e6   : > { %v1172_v20 = vpop.f32.mrb[25].mxu0  ;;  %v3461_v8 = vpop.f32.mrb[24].mxu1  ;;  %3217 = vmatprep.subr.bf16.mxu0 %v1466_v61  ;;  %v1171_v28 = vadd.f32 %v1170_v60, %v5059_v12 }
 0x4e7   : > { %v1174_v11 = vpop.f32.mrb[26].mxu0  ;;  %v1393_v15 = vpop.f32.mrb[25].mxu1  ;;  %3218 = vmatpush3.bf16.msra.mxu0 %v1442_v5  ;;  %v5200_v29 = vadd.f32 %v1172_v20, %v5061_v57  ;;  %v1402_v24 = vadd.f32 %v3461_v8, %v5063_v44 }
 0x4e8   : > { %v1175_v25 = vadd.f32 %v1174_v11, %v5059_v12  ;;  %v1176_v58 = vpop.f32.mrb[27].mxu0  ;;  %v3462_v62 = vpop.f32.mrb[26].mxu1  ;;  %3219 = vmatprep.subr.bf16.mxu0 %v1469_v10  ;;  %v1394_v2 = vadd.f32 %v1393_v15, %v5063_v44 }
 0x4e9   : > { %v5204_v55 = vadd.f32 %v1176_v58, %v5061_v57  ;;  %v1405_v42 = vadd.f32 %v3462_v62, %v5063_v44  ;;  %v1396_v46 = vpop.f32.mrb[27].mxu1 }
 0x4ea   : > { %v5207_v53 = vpack.c.bf16 %v1175_v25, %v1171_v28  ;;  %v1397_v5 = vadd.f32 %v1396_v46, %v5063_v44 }
 0x4eb   : > { %v1456_v49 = vpack.c.bf16 %v5204_v55, %v5200_v29  ;;  %v1475_v10 = vpack.c.bf16 %v1405_v42, %v1402_v24  ;;  %3220 = vmatpush3.bf16.msra.mxu0 %v1445_v27 }
 0x4ec   : > { %v1472_v61 = vpack.c.bf16 %v1397_v5, %v1394_v2 }
 0x4ed   : > { %v1180_v60 = vpop.f32.mrb[28].mxu0 }
 0x4ee   : > { %v1182_v20 = vpop.f32.mrb[29].mxu0  ;;  %v3465_v8 = vpop.f32.mrb[28].mxu1  ;;  %3221 = vmatprep.subr.bf16.mxu0 %v1472_v61  ;;  %v1181_v15 = vadd.f32 %v1180_v60, %v5059_v12 }
 0x4ef   : > { %v1184_v11 = vpop.f32.mrb[30].mxu0  ;;  %v1409_v28 = vpop.f32.mrb[29].mxu1  ;;  %3222 = vmatpush3.bf16.msra.mxu0 %v1448_v45  ;;  %v5222_v36 = vadd.f32 %v1182_v20, %v5061_v57  ;;  %v1418_v21 = vadd.f32 %v3465_v8, %v5063_v44 }
 0x4f0   : > { %v1185_v25 = vadd.f32 %v1184_v11, %v5059_v12  ;;  %v1186_v58 = vpop.f32.mrb[31].mxu0  ;;  %v3466_v62 = vpop.f32.mrb[30].mxu1  ;;  %3223 = vmatprep.subr.bf16.mxu0 %v1475_v10  ;;  %v1410_v23 = vadd.f32 %v1409_v28, %v5063_v44 }
 0x4f1   : > { %v5226_v27 = vadd.f32 %v1186_v58, %v5061_v57  ;;  %v1421_v24 = vadd.f32 %v3466_v62, %v5063_v44  ;;  %v1412_v42 = vpop.f32.mrb[31].mxu1 }
 0x4f2   : > { %v5229_v40 = vpack.c.bf16 %v1185_v25, %v1181_v15  ;;  %v1413_v45 = vadd.f32 %v1412_v42, %v5063_v44 }
 0x4f3   : > { %v1459_v46 = vpack.c.bf16 %v5226_v27, %v5222_v36  ;;  %v1481_v2 = vpack.c.bf16 %v1421_v24, %v1418_v21  ;;  %3224 = vmatpush3.bf16.msra.mxu0 %v1451_v6 }
 0x4f4   : > { %v1478_v5 = vpack.c.bf16 %v1413_v45, %v1410_v23 }
 0x4f5   : > { %v1190_v10 = vpop.f32.mrb[32].mxu0 }
 0x4f6   : > { %v1192_v61 = vpop.f32.mrb[33].mxu0  ;;  %v3469_v60 = vpop.f32.mrb[32].mxu1  ;;  %3225 = vmatprep.subr.bf16.mxu0 %v1478_v5  ;;  %v1191_v11 = vadd.f32 %v1190_v10, %v5059_v12 }
 0x4f7   : > { %v1194_v20 = vpop.f32.mrb[34].mxu0  ;;  %v1425_v8 = vpop.f32.mrb[33].mxu1  ;;  %3226 = vmatpush3.bf16.msra.mxu0 %v1454_v59  ;;  %v5244_v1 = vadd.f32 %v1192_v61, %v5061_v57  ;;  %v1434_v4 = vadd.f32 %v3469_v60, %v5063_v44 }
 0x4f8   : > { %v1195_v28 = vadd.f32 %v1194_v20, %v5059_v12  ;;  %v1196_v15 = vpop.f32.mrb[35].mxu0  ;;  %v3470_v25 = vpop.f32.mrb[34].mxu1  ;;  %3227 = vmatprep.subr.bf16.mxu0 %v1481_v2  ;;  %v1426_v38 = vadd.f32 %v1425_v8, %v5063_v44 }
 0x4f9   : > { %v5248_v6 = vadd.f32 %v1196_v15, %v5061_v57  ;;  %v1437_v58 = vadd.f32 %v3470_v25, %v5063_v44  ;;  %v1428_v62 = vpop.f32.mrb[35].mxu1 }
 0x4fa   : > { %v5251_v63 = vpack.c.bf16 %v1195_v28, %v1191_v11  ;;  %v1429_v59 = vadd.f32 %v1428_v62, %v5063_v44 }
 0x4fb   : > { %v1462_v21 = vpack.c.bf16 %v5248_v6, %v5244_v1  ;;  %v1487_v24 = vpack.c.bf16 %v1437_v58, %v1434_v4  ;;  %3228 = vmatpush3.bf16.msra.mxu0 %v1457_v33 }
 0x4fc   : > { %v1484_v42 = vpack.c.bf16 %v1429_v59, %v1426_v38 }
 0x4fd   : > { %v1200_v23 = vpop.f32.mrb[36].mxu0 }
 0x4fe   : > { %v1202_v45 = vpop.f32.mrb[37].mxu0  ;;  %3229 = vmatprep.subr.bf16.mxu0 %v1484_v42  ;;  %v1201_v5 = vadd.f32 %v1200_v23, %v5059_v12 }
 0x4ff   : > { %v1204_v2 = vpop.f32.mrb[38].mxu0  ;;  %3230 = vmatpush3.bf16.msra.mxu0 %v1460_v48  ;;  %v1203_v61 = vadd.f32 %v1202_v45, %v5061_v57 }
 0x500   : > { %v1205_v44 = vadd.f32 %v1204_v2, %v5059_v12  ;;  %v1206_v10 = vpop.f32.mrb[39].mxu0  ;;  %3231 = vmatprep.subr.bf16.mxu0 %v1487_v24 }
 0x501   : > { %v1207_v22 = vadd.f32 %v1206_v10, %v5061_v57 }
 0x502   : > { %v5267_v30 = vpack.c.bf16 %v1205_v44, %v1201_v5 }
 0x503   : > { %v1465_v33 = vpack.c.bf16 %v1207_v22, %v1203_v61  ;;  %3232 = vmatpush3.bf16.msra.mxu0 %v1463_v16 }
 0x505   : > { %v1210_v60 = vpop.f32.mrb[40].mxu0  ;;  %3169 = vmatprep.subr.bf16.mxu1 %v1465_v33 }
 0x506   : > { %v1212_v54 = vpop.f32.mrb[41].mxu0  ;;  %3170 = vmatpush3.bf16.xpose.msra.mxu1 %v1441_v56  ;;  %v1211_v48 = vadd.f32 %v1210_v60, %v5059_v12 }
 0x507   : > { %v1214_v37 = vpop.f32.mrb[42].mxu0  ;;  %v1213_v11 = vadd.f32 %v1212_v54, %v5061_v57 }
 0x508   : > { %v1215_v20 = vadd.f32 %v1214_v37, %v5059_v12  ;;  %v1216_v8 = vpop.f32.mrb[43].mxu0 }
 0x509   : > { %v1217_v28 = vadd.f32 %v1216_v8, %v5061_v57 }
 0x50a   : > { %v5279_v15 = vpack.c.bf16 %v1215_v20, %v1211_v48 }
 0x50b   : > { %v1468_v50 = vpack.c.bf16 %v1217_v28, %v1213_v11 }
 0x50d   : > { %v1220_v43 = vpop.f32.mrb[44].mxu0  ;;  %3171 = vmatprep.subr.bf16.mxu1 %v1468_v50 }
 0x50e   : > { %v1222_v16 = vpop.f32.mrb[45].mxu0  ;;  %3172 = vmatpush3.bf16.xpose.msra.mxu1 %v1444_v41  ;;  %v1221_v18 = vadd.f32 %v1220_v43, %v5059_v12 }
 0x50f   : > { %v1224_v31 = vpop.f32.mrb[46].mxu0  ;;  %v1223_v4 = vadd.f32 %v1222_v16, %v5061_v57 }
 0x510   : > { %v1225_v56 = vadd.f32 %v1224_v31, %v5059_v12  ;;  %v1226_v25 = vpop.f32.mrb[47].mxu0 }
 0x511   : > { %v1227_v58 = vadd.f32 %v1226_v25, %v5061_v57 }
 0x512   : > { %v5288_v62 = vpack.c.bf16 %v1225_v56, %v1221_v18 }
 0x513   : > { %v1471_v38 = vpack.c.bf16 %v1227_v58, %v1223_v4 }
 0x515   : > { %v1230_v59 = vpop.f32.mrb[48].mxu0  ;;  %3173 = vmatprep.subr.bf16.mxu1 %v1471_v38 }
 0x516   : > { %v1232_v24 = vpop.f32.mrb[49].mxu0  ;;  %3174 = vmatpush3.bf16.xpose.msra.mxu1 %v1447_v52  ;;  %v1231_v3 = vadd.f32 %v1230_v59, %v5059_v12 }
 0x517   : > { %v1234_v17 = vpop.f32.mrb[50].mxu0  ;;  %v1233_v23 = vadd.f32 %v1232_v24, %v5061_v57 }
 0x518   : > { %v1235_v41 = vadd.f32 %v1234_v17, %v5059_v12  ;;  %v1236_v42 = vpop.f32.mrb[51].mxu0 }
 0x519   : > { %v1237_v45 = vadd.f32 %v1236_v42, %v5061_v57 }
 0x51a   : > { %v5297_v2 = vpack.c.bf16 %v1235_v41, %v1231_v3 }
 0x51b   : > { %v1474_v5 = vpack.c.bf16 %v1237_v45, %v1233_v23 }
 0x51d   : > { %v1240_v44 = vpop.f32.mrb[52].mxu0  ;;  %3175 = vmatprep.subr.bf16.mxu1 %v1474_v5 }
 0x51e   : > { %v1242_v10 = vpop.f32.mrb[53].mxu0  ;;  %3176 = vmatpush3.bf16.xpose.msra.mxu1 %v1450_v13  ;;  %v1241_v26 = vadd.f32 %v1240_v44, %v5059_v12 }
 0x51f   : > { %v1244_v34 = vpop.f32.mrb[54].mxu0  ;;  %v1243_v22 = vadd.f32 %v1242_v10, %v5061_v57 }
 0x520   : > { %v1245_v52 = vadd.f32 %v1244_v34, %v5059_v12  ;;  %v1246_v61 = vpop.f32.mrb[55].mxu0 }
 0x521   : > { %v1247_v33 = vadd.f32 %v1246_v61, %v5061_v57 }
 0x522   : > { %v5306_v60 = vpack.c.bf16 %v1245_v52, %v1241_v26 }
 0x523   : > { %v1477_v54 = vpack.c.bf16 %v1247_v33, %v1243_v22 }
 0x525   : > { %v1250_v37 = vpop.f32.mrb[56].mxu0  ;;  %3177 = vmatprep.subr.bf16.mxu1 %v1477_v54 }
 0x526   : > { %v1252_v48 = vpop.f32.mrb[57].mxu0  ;;  %3178 = vmatpush3.bf16.xpose.msra.mxu1 %v1453_v51  ;;  %v1251_v32 = vadd.f32 %v1250_v37, %v5059_v12 }
 0x527   : > { %v1254_v14 = vpop.f32.mrb[58].mxu0  ;;  %v1253_v8 = vadd.f32 %v1252_v48, %v5061_v57 }
 0x528   : > { %v1255_v13 = vadd.f32 %v1254_v14, %v5059_v12  ;;  %v1256_v20 = vpop.f32.mrb[59].mxu0 }
 0x529   : > { %v1257_v11 = vadd.f32 %v1256_v20, %v5061_v57 }
 0x52a   : > { %v1479_v28 = vpack.c.bf16 %v1255_v13, %v1251_v32 }
 0x52b   : > { %v1480_v50 = vpack.c.bf16 %v1257_v11, %v1253_v8 }
 0x52d   : > { %v1260_v43 = vpop.f32.mrb[60].mxu0  ;;  %3179 = vmatprep.subr.bf16.mxu1 %v1480_v50 }
 0x52e   : > { %v1262_v16 = vpop.f32.mrb[61].mxu0  ;;  %3180 = vmatpush3.bf16.xpose.msra.mxu1 %v1456_v49  ;;  %v1261_v9 = vadd.f32 %v1260_v43, %v5059_v12 }
 0x52f   : > { %v1264_v19 = vpop.f32.mrb[62].mxu0  ;;  %v1263_v18 = vadd.f32 %v1262_v16, %v5061_v57 }
 0x530   : > { %v1265_v51 = vadd.f32 %v1264_v19, %v5059_v12  ;;  %v1266_v31 = vpop.f32.mrb[63].mxu0 }
 0x531   : > { %v1267_v56 = vadd.f32 %v1266_v31, %v5061_v57 }
 0x532   : > { %v1482_v25 = vpack.c.bf16 %v1265_v51, %v1261_v9 }
 0x533   : > { %v1483_v4 = vpack.c.bf16 %v1267_v56, %v1263_v18 }
 0x535   : > { %v1270_v58 = vpop.f32.mrb[64].mxu0  ;;  %3181 = vmatprep.subr.bf16.mxu1 %v1483_v4 }
 0x536   : > { %v1272_v38 = vpop.f32.mrb[65].mxu0  ;;  %3182 = vmatpush3.bf16.xpose.msra.mxu1 %v1459_v46  ;;  %v1271_v55 = vadd.f32 %v1270_v58, %v5059_v12 }
 0x537   : > { %v1274_v29 = vpop.f32.mrb[66].mxu0  ;;  %v1273_v24 = vadd.f32 %v1272_v38, %v5061_v57 }
 0x538   : > { %v1275_v49 = vadd.f32 %v1274_v29, %v5059_v12  ;;  %v1276_v59 = vpop.f32.mrb[67].mxu0 }
 0x539   : > { %v1277_v17 = vadd.f32 %v1276_v59, %v5061_v57 }
 0x53a   : > { %v1485_v3 = vpack.c.bf16 %v1275_v49, %v1271_v55 }
 0x53b   : > { %v1486_v41 = vpack.c.bf16 %v1277_v17, %v1273_v24 }
 0x53d   : > { %3183 = vmatprep.subr.bf16.mxu1 %v1486_v41 }
 0x53e   : > { %3184 = vmatpush3.bf16.xpose.msra.mxu1 %v1462_v21 }
 0x545   : > { %3186 = vmatmul.mubr.bf16.vlgmr.msra.gmra.mrb[36].mxu1 %v5079_v0 }
 0x546   : > { %3187 = vmatprep.mubr.bf16.mxu1 %v5108_v39 }
 0x54d   : > { %3188 = vmatmul.mubr.bf16.gmra.mrb[40].mxu1 %v5108_v39 }
 0x54e   : > { %3189 = vmatprep.mubr.bf16.mxu1 %v5136_v35 }
 0x555   : > { %3190 = vmatmul.mubr.bf16.gmra.mrb[44].mxu1 %v5136_v35 }
 0x556   : > { %3191 = vmatprep.mubr.bf16.mxu1 %v5164_v7 }
 0x55d   : > { %3192 = vmatmul.mubr.bf16.gmra.mrb[48].mxu1 %v5164_v7 }
 0x55e   : > { %3193 = vmatprep.mubr.bf16.mxu1 %v5188_v47 }
 0x565   : > { %3194 = vmatmul.mubr.bf16.gmra.mrb[52].mxu1 %v5188_v47 }
 0x566   : > { %3195 = vmatprep.mubr.bf16.mxu1 %v5207_v53 }
 0x56d   : > { %3196 = vmatmul.mubr.bf16.gmra.mrb[56].mxu1 %v5207_v53 }
 0x56e   : > { %3197 = vmatprep.mubr.bf16.mxu1 %v5229_v40 }
 0x575   : > { %3198 = vmatmul.mubr.bf16.gmra.mrb[60].mxu1 %v5229_v40 }
 0x576   : > { %3199 = vmatprep.mubr.bf16.mxu1 %v5251_v63 }
 0x57d   : > { %3200 = vmatmul.mubr.bf16.gmra.mrb[64].mxu1 %v5251_v63 }
 0x57e   : > { %3201 = vmatprep.mubr.bf16.mxu1 %v5267_v30 }
 0x585   : > { %3202 = vmatmul.mubr.bf16.gmra.mrb[68].mxu1 %v5267_v30 }
 0x586   : > { %3203 = vmatprep.mubr.bf16.mxu1 %v5279_v15 }
 0x58d   : > { %3204 = vmatmul.mubr.bf16.gmra.mrb[72].mxu1 %v5279_v15 }
 0x58e   : > { %3205 = vmatprep.mubr.bf16.mxu1 %v5288_v62 }
 0x595   : > { %3206 = vmatmul.mubr.bf16.gmra.mrb[76].mxu1 %v5288_v62 }
 0x596   : > { %3207 = vmatprep.mubr.bf16.mxu1 %v5297_v2 }
 0x59d   : > { %3208 = vmatmul.mubr.bf16.gmra.mrb[80].mxu1 %v5297_v2 }
 0x59e   : > { %3209 = vmatprep.mubr.bf16.mxu1 %v5306_v60 }
 0x5a5   : > { %3210 = vmatmul.mubr.bf16.gmra.mrb[84].mxu1 %v5306_v60 }
 0x5a6   : > { %3211 = vmatprep.mubr.bf16.mxu1 %v1479_v28 }
 0x5ad   : > { %3212 = vmatmul.mubr.bf16.gmra.mrb[88].mxu1 %v1479_v28 }
 0x5ae   : > { %3213 = vmatprep.mubr.bf16.mxu1 %v1482_v25 }
 0x5b5   : > { %3214 = vmatmul.mubr.bf16.gmra.mrb[92].mxu1 %v1482_v25 }
 0x5b6   : > { %3215 = vmatprep.mubr.bf16.mxu1 %v1485_v3 }
 0x5bd   : > { %3216 = vmatmul.mubr.bf16.gmra.mrb[96].mxu1 %v1485_v3 }
 0x618   : > { %v5357_v12 = vpop.f32.mrb[36].mxu1 }
 0x619   : > { %v5359_v57 = vpop.f32.mrb[37].mxu1 }
 0x61a   : > { %v5361_v0 = vpop.f32.mrb[38].mxu1  ;;  %v1780_v39 = vmax.f32 %v5357_v12, %v5359_v57 }
 0x61b   : > { %v5365_v35 = vpop.f32.mrb[39].mxu1 }
 0x61c   : > { %1781 = vmax.xlane.f32.xlu0 %v1780_v39  ;;  %v1783_v7 = vmax.f32 %v5361_v0, %v5365_v35 }
 0x61e   : > { %1784 = vmax.xlane.f32.xlu1 %v1783_v7 }
 0x620   : > { %v5369_v47 = vpop.f32.mrb[40].mxu1 }
 0x621   : > { %v5371_v53 = vpop.f32.mrb[41].mxu1 }
 0x622   : > { %v5373_v36 = vpop.f32.mrb[42].mxu1  ;;  %v1786_v27 = vmax.f32 %v5369_v47, %v5371_v53 }
 0x623   : > { %v5377_v40 = vpop.f32.mrb[43].mxu1 }
 0x624   : > { %1787 = vmax.xlane.f32.xlu1 %v1786_v27  ;;  %v1789_v46 = vmax.f32 %v5373_v36, %v5377_v40 }
 0x628   : > { %1790 = vmax.xlane.f32.xlu1 %v1789_v46  ;;  %v5381_v1 = vpop.f32.mrb[44].mxu1 }
 0x629   : > { %v5383_v6 = vpop.f32.mrb[45].mxu1 }
 0x62a   : > { %v5385_v63 = vpop.f32.mrb[46].mxu1  ;;  %v1792_v21 = vmax.f32 %v5381_v1, %v5383_v6 }
 0x62b   : > { %v5389_v30 = vpop.f32.mrb[47].mxu1 }
 0x62c   : > { %1793 = vmax.xlane.f32.xlu0 %v1792_v21  ;;  %v1795_v15 = vmax.f32 %v5385_v63, %v5389_v30 }
 0x62e   : > { %1796 = vmax.xlane.f32.xlu1 %v1795_v15 }
 0x630   : > { %v5393_v62 = vpop.f32.mrb[48].mxu1 }
 0x631   : > { %v5395_v42 = vpop.f32.mrb[49].mxu1 }
 0x632   : > { %v5397_v23 = vpop.f32.mrb[50].mxu1  ;;  %v1798_v45 = vmax.f32 %v5393_v62, %v5395_v42 }
 0x633   : > { %v5401_v2 = vpop.f32.mrb[51].mxu1 }
 0x634   : > { %1799 = vmax.xlane.f32.xlu0 %v1798_v45  ;;  %v1801_v5 = vmax.f32 %v5397_v23, %v5401_v2 }
 0x636   : > { %1802 = vmax.xlane.f32.xlu1 %v1801_v5 }
 0x638   : > { %v5405_v44 = vpop.f32.mrb[52].mxu1 }
 0x639   : > { %v5407_v10 = vpop.f32.mrb[53].mxu1 }
 0x63a   : > { %v5409_v34 = vpop.f32.mrb[54].mxu1  ;;  %v1804_v26 = vmax.f32 %v5405_v44, %v5407_v10 }
 0x63b   : > { %v5413_v52 = vpop.f32.mrb[55].mxu1 }
 0x63c   : > { %1805 = vmax.xlane.f32.xlu0 %v1804_v26  ;;  %v1807_v61 = vmax.f32 %v5409_v34, %v5413_v52 }
 0x63e   : > { %1808 = vmax.xlane.f32.xlu1 %v1807_v61 }
 0x640   : > { %v5417_v22 = vpop.f32.mrb[56].mxu1 }
 0x641   : > { %v5419_v33 = vpop.f32.mrb[57].mxu1 }
 0x642   : > { %v5421_v60 = vpop.f32.mrb[58].mxu1  ;;  %v1810_v54 = vmax.f32 %v5417_v22, %v5419_v33 }
 0x643   : > { %v5425_v37 = vpop.f32.mrb[59].mxu1 }
 0x644   : > { %1811 = vmax.xlane.f32.xlu0 %v1810_v54  ;;  %v1813_v48 = vmax.f32 %v5421_v60, %v5425_v37 }
 0x646   : > { %1814 = vmax.xlane.f32.xlu1 %v1813_v48 }
 0x648   : > { %v5429_v14 = vpop.f32.mrb[60].mxu1 }
 0x649   : > { %v5431_v32 = vpop.f32.mrb[61].mxu1 }
 0x64a   : > { %v5433_v13 = vpop.f32.mrb[62].mxu1  ;;  %v1816_v20 = vmax.f32 %v5429_v14, %v5431_v32 }
 0x64b   : > { %v5437_v8 = vpop.f32.mrb[63].mxu1 }
 0x64c   : > { %1817 = vmax.xlane.f32.xlu0 %v1816_v20  ;;  %v1819_v11 = vmax.f32 %v5433_v13, %v5437_v8 }
 0x64e   : > { %1820 = vmax.xlane.f32.xlu1 %v1819_v11 }
 0x650   : > { %v5441_v28 = vpop.f32.mrb[64].mxu1 }
 0x651   : > { %v5443_v50 = vpop.f32.mrb[65].mxu1 }
 0x652   : > { %v5445_v43 = vpop.f32.mrb[66].mxu1  ;;  %v1822_v16 = vmax.f32 %v5441_v28, %v5443_v50 }
 0x653   : > { %v5449_v19 = vpop.f32.mrb[67].mxu1 }
 0x654   : > { %1823 = vmax.xlane.f32.xlu0 %v1822_v16  ;;  %v1825_v9 = vmax.f32 %v5445_v43, %v5449_v19 }
 0x656   : > { %1826 = vmax.xlane.f32.xlu1 %v1825_v9 }
 0x658   : > { %v5453_v51 = vpop.f32.mrb[68].mxu1 }
 0x659   : > { %v5455_v31 = vpop.f32.mrb[69].mxu1 }
 0x65a   : > { %v5457_v18 = vpop.f32.mrb[70].mxu1  ;;  %v1828_v56 = vmax.f32 %v5453_v51, %v5455_v31 }
 0x65b   : > { %v5461_v25 = vpop.f32.mrb[71].mxu1 }
 0x65c   : > { %1829 = vmax.xlane.f32.xlu0 %v1828_v56  ;;  %v1831_v4 = vmax.f32 %v5457_v18, %v5461_v25 }
 0x65e   : > { %1832 = vmax.xlane.f32.xlu1 %v1831_v4 }
 0x660   : > { %v5465_v58 = vpop.f32.mrb[72].mxu1 }
 0x661   : > { %v5467_v38 = vpop.f32.mrb[73].mxu1 }
 0x662   : > { %v5469_v29 = vpop.f32.mrb[74].mxu1  ;;  %v1834_v55 = vmax.f32 %v5465_v58, %v5467_v38 }
 0x663   : > { %v5473_v49 = vpop.f32.mrb[75].mxu1 }
 0x664   : > { %1835 = vmax.xlane.f32.xlu0 %v1834_v55  ;;  %v1837_v59 = vmax.f32 %v5469_v29, %v5473_v49 }
 0x666   : > { %1838 = vmax.xlane.f32.xlu1 %v1837_v59 }
 0x668   : > { %v5477_v24 = vpop.f32.mrb[76].mxu1 }
 0x669   : > { %v5479_v17 = vpop.f32.mrb[77].mxu1 }
 0x66a   : > { %v5481_v3 = vpop.f32.mrb[78].mxu1  ;;  %v1840_v41 = vmax.f32 %v5477_v24, %v5479_v17 }
 0x66b   : > { %v5485_v39 = vpop.f32.mrb[79].mxu1 }
 0x66c   : > { %1841 = vmax.xlane.f32.xlu0 %v1840_v41  ;;  %v1843_v7 = vmax.f32 %v5481_v3, %v5485_v39 }
 0x66e   : > { %1844 = vmax.xlane.f32.xlu1 %v1843_v7 }
 0x670   : > { %v5489_v27 = vpop.f32.mrb[80].mxu1 }
 0x671   : > { %v5491_v46 = vpop.f32.mrb[81].mxu1 }
 0x672   : > { %v5493_v21 = vpop.f32.mrb[82].mxu1  ;;  %v1846_v15 = vmax.f32 %v5489_v27, %v5491_v46 }
 0x673   : > { %v5497_v45 = vpop.f32.mrb[83].mxu1 }
 0x674   : > { %1847 = vmax.xlane.f32.xlu0 %v1846_v15  ;;  %v1849_v5 = vmax.f32 %v5493_v21, %v5497_v45 }
 0x676   : > { %1850 = vmax.xlane.f32.xlu1 %v1849_v5 }
 0x678   : > { %v5501_v26 = vpop.f32.mrb[84].mxu1 }
 0x679   : > { %v5503_v61 = vpop.f32.mrb[85].mxu1 }
 0x67a   : > { %v5505_v54 = vpop.f32.mrb[86].mxu1  ;;  %v1852_v48 = vmax.f32 %v5501_v26, %v5503_v61 }
 0x67b   : > { %5808 = vst [vmem:[#allocation25_spill] sm:$0xff] %v5505_v54  ;;  %v5509_v20 = vpop.f32.mrb[87].mxu1 }
 0x67c   : > { %5809 = vst [vmem:[#allocation26_spill] sm:$0xff] %v5509_v20  ;;  %1853 = vmax.xlane.f32.xlu0 %v1852_v48  ;;  %v1855_v11 = vmax.f32 %v5505_v54, %v5509_v20 }
 0x67e   : > { %1856 = vmax.xlane.f32.xlu1 %v1855_v11 }
 0x680   : > { %v5513_v16 = vpop.f32.mrb[88].mxu1 }
 0x681   : > { %5810 = vst [vmem:[#allocation27_spill] sm:$0xff] %v5513_v16  ;;  %v5515_v9 = vpop.f32.mrb[89].mxu1 }
 0x682   : > { %5811 = vst [vmem:[#allocation28_spill] sm:$0xff] %v5515_v9  ;;  %v5517_v56 = vpop.f32.mrb[90].mxu1  ;;  %v1858_v4 = vmax.f32 %v5513_v16, %v5515_v9 }
 0x683   : > { %5812 = vst [vmem:[#allocation29_spill] sm:$0xff] %v5517_v56  ;;  %v5521_v55 = vpop.f32.mrb[91].mxu1 }
 0x684   : > { %5813 = vst [vmem:[#allocation30_spill] sm:$0xff] %v5521_v55  ;;  %1859 = vmax.xlane.f32.xlu0 %v1858_v4  ;;  %v1861_v59 = vmax.f32 %v5517_v56, %v5521_v55 }
 0x686   : > { %1862 = vmax.xlane.f32.xlu1 %v1861_v59 }
 0x688   : > { %v5525_v41 = vpop.f32.mrb[92].mxu1 }
 0x689   : > { %5814 = vst [vmem:[#allocation31_spill] sm:$0xff] %v5525_v41  ;;  %v5527_v7 = vpop.f32.mrb[93].mxu1 }
 0x68a   : > { %5815 = vst [vmem:[#allocation32_spill] sm:$0xff] %v5527_v7  ;;  %v5529_v15 = vpop.f32.mrb[94].mxu1  ;;  %v1864_v5 = vmax.f32 %v5525_v41, %v5527_v7 }
 0x68b   : > { %5816 = vst [vmem:[#allocation33_spill] sm:$0xff] %v5529_v15  ;;  %v5533_v48 = vpop.f32.mrb[95].mxu1 }
 0x68c   : > { %5817 = vst [vmem:[#allocation34_spill] sm:$0xff] %v5533_v48  ;;  %1865 = vmax.xlane.f32.xlu0 %v1864_v5  ;;  %v1867_v11 = vmax.f32 %v5529_v15, %v5533_v48 }
 0x68e   : > { %1868 = vmax.xlane.f32.xlu1 %v1867_v11 }
 0x690   : > { %v5537_v4 = vpop.f32.mrb[96].mxu1 }
 0x691   : > { %5818 = vst [vmem:[#allocation35_spill] sm:$0xff] %v5537_v4  ;;  %v5539_v55 = vpop.f32.mrb[97].mxu1 }
 0x692   : > { %5819 = vst [vmem:[#allocation36_spill] sm:$0xff] %v5539_v55  ;;  %v5541_v59 = vpop.f32.mrb[98].mxu1  ;;  %v1870_v56 = vmax.f32 %v5537_v4, %v5539_v55 }
 0x693   : > { %v5545_v9 = vpop.f32.mrb[99].mxu1 }
 0x694   : > { %5820 = vst [vmem:[#allocation37_spill] sm:$0xff] %v5545_v9  ;;  %1871 = vmax.xlane.f32.xlu0 %v1870_v56  ;;  %v1873_v7 = vmax.f32 %v5541_v59, %v5545_v9 }
 0x696   : > { %1874 = vmax.xlane.f32.xlu1 %v1873_v7 }
 0x6a9   : > { %v1782_v5 = vpop.xlane.xlu0 %1781 }
 0x6aa   : > { %v1876_v48 = vsub.f32 %v5357_v12, %v1782_v5  ;;  %v1877_v11 = vsub.f32 %v5359_v57, %v1782_v5 }
 0x6ab   : > { %v1785_v15 = vpop.xlane.xlu1 %1784 }
 0x6ac   : > { %v1940_v41 = vmul.f32 1.442695, %v1876_v48  ;;  %v1942_v16 = vmul.f32 1.442695, %v1877_v11  ;;  %v1878_v20 = vsub.f32 %v5361_v0, %v1785_v15  ;;  %v1879_v54 = vsub.f32 %v5365_v35, %v1785_v15 }
 0x6ae   : > { %3740 = vpow2.f32 %v1940_v41  ;;  %v1944_v55 = vmul.f32 1.442695, %v1878_v20  ;;  %v1946_v4 = vmul.f32 1.442695, %v1879_v54  ;;  %v3730_v41 = vld [vmem:[#allocation15] sm:$0xff]  }
 0x6af   : > { %3742 = vpow2.f32 %v1942_v16  ;;  %3471 = vmatprep.subr.bf16.mxu1 %v3730_v41 }
 0x6b0   : > { %3744 = vpow2.f32 %v1944_v55  ;;  %3472 = vmatpush3.bf16.msra.mxu1 %v3730_v41 }
 0x6b1   : > { %3746 = vpow2.f32 %v1946_v4  ;;  %v1788_v56 = vpop.xlane.xlu1 %1787 }
 0x6b2   : > { %v1880_v7 = vsub.f32 %v5369_v47, %v1788_v56  ;;  %v1881_v12 = vsub.f32 %v5371_v53, %v1788_v56 }
 0x6b4   : > { %v1948_v9 = vmul.f32 1.442695, %v1880_v7  ;;  %v1950_v57 = vmul.f32 1.442695, %v1881_v12 }
 0x6b5   : > { %v1791_v5 = vpop.xlane.xlu1 %1790 }
 0x6b6   : > { %3748 = vpow2.f32 %v1948_v9  ;;  %v1882_v48 = vsub.f32 %v5373_v36, %v1791_v5  ;;  %v1883_v0 = vsub.f32 %v5377_v40, %v1791_v5 }
 0x6b7   : > { %3750 = vpow2.f32 %v1950_v57 }
 0x6b8   : > { %v3741_v35 = vpop.eup %3740  ;;  %v1952_v20 = vmul.f32 1.442695, %v1882_v48  ;;  %v1954_v54 = vmul.f32 1.442695, %v1883_v0 }
 0x6b9   : > { %v3743_v16 = vpop.eup %3742  ;;  %v1794_v55 = vpop.xlane.xlu0 %1793 }
 0x6ba   : > { %v3745_v15 = vpop.eup %3744  ;;  %3752 = vpow2.f32 %v1952_v20  ;;  %v1884_v47 = vsub.f32 %v5381_v1, %v1794_v55  ;;  %v1885_v53 = vsub.f32 %v5383_v6, %v1794_v55  ;;  %v2068_v4 = vadd.f32 %v3743_v16, %v3741_v35 }
 0x6bb   : > { %v3747_v11 = vpop.eup %3746  ;;  %3754 = vpow2.f32 %v1954_v54  ;;  %v1797_v9 = vpop.xlane.xlu1 %1796  ;;  %v2164_v36 = vpack.c.bf16 %v3745_v15, %v3741_v35 }
 0x6bc   : > { %v1956_v40 = vmul.f32 1.442695, %v1884_v47  ;;  %v1958_v56 = vmul.f32 1.442695, %v1885_v53  ;;  %v1886_v7 = vsub.f32 %v5385_v63, %v1797_v9  ;;  %v1887_v12 = vsub.f32 %v5389_v30, %v1797_v9  ;;  %2069 = vadd.xlane.f32.xlu0 %v2068_v4 }
 0x6bd   : > { %v2165_v57 = vpack.c.bf16 %v3747_v11, %v3743_v16  ;;  %v2071_v5 = vadd.f32 %v3747_v11, %v3745_v15 }
 0x6be   : > { %3756 = vpow2.f32 %v1956_v40  ;;  %v1960_v1 = vmul.f32 1.442695, %v1886_v7  ;;  %v1962_v48 = vmul.f32 1.442695, %v1887_v12 }
 0x6bf   : > { %3758 = vpow2.f32 %v1958_v56  ;;  %2228 = vmatprep.mubr.bf16.mxu0 %v2165_v57  ;;  %2072 = vadd.xlane.f32.xlu1 %v2071_v5 }
 0x6c0   : > { %v3749_v6 = vpop.eup %3748  ;;  %3760 = vpow2.f32 %v1960_v1  ;;  %2229 = vmatmul.mubr.bf16.vlgmr.msra.gmra.mrb[68].mxu0 %v2164_v36 }
 0x6c1   : > { %v3751_v0 = vpop.eup %3750  ;;  %3762 = vpow2.f32 %v1962_v48  ;;  %v1800_v35 = vpop.xlane.xlu0 %1799 }
 0x6c2   : > { %v1888_v63 = vsub.f32 %v5393_v62, %v1800_v35  ;;  %v1889_v30 = vsub.f32 %v5395_v42, %v1800_v35  ;;  %v2074_v20 = vadd.f32 %v3751_v0, %v3749_v6 }
 0x6c3   : > { %v1803_v54 = vpop.xlane.xlu1 %1802 }
 0x6c4   : > { %v3753_v16 = vpop.eup %3752  ;;  %v1964_v55 = vmul.f32 1.442695, %v1888_v63  ;;  %v1966_v41 = vmul.f32 1.442695, %v1889_v30  ;;  %v1890_v15 = vsub.f32 %v5397_v23, %v1803_v54  ;;  %v1891_v47 = vsub.f32 %v5401_v2, %v1803_v54  ;;  %2075 = vadd.xlane.f32.xlu0 %v2074_v20 }
 0x6c5   : > { %v3755_v53 = vpop.eup %3754  ;;  %v2166_v4 = vpack.c.bf16 %v3753_v16, %v3749_v6 }
 0x6c6   : > { %3764 = vpow2.f32 %v1964_v55  ;;  %v1968_v11 = vmul.f32 1.442695, %v1890_v15  ;;  %v1970_v9 = vmul.f32 1.442695, %v1891_v47  ;;  %v2167_v36 = vpack.c.bf16 %v3755_v53, %v3751_v0 }
 0x6c7   : > { %3766 = vpow2.f32 %v1966_v41  ;;  %v2077_v62 = vadd.f32 %v3755_v53, %v3753_v16 }
 0x6c8   : > { %v3757_v40 = vpop.eup %3756  ;;  %3768 = vpow2.f32 %v1968_v11  ;;  %2236 = vmatprep.mubr.bf16.mxu0 %v2167_v36 }
 0x6c9   : > { %v3759_v42 = vpop.eup %3758  ;;  %3770 = vpow2.f32 %v1970_v9  ;;  %2078 = vadd.xlane.f32.xlu1 %v2077_v62  ;;  %2237 = vmatmul.mubr.bf16.gmra.mrb[72].mxu0 %v2166_v4  ;;  %v1806_v56 = vpop.xlane.xlu0 %1805 }
 0x6ca   : > { %v3761_v23 = vpop.eup %3760  ;;  %v1892_v2 = vsub.f32 %v5405_v44, %v1806_v56  ;;  %v1893_v7 = vsub.f32 %v5407_v10, %v1806_v56  ;;  %v2080_v12 = vadd.f32 %v3759_v42, %v3757_v40 }
 0x6cb   : > { %v3763_v57 = vpop.eup %3762  ;;  %v1809_v5 = vpop.xlane.xlu1 %1808  ;;  %v2168_v1 = vpack.c.bf16 %v3761_v23, %v3757_v40 }
 0x6cc   : > { %v1972_v48 = vmul.f32 1.442695, %v1892_v2  ;;  %v1974_v6 = vmul.f32 1.442695, %v1893_v7  ;;  %v1894_v0 = vsub.f32 %v5409_v34, %v1809_v5  ;;  %v1895_v35 = vsub.f32 %v5413_v52, %v1809_v5  ;;  %2081 = vadd.xlane.f32.xlu0 %v2080_v12 }
 0x6cd   : > { %v2169_v63 = vpack.c.bf16 %v3763_v57, %v3759_v42  ;;  %v2083_v30 = vadd.f32 %v3763_v57, %v3761_v23 }
 0x6ce   : > { %3772 = vpow2.f32 %v1972_v48  ;;  %v1976_v20 = vmul.f32 1.442695, %v1894_v0  ;;  %v1978_v54 = vmul.f32 1.442695, %v1895_v35 }
 0x6cf   : > { %3774 = vpow2.f32 %v1974_v6  ;;  %2244 = vmatprep.mubr.bf16.mxu0 %v2169_v63  ;;  %2084 = vadd.xlane.f32.xlu1 %v2083_v30 }
 0x6d0   : > { %v3765_v44 = vpop.eup %3764  ;;  %3776 = vpow2.f32 %v1976_v20 }
 0x6d1   : > { %v3767_v10 = vpop.eup %3766  ;;  %3778 = vpow2.f32 %v1978_v54  ;;  %2245 = vmatmul.mubr.bf16.gmra.mrb[76].mxu0 %v2168_v1  ;;  %v1812_v16 = vpop.xlane.xlu0 %1811 }
 0x6d2   : > { %v3769_v55 = vpop.eup %3768  ;;  %v1896_v34 = vsub.f32 %v5417_v22, %v1812_v16  ;;  %v1897_v52 = vsub.f32 %v5419_v33, %v1812_v16  ;;  %v2086_v41 = vadd.f32 %v3767_v10, %v3765_v44  ;;  %v3731_v22 = vld [vmem:[#allocation15 + $0x8] sm:$0xff]  }
 0x6d3   : > { %v3771_v15 = vpop.eup %3770  ;;  %v1815_v47 = vpop.xlane.xlu1 %1814  ;;  %v2170_v53 = vpack.c.bf16 %v3769_v55, %v3765_v44  ;;  %3473 = vmatprep.subr.bf16.mxu1 %v3731_v22 }
 0x6d4   : > { %v1980_v4 = vmul.f32 1.442695, %v1896_v34  ;;  %v1982_v11 = vmul.f32 1.442695, %v1897_v52  ;;  %v1898_v9 = vsub.f32 %v5421_v60, %v1815_v47  ;;  %v1899_v36 = vsub.f32 %v5425_v37, %v1815_v47  ;;  %2087 = vadd.xlane.f32.xlu0 %v2086_v41  ;;  %3474 = vmatpush3.bf16.msra.mxu1 %v3731_v22 }
 0x6d5   : > { %v2171_v62 = vpack.c.bf16 %v3771_v15, %v3767_v10  ;;  %v2089_v40 = vadd.f32 %v3771_v15, %v3769_v55 }
 0x6d6   : > { %3780 = vpow2.f32 %v1980_v4  ;;  %v1984_v42 = vmul.f32 1.442695, %v1898_v9  ;;  %v1986_v56 = vmul.f32 1.442695, %v1899_v36  ;;  %v3732_v9 = vld [vmem:[#allocation15 + $0x10] sm:$0xff]  }
 0x6d7   : > { %3782 = vpow2.f32 %v1982_v11  ;;  %2252 = vmatprep.mubr.bf16.mxu0 %v2171_v62  ;;  %2090 = vadd.xlane.f32.xlu1 %v2089_v40 }
 0x6d8   : > { %v3773_v33 = vpop.eup %3772  ;;  %3784 = vpow2.f32 %v1984_v42  ;;  %3475 = vmatprep.subr.bf16.mxu1 %v3732_v9 }
 0x6d9   : > { %v3775_v23 = vpop.eup %3774  ;;  %3786 = vpow2.f32 %v1986_v56  ;;  %2253 = vmatmul.mubr.bf16.gmra.mrb[80].mxu0 %v2170_v53  ;;  %v1818_v2 = vpop.xlane.xlu0 %1817  ;;  %3476 = vmatpush3.bf16.msra.mxu1 %v3732_v9 }
 0x6da   : > { %v3777_v60 = vpop.eup %3776  ;;  %v1900_v37 = vsub.f32 %v5429_v14, %v1818_v2  ;;  %v1901_v7 = vsub.f32 %v5431_v32, %v1818_v2  ;;  %v2092_v12 = vadd.f32 %v3775_v23, %v3773_v33 }
 0x6db   : > { %v3779_v57 = vpop.eup %3778  ;;  %v1821_v5 = vpop.xlane.xlu1 %1820  ;;  %v2172_v1 = vpack.c.bf16 %v3777_v60, %v3773_v33 }
 0x6dc   : > { %v1988_v48 = vmul.f32 1.442695, %v1900_v37  ;;  %v1990_v6 = vmul.f32 1.442695, %v1901_v7  ;;  %v1902_v0 = vsub.f32 %v5433_v13, %v1821_v5  ;;  %v1903_v35 = vsub.f32 %v5437_v8, %v1821_v5  ;;  %2093 = vadd.xlane.f32.xlu0 %v2092_v12 }
 0x6dd   : > { %v2173_v63 = vpack.c.bf16 %v3779_v57, %v3775_v23  ;;  %v2095_v30 = vadd.f32 %v3779_v57, %v3777_v60 }
 0x6de   : > { %3788 = vpow2.f32 %v1988_v48  ;;  %v1992_v20 = vmul.f32 1.442695, %v1902_v0  ;;  %v1994_v54 = vmul.f32 1.442695, %v1903_v35 }
 0x6df   : > { %3790 = vpow2.f32 %v1990_v6  ;;  %2260 = vmatprep.mubr.bf16.mxu0 %v2173_v63  ;;  %2096 = vadd.xlane.f32.xlu1 %v2095_v30 }
 0x6e0   : > { %v3781_v14 = vpop.eup %3780  ;;  %3792 = vpow2.f32 %v1992_v20 }
 0x6e1   : > { %v3783_v32 = vpop.eup %3782  ;;  %3794 = vpow2.f32 %v1994_v54  ;;  %2261 = vmatmul.mubr.bf16.gmra.mrb[84].mxu0 %v2172_v1  ;;  %v1824_v44 = vpop.xlane.xlu0 %1823 }
 0x6e2   : > { %v3785_v10 = vpop.eup %3784  ;;  %v1904_v13 = vsub.f32 %v5441_v28, %v1824_v44  ;;  %v1905_v8 = vsub.f32 %v5443_v50, %v1824_v44  ;;  %v2098_v16 = vadd.f32 %v3783_v32, %v3781_v14 }
 0x6e3   : > { %v3787_v55 = vpop.eup %3786  ;;  %v1827_v34 = vpop.xlane.xlu1 %1826  ;;  %v2174_v52 = vpack.c.bf16 %v3785_v10, %v3781_v14 }
 0x6e4   : > { %v1996_v41 = vmul.f32 1.442695, %v1904_v13  ;;  %v1998_v15 = vmul.f32 1.442695, %v1905_v8  ;;  %v1906_v47 = vsub.f32 %v5445_v43, %v1827_v34  ;;  %v1907_v53 = vsub.f32 %v5449_v19, %v1827_v34  ;;  %2099 = vadd.xlane.f32.xlu0 %v2098_v16  ;;  %v3733_v13 = vld [vmem:[#allocation15 + $0x18] sm:$0xff]  }
 0x6e5   : > { %v2175_v4 = vpack.c.bf16 %v3787_v55, %v3783_v32  ;;  %v2101_v11 = vadd.f32 %v3787_v55, %v3785_v10  ;;  %3477 = vmatprep.subr.bf16.mxu1 %v3733_v13 }
 0x6e6   : > { %3796 = vpow2.f32 %v1996_v41  ;;  %v2000_v36 = vmul.f32 1.442695, %v1906_v47  ;;  %v2002_v62 = vmul.f32 1.442695, %v1907_v53  ;;  %3478 = vmatpush3.bf16.msra.mxu1 %v3733_v13 }
 0x6e7   : > { %3798 = vpow2.f32 %v1998_v15  ;;  %2268 = vmatprep.mubr.bf16.mxu0 %v2175_v4  ;;  %2102 = vadd.xlane.f32.xlu1 %v2101_v11 }
 0x6e8   : > { %v3789_v28 = vpop.eup %3788  ;;  %3800 = vpow2.f32 %v2000_v36 }
 0x6e9   : > { %v3791_v50 = vpop.eup %3790  ;;  %3802 = vpow2.f32 %v2002_v62  ;;  %2269 = vmatmul.mubr.bf16.gmra.mrb[88].mxu0 %v2174_v52  ;;  %v1830_v40 = vpop.xlane.xlu0 %1829 }
 0x6ea   : > { %v3793_v43 = vpop.eup %3792  ;;  %v1908_v19 = vsub.f32 %v5453_v51, %v1830_v40  ;;  %v1909_v42 = vsub.f32 %v5455_v31, %v1830_v40  ;;  %v2104_v56 = vadd.f32 %v3791_v50, %v3789_v28 }
 0x6eb   : > { %v3795_v22 = vpop.eup %3794  ;;  %v1833_v33 = vpop.xlane.xlu1 %1832  ;;  %v2176_v23 = vpack.c.bf16 %v3793_v43, %v3789_v28 }
 0x6ec   : > { %v2004_v2 = vmul.f32 1.442695, %v1908_v19  ;;  %v2006_v60 = vmul.f32 1.442695, %v1909_v42  ;;  %v1910_v37 = vsub.f32 %v5457_v18, %v1833_v33  ;;  %v1911_v7 = vsub.f32 %v5461_v25, %v1833_v33  ;;  %2105 = vadd.xlane.f32.xlu0 %v2104_v56 }
 0x6ed   : > { %v2177_v12 = vpack.c.bf16 %v3795_v22, %v3791_v50  ;;  %v2107_v57 = vadd.f32 %v3795_v22, %v3793_v43 }
 0x6ee   : > { %3804 = vpow2.f32 %v2004_v2  ;;  %v2008_v5 = vmul.f32 1.442695, %v1910_v37  ;;  %v2010_v1 = vmul.f32 1.442695, %v1911_v7 }
 0x6ef   : > { %3806 = vpow2.f32 %v2006_v60  ;;  %2276 = vmatprep.mubr.bf16.mxu0 %v2177_v12  ;;  %2108 = vadd.xlane.f32.xlu1 %v2107_v57  ;;  %v3734_v12 = vld [vmem:[#allocation15 + $0x20] sm:$0xff]  }
 0x6f0   : > { %v3797_v51 = vpop.eup %3796  ;;  %3808 = vpow2.f32 %v2008_v5  ;;  %3479 = vmatprep.subr.bf16.mxu1 %v3734_v12 }
 0x6f1   : > { %v3799_v31 = vpop.eup %3798  ;;  %3810 = vpow2.f32 %v2010_v1  ;;  %2277 = vmatmul.mubr.bf16.gmra.mrb[92].mxu0 %v2176_v23  ;;  %v1836_v48 = vpop.xlane.xlu0 %1835  ;;  %3480 = vmatpush3.bf16.msra.mxu1 %v3734_v12 }
 0x6f2   : > { %v3801_v6 = vpop.eup %3800  ;;  %v1912_v18 = vsub.f32 %v5465_v58, %v1836_v48  ;;  %v1913_v25 = vsub.f32 %v5467_v38, %v1836_v48  ;;  %v2110_v0 = vadd.f32 %v3799_v31, %v3797_v51 }
 0x6f3   : > { %v3803_v35 = vpop.eup %3802  ;;  %v1839_v63 = vpop.xlane.xlu1 %1838  ;;  %v2178_v30 = vpack.c.bf16 %v3801_v6, %v3797_v51 }
 0x6f4   : > { %v2012_v20 = vmul.f32 1.442695, %v1912_v18  ;;  %v2014_v54 = vmul.f32 1.442695, %v1913_v25  ;;  %v1914_v14 = vsub.f32 %v5469_v29, %v1839_v63  ;;  %v1915_v32 = vsub.f32 %v5473_v49, %v1839_v63  ;;  %2111 = vadd.xlane.f32.xlu0 %v2110_v0 }
 0x6f5   : > { %v2179_v44 = vpack.c.bf16 %v3803_v35, %v3799_v31  ;;  %v2113_v10 = vadd.f32 %v3803_v35, %v3801_v6  ;;  %v5821_v35 = vld [vmem:[#allocation25_spill] sm:$0xff] }
 0x6f6   : > { %3812 = vpow2.f32 %v2012_v20  ;;  %v2016_v8 = vmul.f32 1.442695, %v1914_v14  ;;  %v2018_v16 = vmul.f32 1.442695, %v1915_v32 }
 0x6f7   : > { %3814 = vpow2.f32 %v2014_v54  ;;  %2284 = vmatprep.mubr.bf16.mxu0 %v2179_v44  ;;  %2114 = vadd.xlane.f32.xlu1 %v2113_v10 }
 0x6f8   : > { %v3805_v58 = vpop.eup %3804  ;;  %3816 = vpow2.f32 %v2016_v8  ;;  %v5823_v8 = vld [vmem:[#allocation27_spill] sm:$0xff] }
 0x6f9   : > { %v3807_v38 = vpop.eup %3806  ;;  %3818 = vpow2.f32 %v2018_v16  ;;  %2285 = vmatmul.mubr.bf16.gmra.mrb[96].mxu0 %v2178_v30  ;;  %v1842_v55 = vpop.xlane.xlu0 %1841  ;;  %v5822_v30 = vld [vmem:[#allocation26_spill] sm:$0xff] }
 0x6fa   : > { %v3809_v29 = vpop.eup %3808  ;;  %v1916_v49 = vsub.f32 %v5477_v24, %v1842_v55  ;;  %v1917_v34 = vsub.f32 %v5479_v17, %v1842_v55  ;;  %v2116_v52 = vadd.f32 %v3807_v38, %v3805_v58 }
 0x6fb   : > { %v3811_v41 = vpop.eup %3810  ;;  %v1845_v15 = vpop.xlane.xlu1 %1844  ;;  %v2180_v47 = vpack.c.bf16 %v3809_v29, %v3805_v58  ;;  %v5824_v58 = vld [vmem:[#allocation28_spill] sm:$0xff] }
 0x6fc   : > { %v2020_v53 = vmul.f32 1.442695, %v1916_v49  ;;  %v2022_v4 = vmul.f32 1.442695, %v1917_v34  ;;  %v1918_v11 = vsub.f32 %v5481_v3, %v1845_v15  ;;  %v1919_v9 = vsub.f32 %v5485_v39, %v1845_v15  ;;  %2117 = vadd.xlane.f32.xlu0 %v2116_v52  ;;  %v5825_v15 = vld [vmem:[#allocation29_spill] sm:$0xff] }
 0x6fd   : > { %v2181_v36 = vpack.c.bf16 %v3811_v41, %v3807_v38  ;;  %v2119_v62 = vadd.f32 %v3811_v41, %v3809_v29 }
 0x6fe   : > { %3820 = vpow2.f32 %v2020_v53  ;;  %v2024_v28 = vmul.f32 1.442695, %v1918_v11  ;;  %v2026_v50 = vmul.f32 1.442695, %v1919_v9  ;;  %v5826_v53 = vld [vmem:[#allocation30_spill] sm:$0xff] }
 0x6ff   : > { %3822 = vpow2.f32 %v2022_v4  ;;  %2292 = vmatprep.mubr.bf16.mxu0 %v2181_v36  ;;  %2120 = vadd.xlane.f32.xlu1 %v2119_v62 }
 0x700   : > { %v3813_v24 = vpop.eup %3812  ;;  %3824 = vpow2.f32 %v2024_v28 }
 0x701   : > { %v3815_v17 = vpop.eup %3814  ;;  %3826 = vpow2.f32 %v2026_v50  ;;  %2293 = vmatmul.mubr.bf16.gmra.mrb[100].mxu0 %v2180_v47  ;;  %v1848_v40 = vpop.xlane.xlu0 %1847 }
 0x702   : > { %v3817_v43 = vpop.eup %3816  ;;  %v1920_v3 = vsub.f32 %v5489_v27, %v1848_v40  ;;  %v1921_v39 = vsub.f32 %v5491_v46, %v1848_v40  ;;  %v2122_v19 = vadd.f32 %v3815_v17, %v3813_v24 }
 0x703   : > { %v3819_v42 = vpop.eup %3818  ;;  %v1851_v56 = vpop.xlane.xlu1 %1850  ;;  %v2182_v22 = vpack.c.bf16 %v3817_v43, %v3813_v24 }
 0x704   : > { %v2028_v33 = vmul.f32 1.442695, %v1920_v3  ;;  %v2030_v23 = vmul.f32 1.442695, %v1921_v39  ;;  %v1922_v2 = vsub.f32 %v5493_v21, %v1851_v56  ;;  %v1923_v60 = vsub.f32 %v5497_v45, %v1851_v56  ;;  %2123 = vadd.xlane.f32.xlu0 %v2122_v19  ;;  %v5828_v39 = vld [vmem:[#allocation32_spill] sm:$0xff] }
 0x705   : > { %v2183_v37 = vpack.c.bf16 %v3819_v42, %v3815_v17  ;;  %v2125_v7 = vadd.f32 %v3819_v42, %v3817_v43  ;;  %v3735_v17 = vld [vmem:[#allocation15 + $0x28] sm:$0xff]   ;;  %v5827_v43 = vld [vmem:[#allocation31_spill] sm:$0xff] }
 0x706   : > { %3828 = vpow2.f32 %v2028_v33  ;;  %v2032_v57 = vmul.f32 1.442695, %v1922_v2  ;;  %v2034_v5 = vmul.f32 1.442695, %v1923_v60  ;;  %3481 = vmatprep.subr.bf16.mxu1 %v3735_v17  ;;  %v5829_v60 = vld [vmem:[#allocation33_spill] sm:$0xff] }
 0x707   : > { %3830 = vpow2.f32 %v2030_v23  ;;  %2300 = vmatprep.mubr.bf16.mxu0 %v2183_v37  ;;  %2126 = vadd.xlane.f32.xlu1 %v2125_v7  ;;  %v5830_v7 = vld [vmem:[#allocation34_spill] sm:$0xff] }
 0x708   : > { %v3821_v27 = vpop.eup %3820  ;;  %3832 = vpow2.f32 %v2032_v57  ;;  %3482 = vmatpush3.bf16.msra.mxu1 %v3735_v17 }
 0x709   : > { %v3823_v46 = vpop.eup %3822  ;;  %3834 = vpow2.f32 %v2034_v5  ;;  %2301 = vmatmul.mubr.bf16.gmra.mrb[104].mxu0 %v2182_v22  ;;  %v1854_v1 = vpop.xlane.xlu0 %1853 }
 0x70a   : > { %v3825_v21 = vpop.eup %3824  ;;  %v1924_v45 = vsub.f32 %v5501_v26, %v1854_v1  ;;  %v1925_v51 = vsub.f32 %v5503_v61, %v1854_v1  ;;  %v2128_v31 = vadd.f32 %v3823_v46, %v3821_v27 }
 0x70b   : > { %v3827_v48 = vpop.eup %3826  ;;  %v1857_v6 = vpop.xlane.xlu1 %1856  ;;  %v2184_v18 = vpack.c.bf16 %v3825_v21, %v3821_v27 }
 0x70c   : > { %v2036_v25 = vmul.f32 1.442695, %v1924_v45  ;;  %v2038_v0 = vmul.f32 1.442695, %v1925_v51  ;;  %v1926_v63 = vsub.f32 %v5821_v35, %v1857_v6  ;;  %v1927_v20 = vsub.f32 %v5822_v30, %v1857_v6  ;;  %2129 = vadd.xlane.f32.xlu0 %v2128_v31 }
 0x70d   : > { %v2185_v54 = vpack.c.bf16 %v3827_v48, %v3823_v46  ;;  %v2131_v14 = vadd.f32 %v3827_v48, %v3825_v21  ;;  %v3736_v21 = vld [vmem:[#allocation15 + $0x30] sm:$0xff]  }
 0x70e   : > { %3836 = vpow2.f32 %v2036_v25  ;;  %v2040_v32 = vmul.f32 1.442695, %v1926_v63  ;;  %v2042_v44 = vmul.f32 1.442695, %v1927_v20  ;;  %v5831_v48 = vld [vmem:[#allocation35_spill] sm:$0xff]  ;;  %3483 = vmatprep.subr.bf16.mxu1 %v3736_v21 }
 0x70f   : > { %3838 = vpow2.f32 %v2038_v0  ;;  %2308 = vmatprep.mubr.bf16.mxu0 %v2185_v54  ;;  %2132 = vadd.xlane.f32.xlu1 %v2131_v14 }
 0x710   : > { %v3829_v26 = vpop.eup %3828  ;;  %3840 = vpow2.f32 %v2040_v32  ;;  %3484 = vmatpush3.bf16.msra.mxu1 %v3736_v21  ;;  %v5833_v32 = vld [vmem:[#allocation37_spill] sm:$0xff] }
 0x711   : > { %v3831_v61 = vpop.eup %3830  ;;  %3842 = vpow2.f32 %v2042_v44  ;;  %2309 = vmatmul.mubr.bf16.gmra.mrb[108].mxu0 %v2184_v18  ;;  %v1860_v10 = vpop.xlane.xlu0 %1859  ;;  %v5832_v18 = vld [vmem:[#allocation36_spill] sm:$0xff] }
 0x712   : > { %v3833_v13 = vpop.eup %3832  ;;  %v1928_v16 = vsub.f32 %v5823_v8, %v1860_v10  ;;  %v1929_v38 = vsub.f32 %v5824_v58, %v1860_v10  ;;  %v2134_v55 = vadd.f32 %v3831_v61, %v3829_v26 }
 0x713   : > { %v3835_v29 = vpop.eup %3834  ;;  %v1863_v49 = vpop.xlane.xlu1 %1862  ;;  %v2186_v34 = vpack.c.bf16 %v3833_v13, %v3829_v26  ;;  %v3737_v26 = vld [vmem:[#allocation15 + $0x38] sm:$0xff]  }
 0x714   : > { %v2044_v52 = vmul.f32 1.442695, %v1928_v16  ;;  %v2046_v41 = vmul.f32 1.442695, %v1929_v38  ;;  %v1930_v47 = vsub.f32 %v5825_v15, %v1863_v49  ;;  %v1931_v4 = vsub.f32 %v5826_v53, %v1863_v49  ;;  %2135 = vadd.xlane.f32.xlu0 %v2134_v55  ;;  %3485 = vmatprep.subr.bf16.mxu1 %v3737_v26 }
 0x715   : > { %v2187_v11 = vpack.c.bf16 %v3835_v29, %v3831_v61  ;;  %v2137_v9 = vadd.f32 %v3835_v29, %v3833_v13  ;;  %3486 = vmatpush3.bf16.msra.mxu1 %v3737_v26 }
 0x716   : > { %3844 = vpow2.f32 %v2044_v52  ;;  %v2048_v36 = vmul.f32 1.442695, %v1930_v47  ;;  %v2050_v62 = vmul.f32 1.442695, %v1931_v4 }
 0x717   : > { %3846 = vpow2.f32 %v2046_v41  ;;  %2316 = vmatprep.mubr.bf16.mxu0 %v2187_v11  ;;  %2138 = vadd.xlane.f32.xlu1 %v2137_v9 }
 0x718   : > { %v3837_v28 = vpop.eup %3836  ;;  %3848 = vpow2.f32 %v2048_v36 }
 0x719   : > { %v3839_v50 = vpop.eup %3838  ;;  %3850 = vpow2.f32 %v2050_v62  ;;  %2317 = vmatmul.mubr.bf16.gmra.mrb[112].mxu0 %v2186_v34  ;;  %v1866_v24 = vpop.xlane.xlu0 %1865 }
 0x71a   : > { %v3841_v40 = vpop.eup %3840  ;;  %v1932_v3 = vsub.f32 %v5827_v43, %v1866_v24  ;;  %v1933_v19 = vsub.f32 %v5828_v39, %v1866_v24  ;;  %v2140_v42 = vadd.f32 %v3839_v50, %v3837_v28 }
 0x71b   : > { %v3843_v56 = vpop.eup %3842  ;;  %v1869_v22 = vpop.xlane.xlu1 %1868  ;;  %v2188_v33 = vpack.c.bf16 %v3841_v40, %v3837_v28 }
 0x71c   : > { %v2052_v23 = vmul.f32 1.442695, %v1932_v3  ;;  %v2054_v2 = vmul.f32 1.442695, %v1933_v19  ;;  %v1934_v37 = vsub.f32 %v5829_v60, %v1869_v22  ;;  %v1935_v12 = vsub.f32 %v5830_v7, %v1869_v22  ;;  %2141 = vadd.xlane.f32.xlu0 %v2140_v42 }
 0x71d   : > { %v2189_v57 = vpack.c.bf16 %v3843_v56, %v3839_v50  ;;  %v2143_v5 = vadd.f32 %v3843_v56, %v3841_v40 }
 0x71e   : > { %3852 = vpow2.f32 %v2052_v23  ;;  %v2056_v27 = vmul.f32 1.442695, %v1934_v37  ;;  %v2058_v46 = vmul.f32 1.442695, %v1935_v12 }
 0x71f   : > { %3854 = vpow2.f32 %v2054_v2  ;;  %2324 = vmatprep.mubr.bf16.mxu0 %v2189_v57  ;;  %2144 = vadd.xlane.f32.xlu1 %v2143_v5 }
 0x720   : > { %v3845_v1 = vpop.eup %3844  ;;  %3856 = vpow2.f32 %v2056_v27 }
 0x721   : > { %v3847_v45 = vpop.eup %3846  ;;  %3858 = vpow2.f32 %v2058_v46  ;;  %2325 = vmatmul.mubr.bf16.gmra.mrb[116].mxu0 %v2188_v33  ;;  %v1872_v51 = vpop.xlane.xlu0 %1871 }
 0x722   : > { %v3849_v31 = vpop.eup %3848  ;;  %v1936_v6 = vsub.f32 %v5831_v48, %v1872_v51  ;;  %v1937_v25 = vsub.f32 %v5832_v18, %v1872_v51  ;;  %v2146_v0 = vadd.f32 %v3847_v45, %v3845_v1 }
 0x723   : > { %v3851_v35 = vpop.eup %3850  ;;  %v1875_v63 = vpop.xlane.xlu1 %1874  ;;  %v2190_v30 = vpack.c.bf16 %v3849_v31, %v3845_v1 }
 0x724   : > { %v2060_v20 = vmul.f32 1.442695, %v1936_v6  ;;  %v2062_v54 = vmul.f32 1.442695, %v1937_v25  ;;  %2147 = vadd.xlane.f32.xlu0 %v2146_v0  ;;  %v1938_v14 = vsub.f32 %v5541_v59, %v1875_v63  ;;  %v1939_v44 = vsub.f32 %v5833_v32, %v1875_v63 }
 0x725   : > { %v2191_v61 = vpack.c.bf16 %v3851_v35, %v3847_v45  ;;  %v2149_v10 = vadd.f32 %v3851_v35, %v3849_v31 }
 0x726   : > { %3860 = vpow2.f32 %v2060_v20  ;;  %v2064_v13 = vmul.f32 1.442695, %v1938_v14  ;;  %v2066_v8 = vmul.f32 1.442695, %v1939_v44 }
 0x727   : > { %3862 = vpow2.f32 %v2062_v54  ;;  %2332 = vmatprep.mubr.bf16.mxu0 %v2191_v61  ;;  %2150 = vadd.xlane.f32.xlu1 %v2149_v10 }
 0x728   : > { %v3853_v16 = vpop.eup %3852  ;;  %3864 = vpow2.f32 %v2064_v13 }
 0x729   : > { %v3855_v58 = vpop.eup %3854  ;;  %3866 = vpow2.f32 %v2066_v8  ;;  %2333 = vmatmul.mubr.bf16.gmra.mrb[120].mxu0 %v2190_v30 }
 0x72a   : > { %v3857_v38 = vpop.eup %3856  ;;  %v2152_v59 = vadd.f32 %v3855_v58, %v3853_v16 }
 0x72b   : > { %v3859_v55 = vpop.eup %3858  ;;  %v2192_v29 = vpack.c.bf16 %v3857_v38, %v3853_v16 }
 0x72c   : > { %2153 = vadd.xlane.f32.xlu0 %v2152_v59  ;;  %v2193_v49 = vpack.c.bf16 %v3859_v55, %v3855_v58  ;;  %v2155_v34 = vadd.f32 %v3859_v55, %v3857_v38 }
 0x72e   : > { %2340 = vmatprep.mubr.bf16.mxu0 %v2193_v49  ;;  %2156 = vadd.xlane.f32.xlu1 %v2155_v34 }
 0x730   : > { %v3861_v52 = vpop.eup %3860 }
 0x731   : > { %v3863_v41 = vpop.eup %3862  ;;  %2341 = vmatmul.mubr.bf16.gmra.mrb[124].mxu0 %v2192_v29 }
 0x732   : > { %v3865_v15 = vpop.eup %3864  ;;  %v2158_v47 = vadd.f32 %v3863_v41, %v3861_v52 }
 0x733   : > { %v3867_v53 = vpop.eup %3866  ;;  %v2194_v4 = vpack.c.bf16 %v3865_v15, %v3861_v52 }
 0x734   : > { %2159 = vadd.xlane.f32.xlu0 %v2158_v47  ;;  %v2195_v11 = vpack.c.bf16 %v3867_v53, %v3863_v41  ;;  %v2161_v9 = vadd.f32 %v3867_v53, %v3865_v15 }
 0x736   : > { %2348 = vmatprep.mubr.bf16.mxu0 %v2195_v11  ;;  %2162 = vadd.xlane.f32.xlu1 %v2161_v9 }
 0x739   : > { %2349 = vmatmul.mubr.bf16.gmra.mrb[128].mxu0 %v2194_v4 }
 0x749   : > { %v2070_v36 = vpop.xlane.xlu0 %2069 }
 0x74a   : > { %3868 = vrcp.f32 %v2070_v36 }
 0x74c   : > { %v2073_v62 = vpop.xlane.xlu1 %2072 }
 0x74d   : > { %3870 = vrcp.f32 %v2073_v62 }
 0x751   : > { %v2076_v28 = vpop.xlane.xlu0 %2075 }
 0x752   : > { %3872 = vrcp.f32 %v2076_v28 }
 0x754   : > { %v3869_v39 = vpop.eup %3868 }
 0x756   : > { %v2079_v24 = vpop.xlane.xlu1 %2078 }
 0x757   : > { %3874 = vrcp.f32 %v2079_v24  ;;  %v3871_v42 = vpop.eup %3870 }
 0x759   : > { %v2082_v33 = vpop.xlane.xlu0 %2081 }
 0x75a   : > { %3876 = vrcp.f32 %v2082_v33 }
 0x75c   : > { %v2085_v2 = vpop.xlane.xlu1 %2084  ;;  %v3873_v5 = vpop.eup %3872 }
 0x75d   : > { %3878 = vrcp.f32 %v2085_v2 }
 0x761   : > { %v3875_v46 = vpop.eup %3874  ;;  %v2088_v45 = vpop.xlane.xlu0 %2087 }
 0x762   : > { %3880 = vrcp.f32 %v2088_v45 }
 0x764   : > { %v2091_v51 = vpop.xlane.xlu1 %2090  ;;  %v3877_v35 = vpop.eup %3876 }
 0x765   : > { %3882 = vrcp.f32 %v2091_v51 }
 0x767   : > { %v3879_v30 = vpop.eup %3878 }
 0x769   : > { %v2094_v14 = vpop.xlane.xlu0 %2093 }
 0x76a   : > { %3884 = vrcp.f32 %v2094_v14 }
 0x76c   : > { %v2097_v32 = vpop.xlane.xlu1 %2096  ;;  %v3881_v16 = vpop.eup %3880 }
 0x76d   : > { %3886 = vrcp.f32 %v2097_v32 }
 0x76f   : > { %v3883_v38 = vpop.eup %3882 }
 0x771   : > { %v2100_v29 = vpop.xlane.xlu0 %2099 }
 0x772   : > { %3888 = vrcp.f32 %v2100_v29 }
 0x774   : > { %v2103_v49 = vpop.xlane.xlu1 %2102  ;;  %v3885_v4 = vpop.eup %3884 }
 0x775   : > { %3890 = vrcp.f32 %v2103_v49 }
 0x777   : > { %v3887_v9 = vpop.eup %3886 }
 0x779   : > { %v2106_v28 = vpop.xlane.xlu0 %2105 }
 0x77a   : > { %3892 = vrcp.f32 %v2106_v28 }
 0x793   : > { %v3233_v50 = vpop.f32.mrb[68].mxu0 }
 0x794   : > { %v3234_v17 = vpop.f32.mrb[69].mxu0 }
 0x795   : > { %v3235_v40 = vadd.f32 %v3234_v17, %v3233_v50  ;;  %v3236_v43 = vpop.f32.mrb[70].mxu0  ;;  %v2109_v50 = vpop.xlane.xlu1 %2108 }
 0x796   : > { %v3237_v3 = vpop.f32.mrb[71].mxu0  ;;  %3894 = vrcp.f32 %v2109_v50 }
 0x797   : > { %v3238_v19 = vadd.f32 %v3237_v3, %v3236_v43  ;;  %v2389_v56 = vmul.f32 %v3869_v39, %v3235_v40 }
 0x799   : > { %v2390_v22 = vmul.f32 %v3871_v42, %v3238_v19  ;;  %v3889_v19 = vpop.eup %3888  ;;  %v2115_v2 = vpop.xlane.xlu1 %2114 }
 0x79b   : > { %v2421_v23 = vpack.c.bf16 %v2390_v22, %v2389_v56  ;;  %v3891_v56 = vpop.eup %3890 }
 0x79c   : > { %v3239_v60 = vpop.f32.mrb[72].mxu0 }
 0x79d   : > { %3487 = vmatprep.mubr.bf16.mxu1 %v2421_v23  ;;  %v3240_v37 = vpop.f32.mrb[73].mxu0  ;;  %v2112_v23 = vpop.xlane.xlu0 %2111 }
 0x79e   : > { %v3241_v7 = vadd.f32 %v3240_v37, %v3239_v60  ;;  %v3242_v12 = vpop.f32.mrb[74].mxu0  ;;  %3896 = vrcp.f32 %v2112_v23 }
 0x79f   : > { %v3243_v57 = vpop.f32.mrb[75].mxu0  ;;  %3898 = vrcp.f32 %v2115_v2 }
 0x7a0   : > { %v3244_v27 = vadd.f32 %v3243_v57, %v3242_v12  ;;  %v2391_v1 = vmul.f32 %v3873_v5, %v3241_v7 }
 0x7a1   : > { %v2118_v51 = vpop.xlane.xlu0 %2117 }
 0x7a2   : > { %v2392_v21 = vmul.f32 %v3875_v46, %v3244_v27  ;;  %v3893_v27 = vpop.eup %3892  ;;  %3900 = vrcp.f32 %v2118_v51 }
 0x7a4   : > { %v2422_v31 = vpack.c.bf16 %v2392_v21, %v2391_v1  ;;  %v3245_v48 = vpop.f32.mrb[76].mxu0  ;;  %v3895_v1 = vpop.eup %3894 }
 0x7a5   : > { %v3246_v6 = vpop.f32.mrb[77].mxu0  ;;  %v2124_v32 = vpop.xlane.xlu0 %2123 }
 0x7a6   : > { %v3247_v18 = vadd.f32 %v3246_v6, %v3245_v48  ;;  %v3248_v25 = vpop.f32.mrb[78].mxu0  ;;  %3488 = vmatmul.mubr.bf16.vlgmr.msra.gmra.mrb[100].mxu1 %v2422_v31  ;;  %v2121_v31 = vpop.xlane.xlu1 %2120 }
 0x7a7   : > { %v3249_v0 = vpop.f32.mrb[79].mxu0  ;;  %3902 = vrcp.f32 %v2121_v31 }
 0x7a8   : > { %v3250_v63 = vadd.f32 %v3249_v0, %v3248_v25  ;;  %v2393_v20 = vmul.f32 %v3877_v35, %v3247_v18  ;;  %3904 = vrcp.f32 %v2124_v32 }
 0x7a9   : > { %v2130_v49 = vpop.xlane.xlu0 %2129 }
 0x7aa   : > { %v2394_v54 = vmul.f32 %v3879_v30, %v3250_v63  ;;  %v3897_v63 = vpop.eup %3896 }
 0x7ac   : > { %v3251_v44 = vpop.f32.mrb[80].mxu0  ;;  %v2423_v26 = vpack.c.bf16 %v2394_v54, %v2393_v20  ;;  %v3899_v20 = vpop.eup %3898 }
 0x7ad   : > { %v3252_v61 = vpop.f32.mrb[81].mxu0  ;;  %v2136_v50 = vpop.xlane.xlu0 %2135 }
 0x7ae   : > { %v3253_v10 = vadd.f32 %v3252_v61, %v3251_v44  ;;  %v3254_v13 = vpop.f32.mrb[82].mxu0  ;;  %3491 = vmatprep.mubr.bf16.mxu1 %v2423_v26  ;;  %v2127_v44 = vpop.xlane.xlu1 %2126 }
 0x7af   : > { %v3255_v8 = vpop.f32.mrb[83].mxu0  ;;  %3906 = vrcp.f32 %v2127_v44 }
 0x7b0   : > { %v3256_v58 = vadd.f32 %v3255_v8, %v3254_v13  ;;  %v2395_v59 = vmul.f32 %v3881_v16, %v3253_v10  ;;  %3908 = vrcp.f32 %v2130_v49 }
 0x7b1   : > { %v2142_v2 = vpop.xlane.xlu0 %2141 }
 0x7b2   : > { %v2396_v55 = vmul.f32 %v3883_v38, %v3256_v58  ;;  %v3901_v58 = vpop.eup %3900 }
 0x7b4   : > { %v3257_v34 = vpop.f32.mrb[84].mxu0  ;;  %v2424_v52 = vpack.c.bf16 %v2396_v55, %v2395_v59  ;;  %v3903_v59 = vpop.eup %3902 }
 0x7b5   : > { %v3258_v41 = vpop.f32.mrb[85].mxu0  ;;  %v2148_v31 = vpop.xlane.xlu0 %2147 }
 0x7b6   : > { %v3259_v15 = vadd.f32 %v3258_v41, %v3257_v34  ;;  %v3260_v47 = vpop.f32.mrb[86].mxu0  ;;  %3492 = vmatmul.mubr.bf16.gmra.mrb[104].mxu1 %v2424_v52  ;;  %v2133_v34 = vpop.xlane.xlu1 %2132 }
 0x7b7   : > { %v3261_v53 = vpop.f32.mrb[87].mxu0  ;;  %3910 = vrcp.f32 %v2133_v34 }
 0x7b8   : > { %v3262_v11 = vadd.f32 %v3261_v53, %v3260_v47  ;;  %v2397_v36 = vmul.f32 %v3885_v4, %v3259_v15  ;;  %3912 = vrcp.f32 %v2136_v50 }
 0x7b9   : > { %v2154_v44 = vpop.xlane.xlu0 %2153 }
 0x7ba   : > { %v2398_v62 = vmul.f32 %v3887_v9, %v3262_v11  ;;  %v3905_v11 = vpop.eup %3904 }
 0x7bc   : > { %v3263_v24 = vpop.f32.mrb[88].mxu0  ;;  %v2425_v17 = vpack.c.bf16 %v2398_v62, %v2397_v36  ;;  %v3907_v36 = vpop.eup %3906 }
 0x7bd   : > { %v3264_v40 = vpop.f32.mrb[89].mxu0 }
 0x7be   : > { %v3265_v43 = vadd.f32 %v3264_v40, %v3263_v24  ;;  %v3266_v3 = vpop.f32.mrb[90].mxu0  ;;  %3495 = vmatprep.mubr.bf16.mxu1 %v2425_v17  ;;  %v2139_v24 = vpop.xlane.xlu1 %2138 }
 0x7bf   : > { %v3267_v39 = vpop.f32.mrb[91].mxu0  ;;  %3914 = vrcp.f32 %v2139_v24 }
 0x7c0   : > { %v3268_v42 = vadd.f32 %v3267_v39, %v3266_v3  ;;  %v2399_v22 = vmul.f32 %v3889_v19, %v3265_v43  ;;  %3916 = vrcp.f32 %v2142_v2  ;;  %v5613_v2 = vld [vmem:[#allocation16] ss:$0 sm:$0xff] }
 0x7c1   : > { %v2160_v34 = vpop.xlane.xlu0 %2159 }
 0x7c2   : > { %v2400_v33 = vmul.f32 %v3891_v56, %v3268_v42  ;;  %v3909_v42 = vpop.eup %3908 }
 0x7c4   : > { %v3269_v60 = vpop.f32.mrb[92].mxu0  ;;  %v2426_v37 = vpack.c.bf16 %v2400_v33, %v2399_v22  ;;  %v3911_v22 = vpop.eup %3910 }
 0x7c5   : > { %v3270_v7 = vpop.f32.mrb[93].mxu0 }
 0x7c6   : > { %v3271_v12 = vadd.f32 %v3270_v7, %v3269_v60  ;;  %v3272_v57 = vpop.f32.mrb[94].mxu0  ;;  %3496 = vmatmul.mubr.bf16.gmra.mrb[108].mxu1 %v2426_v37  ;;  %v2145_v60 = vpop.xlane.xlu1 %2144 }
 0x7c7   : > { %v3273_v5 = vpop.f32.mrb[95].mxu0  ;;  %3918 = vrcp.f32 %v2145_v60 }
 0x7c8   : > { %v3274_v46 = vadd.f32 %v3273_v5, %v3272_v57  ;;  %v2401_v21 = vmul.f32 %v3893_v27, %v3271_v12  ;;  %3920 = vrcp.f32 %v2148_v31 }
 0x7ca   : > { %v2402_v45 = vmul.f32 %v3895_v1, %v3274_v46  ;;  %v3913_v46 = vpop.eup %3912 }
 0x7cc   : > { %v3275_v48 = vpop.f32.mrb[96].mxu0  ;;  %v2427_v6 = vpack.c.bf16 %v2402_v45, %v2401_v21  ;;  %v3915_v21 = vpop.eup %3914 }
 0x7cd   : > { %v3276_v18 = vpop.f32.mrb[97].mxu0 }
 0x7ce   : > { %v3277_v25 = vadd.f32 %v3276_v18, %v3275_v48  ;;  %v3278_v0 = vpop.f32.mrb[98].mxu0  ;;  %3499 = vmatprep.mubr.bf16.mxu1 %v2427_v6  ;;  %v2151_v48 = vpop.xlane.xlu1 %2150 }
 0x7cf   : > { %v3279_v35 = vpop.f32.mrb[99].mxu0  ;;  %3922 = vrcp.f32 %v2151_v48 }
 0x7d0   : > { %v3280_v30 = vadd.f32 %v3279_v35, %v3278_v0  ;;  %v2403_v54 = vmul.f32 %v3897_v63, %v3277_v25  ;;  %3924 = vrcp.f32 %v2154_v44 }
 0x7d2   : > { %v2404_v14 = vmul.f32 %v3899_v20, %v3280_v30  ;;  %v3917_v30 = vpop.eup %3916 }
 0x7d4   : > { %v3281_v26 = vpop.f32.mrb[100].mxu0  ;;  %v2428_v61 = vpack.c.bf16 %v2404_v14, %v2403_v54  ;;  %v3919_v54 = vpop.eup %3918 }
 0x7d5   : > { %v3282_v10 = vpop.f32.mrb[101].mxu0 }
 0x7d6   : > { %v3283_v13 = vadd.f32 %v3282_v10, %v3281_v26  ;;  %v3284_v8 = vpop.f32.mrb[102].mxu0  ;;  %3500 = vmatmul.mubr.bf16.gmra.mrb[112].mxu1 %v2428_v61  ;;  %v2157_v26 = vpop.xlane.xlu1 %2156 }
 0x7d7   : > { %v3285_v16 = vpop.f32.mrb[103].mxu0  ;;  %3926 = vrcp.f32 %v2157_v26 }
 0x7d8   : > { %v3286_v38 = vadd.f32 %v3285_v16, %v3284_v8  ;;  %v2405_v55 = vmul.f32 %v3901_v58, %v3283_v13  ;;  %3928 = vrcp.f32 %v2160_v34 }
 0x7da   : > { %v2406_v29 = vmul.f32 %v3903_v59, %v3286_v38  ;;  %v3921_v38 = vpop.eup %3920 }
 0x7dc   : > { %v3287_v52 = vpop.f32.mrb[104].mxu0  ;;  %v2429_v41 = vpack.c.bf16 %v2406_v29, %v2405_v55  ;;  %v3923_v55 = vpop.eup %3922 }
 0x7dd   : > { %v3288_v15 = vpop.f32.mrb[105].mxu0 }
 0x7de   : > { %v3289_v47 = vadd.f32 %v3288_v15, %v3287_v52  ;;  %v3290_v53 = vpop.f32.mrb[106].mxu0  ;;  %3503 = vmatprep.mubr.bf16.mxu1 %v2429_v41  ;;  %v2163_v52 = vpop.xlane.xlu1 %2162 }
 0x7df   : > { %v3291_v4 = vpop.f32.mrb[107].mxu0  ;;  %3930 = vrcp.f32 %v2163_v52 }
 0x7e0   : > { %v3292_v9 = vadd.f32 %v3291_v4, %v3290_v53  ;;  %v2407_v62 = vmul.f32 %v3905_v11, %v3289_v47 }
 0x7e2   : > { %v2408_v28 = vmul.f32 %v3907_v36, %v3292_v9  ;;  %v3925_v9 = vpop.eup %3924 }
 0x7e4   : > { %v3293_v17 = vpop.f32.mrb[108].mxu0  ;;  %v2430_v40 = vpack.c.bf16 %v2408_v28, %v2407_v62  ;;  %v3927_v62 = vpop.eup %3926 }
 0x7e5   : > { %v3294_v43 = vpop.f32.mrb[109].mxu0 }
 0x7e6   : > { %v3295_v3 = vadd.f32 %v3294_v43, %v3293_v17  ;;  %v3296_v39 = vpop.f32.mrb[110].mxu0  ;;  %3504 = vmatmul.mubr.bf16.gmra.mrb[116].mxu1 %v2430_v40 }
 0x7e7   : > { %v3297_v19 = vpop.f32.mrb[111].mxu0 }
 0x7e8   : > { %v3298_v56 = vadd.f32 %v3297_v19, %v3296_v39  ;;  %v2409_v33 = vmul.f32 %v3909_v42, %v3295_v3  ;;  %v3929_v19 = vpop.eup %3928 }
 0x7ea   : > { %v2410_v23 = vmul.f32 %v3911_v22, %v3298_v56  ;;  %v3931_v56 = vpop.eup %3930 }
 0x7ec   : > { %v3299_v37 = vpop.f32.mrb[112].mxu0  ;;  %v2431_v7 = vpack.c.bf16 %v2410_v23, %v2409_v33 }
 0x7ed   : > { %v3300_v12 = vpop.f32.mrb[113].mxu0 }
 0x7ee   : > { %v3301_v57 = vadd.f32 %v3300_v12, %v3299_v37  ;;  %v3302_v5 = vpop.f32.mrb[114].mxu0  ;;  %3507 = vmatprep.mubr.bf16.mxu1 %v2431_v7 }
 0x7ef   : > { %v3303_v27 = vpop.f32.mrb[115].mxu0 }
 0x7f0   : > { %v3304_v1 = vadd.f32 %v3303_v27, %v3302_v5  ;;  %v2411_v45 = vmul.f32 %v3913_v46, %v3301_v57 }
 0x7f2   : > { %v2412_v51 = vmul.f32 %v3915_v21, %v3304_v1 }
 0x7f4   : > { %v3305_v6 = vpop.f32.mrb[116].mxu0  ;;  %v2432_v18 = vpack.c.bf16 %v2412_v51, %v2411_v45 }
 0x7f5   : > { %v3306_v25 = vpop.f32.mrb[117].mxu0 }
 0x7f6   : > { %v3307_v0 = vadd.f32 %v3306_v25, %v3305_v6  ;;  %v3308_v35 = vpop.f32.mrb[118].mxu0  ;;  %3508 = vmatmul.mubr.bf16.gmra.mrb[120].mxu1 %v2432_v18 }
 0x7f7   : > { %v3309_v63 = vpop.f32.mrb[119].mxu0 }
 0x7f8   : > { %v3310_v20 = vadd.f32 %v3309_v63, %v3308_v35  ;;  %v2413_v14 = vmul.f32 %v3917_v30, %v3307_v0 }
 0x7fa   : > { %v2414_v32 = vmul.f32 %v3919_v54, %v3310_v20 }
 0x7fc   : > { %v3311_v61 = vpop.f32.mrb[120].mxu0  ;;  %v2433_v10 = vpack.c.bf16 %v2414_v32, %v2413_v14 }
 0x7fd   : > { %v3312_v13 = vpop.f32.mrb[121].mxu0 }
 0x7fe   : > { %v3313_v8 = vadd.f32 %v3312_v13, %v3311_v61  ;;  %v3314_v16 = vpop.f32.mrb[122].mxu0  ;;  %3511 = vmatprep.mubr.bf16.mxu1 %v2433_v10 }
 0x7ff   : > { %v3315_v58 = vpop.f32.mrb[123].mxu0 }
 0x800   : > { %v3316_v59 = vadd.f32 %v3315_v58, %v3314_v16  ;;  %v2415_v29 = vmul.f32 %v3921_v38, %v3313_v8 }
 0x802   : > { %v2416_v49 = vmul.f32 %v3923_v55, %v3316_v59 }
 0x804   : > { %v3317_v41 = vpop.f32.mrb[124].mxu0  ;;  %v2434_v15 = vpack.c.bf16 %v2416_v49, %v2415_v29 }
 0x805   : > { %v3318_v47 = vpop.f32.mrb[125].mxu0 }
 0x806   : > { %v3319_v53 = vadd.f32 %v3318_v47, %v3317_v41  ;;  %v3320_v4 = vpop.f32.mrb[126].mxu0  ;;  %3512 = vmatmul.mubr.bf16.gmra.mrb[124].mxu1 %v2434_v15 }
 0x807   : > { %v3321_v11 = vpop.f32.mrb[127].mxu0 }
 0x808   : > { %v3322_v36 = vadd.f32 %v3321_v11, %v3320_v4  ;;  %v2417_v28 = vmul.f32 %v3925_v9, %v3319_v53 }
 0x80a   : > { %v2418_v50 = vmul.f32 %v3927_v62, %v3322_v36 }
 0x80c   : > { %v3323_v24 = vpop.f32.mrb[128].mxu0  ;;  %v2435_v17 = vpack.c.bf16 %v2418_v50, %v2417_v28 }
 0x80d   : > { %v3324_v40 = vpop.f32.mrb[129].mxu0 }
 0x80e   : > { %v3325_v43 = vadd.f32 %v3324_v40, %v3323_v24  ;;  %v3326_v3 = vpop.f32.mrb[130].mxu0  ;;  %3515 = vmatprep.mubr.bf16.mxu1 %v2435_v17 }
 0x80f   : > { %v3327_v39 = vpop.f32.mrb[131].mxu0 }
 0x810   : > { %v3328_v42 = vadd.f32 %v3327_v39, %v3326_v3  ;;  %v2419_v22 = vmul.f32 %v3929_v19, %v3325_v43 }
 0x812   : > { %v2420_v33 = vmul.f32 %v3931_v56, %v3328_v42 }
 0x814   : > { %v2436_v23 = vpack.c.bf16 %v2420_v33, %v2419_v22 }
 0x816   : > { %3516 = vmatmul.mubr.bf16.gmra.mrb[128].mxu1 %v2436_v23 }
 0x879   : > { %v3489_v60 = vpop.f32.mrb[100].mxu1 }
 0x87a   : > { %v2542_v37 = vpop.f32.mrb[101].mxu1  ;;  %v2551_v27 = vadd.f32 %v3489_v60, %v5613_v2 }
 0x87b   : > { %v2543_v7 = vadd.f32 %v5613_v2, %v2542_v37  ;;  %v3490_v12 = vpop.f32.mrb[102].mxu1  ;;  %v2701_v37 = vld [vmem:[%s4585_s10] sm:$0xff] }
 0x87c   : > { %v2545_v57 = vpop.f32.mrb[103].mxu1  ;;  %v2554_v46 = vadd.f32 %v3490_v12, %v5613_v2 }
 0x87d   : > { %2765 = vxpose.xlu0.b32.start [1/16] %v2543_v7, 128  ;;  %v2546_v5 = vadd.f32 %v5613_v2, %v2545_v57  ;;  %v2703_v57 = vld [vmem:[%s4585_s10 + $0x10] sm:$0xff] }
 0x881   : > { %2766 = vxpose.xlu0.b32.cont [2/16] %v2546_v5, 128 }
 0x885   : > { %2767 = vxpose.xlu0.b32.cont [3/16] %v2551_v27, 128 }
 0x889   : > { %2768 = vxpose.xlu0.b32.cont [4/16] %v2554_v46, 128  ;;  %v3493_v1 = vpop.f32.mrb[104].mxu1  ;;  %v2705_v46 = vld [vmem:[%s4585_s10 + $0x20] sm:$0xff] }
 0x88a   : > { %v2558_v21 = vpop.f32.mrb[105].mxu1  ;;  %v2567_v6 = vadd.f32 %v3493_v1, %v5613_v2 }
 0x88b   : > { %v2559_v45 = vadd.f32 %v5613_v2, %v2558_v21  ;;  %v3494_v51 = vpop.f32.mrb[106].mxu1  ;;  %v2707_v21 = vld [vmem:[%s4585_s10 + $0x30] sm:$0xff] }
 0x88c   : > { %v2561_v31 = vpop.f32.mrb[107].mxu1  ;;  %v2570_v18 = vadd.f32 %v3494_v51, %v5613_v2 }
 0x88d   : > { %2769 = vxpose.xlu0.b32.cont [5/16] %v2559_v45, 128  ;;  %v2562_v48 = vadd.f32 %v5613_v2, %v2561_v31  ;;  %v2709_v31 = vld [vmem:[%s4585_s10 + $0x40] sm:$0xff] }
 0x891   : > { %2770 = vxpose.xlu0.b32.cont [6/16] %v2562_v48, 128 }
 0x895   : > { %2771 = vxpose.xlu0.b32.cont [7/16] %v2567_v6, 128 }
 0x899   : > { %2772 = vxpose.xlu0.b32.cont [8/16] %v2570_v18, 128  ;;  %v3497_v25 = vpop.f32.mrb[108].mxu1  ;;  %v2711_v18 = vld [vmem:[%s4585_s10 + $0x50] sm:$0xff] }
 0x89a   : > { %v2574_v0 = vpop.f32.mrb[109].mxu1  ;;  %v2583_v54 = vadd.f32 %v3497_v25, %v5613_v2 }
 0x89b   : > { %v2575_v35 = vadd.f32 %v5613_v2, %v2574_v0  ;;  %v3498_v63 = vpop.f32.mrb[110].mxu1 }
 0x89c   : > { %v2577_v30 = vpop.f32.mrb[111].mxu1  ;;  %v2586_v14 = vadd.f32 %v3498_v63, %v5613_v2 }
 0x89d   : > { %2773 = vxpose.xlu0.b32.cont [9/16] %v2575_v35, 128  ;;  %v2578_v20 = vadd.f32 %v5613_v2, %v2577_v30  ;;  %v2713_v35 = vld [vmem:[%s4585_s10 + $0x60] sm:$0xff] }
 0x8a1   : > { %2774 = vxpose.xlu0.b32.cont [10/16] %v2578_v20, 128  ;;  %v2715_v20 = vld [vmem:[%s4585_s10 + $0x70] sm:$0xff] }
 0x8a5   : > { %2775 = vxpose.xlu0.b32.cont [11/16] %v2583_v54, 128 }
 0x8a9   : > { %2776 = vxpose.xlu0.b32.cont [12/16] %v2586_v14, 128  ;;  %v3501_v32 = vpop.f32.mrb[112].mxu1 }
 0x8aa   : > { %v2590_v44 = vpop.f32.mrb[113].mxu1  ;;  %v2599_v8 = vadd.f32 %v3501_v32, %v5613_v2  ;;  %v2717_v32 = vld [vmem:[%s4585_s10 + $0x80] sm:$0xff] }
 0x8ab   : > { %v2591_v26 = vadd.f32 %v5613_v2, %v2590_v44  ;;  %v3502_v61 = vpop.f32.mrb[114].mxu1 }
 0x8ac   : > { %v2593_v10 = vpop.f32.mrb[115].mxu1  ;;  %v2602_v16 = vadd.f32 %v3502_v61, %v5613_v2  ;;  %v2719_v61 = vld [vmem:[%s4585_s10 + $0x90] sm:$0xff] }
 0x8ad   : > { %2777 = vxpose.xlu0.b32.cont [13/16] %v2591_v26, 128  ;;  %v2594_v13 = vadd.f32 %v5613_v2, %v2593_v10 }
 0x8b1   : > { %2778 = vxpose.xlu0.b32.cont [14/16] %v2594_v13, 128 }
 0x8b5   : > { %2779 = vxpose.xlu0.b32.cont [15/16] %v2599_v8, 128  ;;  %v2721_v8 = vld [vmem:[%s4585_s10 + $0xa0] sm:$0xff] }
 0x8b9   : > { %2780 = vxpose.xlu0.b32.end [16/16] %v2602_v16, 128  ;;  %v3505_v58 = vpop.f32.mrb[116].mxu1 }
 0x8ba   : > { %v2606_v38 = vpop.f32.mrb[117].mxu1  ;;  %v2615_v34 = vadd.f32 %v3505_v58, %v5613_v2 }
 0x8bb   : > { %v2607_v59 = vadd.f32 %v5613_v2, %v2606_v38  ;;  %v3506_v55 = vpop.f32.mrb[118].mxu1  ;;  %v2723_v38 = vld [vmem:[%s4585_s10 + $0xb0] sm:$0xff] }
 0x8bc   : > { %v2609_v29 = vpop.f32.mrb[119].mxu1  ;;  %v2618_v52 = vadd.f32 %v3506_v55, %v5613_v2 }
 0x8bd   : > { %2797 = vxpose.xlu1.b32.start [1/16] %v2607_v59, 128  ;;  %v2610_v49 = vadd.f32 %v5613_v2, %v2609_v29  ;;  %v2725_v29 = vld [vmem:[%s4585_s10 + $0xc0] sm:$0xff] }
 0x8c1   : > { %2798 = vxpose.xlu1.b32.cont [2/16] %v2610_v49, 128 }
 0x8c5   : > { %2799 = vxpose.xlu1.b32.cont [3/16] %v2615_v34, 128 }
 0x8c9   : > { %2800 = vxpose.xlu1.b32.cont [4/16] %v2618_v52, 128  ;;  %v3509_v41 = vpop.f32.mrb[120].mxu1  ;;  %v2727_v52 = vld [vmem:[%s4585_s10 + $0xd0] sm:$0xff] }
 0x8ca   : > { %v2622_v15 = vpop.f32.mrb[121].mxu1  ;;  %v2631_v9 = vadd.f32 %v3509_v41, %v5613_v2 }
 0x8cb   : > { %v2623_v47 = vadd.f32 %v5613_v2, %v2622_v15  ;;  %v3510_v53 = vpop.f32.mrb[122].mxu1 }
 0x8cc   : > { %v2625_v4 = vpop.f32.mrb[123].mxu1  ;;  %v2634_v36 = vadd.f32 %v3510_v53, %v5613_v2 }
 0x8cd   : > { %2801 = vxpose.xlu1.b32.cont [5/16] %v2623_v47, 128  ;;  %v2626_v11 = vadd.f32 %v5613_v2, %v2625_v4  ;;  %v2729_v47 = vld [vmem:[%s4585_s10 + $0xe0] sm:$0xff] }
 0x8d1   : > { %2802 = vxpose.xlu1.b32.cont [6/16] %v2626_v11, 128  ;;  %v2731_v11 = vld [vmem:[%s4585_s10 + $0xf0] sm:$0xff] }
 0x8d5   : > { %2803 = vxpose.xlu1.b32.cont [7/16] %v2631_v9, 128 }
 0x8d9   : > { %2804 = vxpose.xlu1.b32.cont [8/16] %v2634_v36, 128  ;;  %v3513_v62 = vpop.f32.mrb[124].mxu1 }
 0x8da   : > { %v2638_v28 = vpop.f32.mrb[125].mxu1  ;;  %v2647_v43 = vadd.f32 %v3513_v62, %v5613_v2  ;;  %v2702_v62 = vld [vmem:[%s4585_s10 + $0x8] sm:$0xff] }
 0x8db   : > { %v2639_v50 = vadd.f32 %v5613_v2, %v2638_v28  ;;  %v3514_v24 = vpop.f32.mrb[126].mxu1 }
 0x8dc   : > { %v2641_v17 = vpop.f32.mrb[127].mxu1  ;;  %v2650_v3 = vadd.f32 %v3514_v24, %v5613_v2  ;;  %v2704_v24 = vld [vmem:[%s4585_s10 + $0x18] sm:$0xff] }
 0x8dd   : > { %2805 = vxpose.xlu1.b32.cont [9/16] %v2639_v50, 128  ;;  %v2642_v40 = vadd.f32 %v5613_v2, %v2641_v17 }
 0x8e1   : > { %2806 = vxpose.xlu1.b32.cont [10/16] %v2642_v40, 128 }
 0x8e5   : > { %2807 = vxpose.xlu1.b32.cont [11/16] %v2647_v43, 128  ;;  %v2706_v43 = vld [vmem:[%s4585_s10 + $0x28] sm:$0xff] }
 0x8e9   : > { %2808 = vxpose.xlu1.b32.cont [12/16] %v2650_v3, 128  ;;  %v3517_v39 = vpop.f32.mrb[128].mxu1 }
 0x8ea   : > { %v2654_v19 = vpop.f32.mrb[129].mxu1  ;;  %v2663_v23 = vadd.f32 %v3517_v39, %v5613_v2 }
 0x8eb   : > { %v2655_v42 = vadd.f32 %v5613_v2, %v2654_v19  ;;  %v3518_v56 = vpop.f32.mrb[130].mxu1  ;;  %v2708_v19 = vld [vmem:[%s4585_s10 + $0x38] sm:$0xff] }
 0x8ec   : > { %v2657_v22 = vpop.f32.mrb[131].mxu1  ;;  %v2666_v60 = vadd.f32 %v3518_v56, %v5613_v2 }
 0x8ed   : > { %2809 = vxpose.xlu1.b32.cont [13/16] %v2655_v42, 128  ;;  %v2658_v33 = vadd.f32 %v5613_v2, %v2657_v22  ;;  %v2710_v22 = vld [vmem:[%s4585_s10 + $0x48] sm:$0xff] }
 0x8f1   : > { %2810 = vxpose.xlu1.b32.cont [14/16] %v2658_v33, 128 }
 0x8f5   : > { %2811 = vxpose.xlu1.b32.cont [15/16] %v2663_v23, 128 }
 0x8f9   : > { %2812 = vxpose.xlu1.b32.end [16/16] %v2666_v60, 128  ;;  %v2712_v60 = vld [vmem:[%s4585_s10 + $0x58] sm:$0xff] }
 0x8fd   : > { %v2781_v7 = vpop.trf.xlu0 }
 0x8fe   : > { %v2829_v12 = vadd.f32 %v2781_v7, %v2701_v37 }
 0x900   : > { %2861 = vst [vmem:[%s5651_s12] sm:$0xff] %v2829_v12  ;;  %v2714_v12 = vld [vmem:[%s4585_s10 + $0x68] sm:$0xff] }
 0x901   : > { %v2782_v5 = vpop.trf.xlu0 }
 0x902   : > { %v2831_v27 = vadd.f32 %v2782_v5, %v2703_v57 }
 0x904   : > { %2863 = vst [vmem:[%s5651_s12 + $0x10] sm:$0xff] %v2831_v27  ;;  %v2716_v27 = vld [vmem:[%s4585_s10 + $0x78] sm:$0xff] }
 0x905   : > { %v2783_v2 = vpop.trf.xlu0 }
 0x906   : > { %v2833_v1 = vadd.f32 %v2783_v2, %v2705_v46 }
 0x908   : > { %2865 = vst [vmem:[%s5651_s12 + $0x20] sm:$0xff] %v2833_v1  ;;  %v2718_v1 = vld [vmem:[%s4585_s10 + $0x88] sm:$0xff] }
 0x909   : > { %v2784_v45 = vpop.trf.xlu0 }
 0x90a   : > { %v2835_v51 = vadd.f32 %v2784_v45, %v2707_v21 }
 0x90c   : > { %2867 = vst [vmem:[%s5651_s12 + $0x30] sm:$0xff] %v2835_v51  ;;  %v2720_v51 = vld [vmem:[%s4585_s10 + $0x98] sm:$0xff] }
 0x90d   : > { %v2785_v48 = vpop.trf.xlu0 }
 0x90e   : > { %v2837_v6 = vadd.f32 %v2785_v48, %v2709_v31 }
 0x910   : > { %2869 = vst [vmem:[%s5651_s12 + $0x40] sm:$0xff] %v2837_v6  ;;  %v2722_v6 = vld [vmem:[%s4585_s10 + $0xa8] sm:$0xff] }
 0x911   : > { %v2786_v25 = vpop.trf.xlu0 }
 0x912   : > { %v2839_v0 = vadd.f32 %v2786_v25, %v2711_v18 }
 0x914   : > { %2871 = vst [vmem:[%s5651_s12 + $0x50] sm:$0xff] %v2839_v0  ;;  %v2724_v0 = vld [vmem:[%s4585_s10 + $0xb8] sm:$0xff] }
 0x915   : > { %v2787_v63 = vpop.trf.xlu0 }
 0x916   : > { %v2841_v30 = vadd.f32 %v2787_v63, %v2713_v35 }
 0x918   : > { %2873 = vst [vmem:[%s5651_s12 + $0x60] sm:$0xff] %v2841_v30  ;;  %v2726_v30 = vld [vmem:[%s4585_s10 + $0xc8] sm:$0xff] }
 0x919   : > { %v2788_v54 = vpop.trf.xlu0 }
 0x91a   : > { %v2843_v14 = vadd.f32 %v2788_v54, %v2715_v20 }
 0x91c   : > { %2875 = vst [vmem:[%s5651_s12 + $0x70] sm:$0xff] %v2843_v14  ;;  %v2728_v14 = vld [vmem:[%s4585_s10 + $0xd8] sm:$0xff] }
 0x91d   : > { %v2789_v44 = vpop.trf.xlu0 }
 0x91e   : > { %v2845_v26 = vadd.f32 %v2789_v44, %v2717_v32 }
 0x920   : > { %2877 = vst [vmem:[%s5651_s12 + $0x80] sm:$0xff] %v2845_v26  ;;  %v2730_v26 = vld [vmem:[%s4585_s10 + $0xe8] sm:$0xff] }
 0x921   : > { %v2790_v10 = vpop.trf.xlu0 }
 0x922   : > { %v2847_v13 = vadd.f32 %v2790_v10, %v2719_v61 }
 0x924   : > { %2879 = vst [vmem:[%s5651_s12 + $0x90] sm:$0xff] %v2847_v13  ;;  %v2732_v13 = vld [vmem:[%s4585_s10 + $0xf8] sm:$0xff] }
 0x925   : > { %v2791_v16 = vpop.trf.xlu0 }
 0x926   : > { %v2849_v58 = vadd.f32 %v2791_v16, %v2721_v8 }
 0x928   : > { %2881 = vst [vmem:[%s5651_s12 + $0xa0] sm:$0xff] %v2849_v58 }
 0x929   : > { %v2792_v59 = vpop.trf.xlu0 }
 0x92a   : > { %v2851_v55 = vadd.f32 %v2792_v59, %v2723_v38 }
 0x92c   : > { %2883 = vst [vmem:[%s5651_s12 + $0xb0] sm:$0xff] %v2851_v55 }
 0x92d   : > { %v2793_v49 = vpop.trf.xlu0 }
 0x92e   : > { %v2853_v34 = vadd.f32 %v2793_v49, %v2725_v29 }
 0x930   : > { %2885 = vst [vmem:[%s5651_s12 + $0xc0] sm:$0xff] %v2853_v34 }
 0x931   : > { %v2794_v41 = vpop.trf.xlu0 }
 0x932   : > { %v2855_v15 = vadd.f32 %v2794_v41, %v2727_v52 }
 0x934   : > { %2887 = vst [vmem:[%s5651_s12 + $0xd0] sm:$0xff] %v2855_v15 }
 0x935   : > { %v2795_v53 = vpop.trf.xlu0 }
 0x936   : > { %v2857_v4 = vadd.f32 %v2795_v53, %v2729_v47 }
 0x938   : > { %2889 = vst [vmem:[%s5651_s12 + $0xe0] sm:$0xff] %v2857_v4 }
 0x939   : > { %v2796_v9 = vpop.trf.xlu0 }
 0x93a   : > { %v2859_v36 = vadd.f32 %v2796_v9, %v2731_v11 }
 0x93c   : > { %2891 = vst [vmem:[%s5651_s12 + $0xf0] sm:$0xff] %v2859_v36 }
 0x93d   : > { %v2813_v28 = vpop.trf.xlu1 }
 0x93e   : > { %v2830_v50 = vadd.f32 %v2813_v28, %v2702_v62 }
 0x940   : > { %2862 = vst [vmem:[%s5651_s12 + $0x8] sm:$0xff] %v2830_v50 }
 0x941   : > { %v2814_v17 = vpop.trf.xlu1 }
 0x942   : > { %v2832_v40 = vadd.f32 %v2814_v17, %v2704_v24 }
 0x944   : > { %2864 = vst [vmem:[%s5651_s12 + $0x18] sm:$0xff] %v2832_v40 }
 0x945   : > { %v2815_v3 = vpop.trf.xlu1 }
 0x946   : > { %v2834_v39 = vadd.f32 %v2815_v3, %v2706_v43 }
 0x948   : > { %2866 = vst [vmem:[%s5651_s12 + $0x28] sm:$0xff] %v2834_v39 }
 0x949   : > { %v2816_v42 = vpop.trf.xlu1 }
 0x94a   : > { %v2836_v56 = vadd.f32 %v2816_v42, %v2708_v19 }
 0x94c   : > { %2868 = vst [vmem:[%s5651_s12 + $0x38] sm:$0xff] %v2836_v56 }
 0x94d   : > { %v2817_v33 = vpop.trf.xlu1 }
 0x94e   : > { %v2838_v23 = vadd.f32 %v2817_v33, %v2710_v22 }
 0x950   : > { %2870 = vst [vmem:[%s5651_s12 + $0x48] sm:$0xff] %v2838_v23 }
 0x951   : > { %v2818_v37 = vpop.trf.xlu1 }
 0x952   : > { %v2840_v7 = vadd.f32 %v2818_v37, %v2712_v60 }
 0x954   : > { %2872 = vst [vmem:[%s5651_s12 + $0x58] sm:$0xff] %v2840_v7 }
 0x955   : > { %v2819_v57 = vpop.trf.xlu1 }
 0x956   : > { %v2842_v5 = vadd.f32 %v2819_v57, %v2714_v12 }
 0x958   : > { %2874 = vst [vmem:[%s5651_s12 + $0x68] sm:$0xff] %v2842_v5 }
 0x959   : > { %v2820_v46 = vpop.trf.xlu1 }
 0x95a   : > { %v2844_v2 = vadd.f32 %v2820_v46, %v2716_v27 }
 0x95c   : > { %2876 = vst [vmem:[%s5651_s12 + $0x78] sm:$0xff] %v2844_v2 }
 0x95d   : > { %v2821_v21 = vpop.trf.xlu1 }
 0x95e   : > { %v2846_v45 = vadd.f32 %v2821_v21, %v2718_v1 }
 0x960   : > { %2878 = vst [vmem:[%s5651_s12 + $0x88] sm:$0xff] %v2846_v45 }
 0x961   : > { %v2822_v31 = vpop.trf.xlu1 }
 0x962   : > { %v2848_v48 = vadd.f32 %v2822_v31, %v2720_v51 }
 0x964   : > { %2880 = vst [vmem:[%s5651_s12 + $0x98] sm:$0xff] %v2848_v48 }
 0x965   : > { %v2823_v18 = vpop.trf.xlu1 }
 0x966   : > { %v2850_v25 = vadd.f32 %v2823_v18, %v2722_v6 }
 0x968   : > { %2882 = vst [vmem:[%s5651_s12 + $0xa8] sm:$0xff] %v2850_v25 }
 0x969   : > { %v2824_v35 = vpop.trf.xlu1 }
 0x96a   : > { %v2852_v63 = vadd.f32 %v2824_v35, %v2724_v0 }
 0x96c   : > { %2884 = vst [vmem:[%s5651_s12 + $0xb8] sm:$0xff] %v2852_v63 }
 0x96d   : > { %v2825_v20 = vpop.trf.xlu1 }
 0x96e   : > { %v2854_v54 = vadd.f32 %v2825_v20, %v2726_v30 }
 0x970   : > { %2886 = vst [vmem:[%s5651_s12 + $0xc8] sm:$0xff] %v2854_v54 }
 0x971   : > { %v2826_v32 = vpop.trf.xlu1 }
 0x972   : > { %v2856_v44 = vadd.f32 %v2826_v32, %v2728_v14 }
 0x974   : > { %2888 = vst [vmem:[%s5651_s12 + $0xd8] sm:$0xff] %v2856_v44 }
 0x975   : > { %v2827_v61 = vpop.trf.xlu1 }
 0x976   : > { %v2858_v10 = vadd.f32 %v2827_v61, %v2730_v26 }
 0x978   : > { %2890 = vst [vmem:[%s5651_s12 + $0xe8] sm:$0xff] %v2858_v10 }
 0x979   : > { %v2828_v8 = vpop.trf.xlu1 }
 0x97a   : > { %v2860_v16 = vadd.f32 %v2828_v8, %v2732_v13 }
 0x97c   : > { %2892 = vst [vmem:[%s5651_s12 + $0xf8] sm:$0xff] %v2860_v16 }
 0x97d   : > { %4171 = shalt.err (!%p4168_p11)
}
 0x97e   : > { %s4172_s14 = scalar_lea.hbm %s5719_s9, 4096  ;;  %s4176_s22 = scalar_lea.hbm %s5774_s8, 8192 }
 0x97f   : > { %p4173_p12 = scmp.ne.s32.totalorder %s5719_s9, %s4172_s14  ;;  %p4177_p9 = scmp.lt.u32.totalorder %s5719_s9, %s5774_s8 }
 0x980   : > { %p4178_p7 = scmp.lt.u32.totalorder %s4176_s22, %s4172_s14  ;;  %p4180_p4 = scmp.lt.u32.totalorder %s4172_s14, %s5719_s9 }
 0x981   : > { %p4174_p0 = pnand %p4173_p12, %p5834_p13 }
 0x982   : > { %p4179_p10 = por %p4178_p7, %p4177_p9 }
 0x983   : > { %p4175_p5 = pneg %p4174_p0 }
 0x984   : > { %p4181_p1 = por %p4180_p4, %p4179_p10 }
 0x986   : > { %p4182_p3 = pnand %p4181_p1, %p4175_p5 }
 0x988   : > { %4185 = shalt.err (!%p4182_p3)
}
 0x989   : > { %s4263_s13 = smov 256   ;;  %s4264_s11 = smov 16  }
 0x98a   : > { %3597 = dma.vmem_to_hbm [thread:$0]  (%p5834_p13), %s5721_s16, 4096, %s5719_s9, %s2894_s18, %s4263_s13, %s4263_s13, %s4264_s11  }
 0x98b PF: > { %s2922_s19 = sand.u32 1, %s4228_s27   ;;  %p5835_p2 = scmp.ne.s32.totalorder %s5797_s25, 0 }
 0x98c   : > { %p5836_p8 = scmp.ge.s32.totalorder %s4240_s30, 2  ;;  %s2923_s24 = scalar_lea.sflag [#allocation6], %s2922_s19 }
 0x98e   : > { %p3626_p6 = pnand %p5836_p8, %p5835_p2 }
 0x990   : > { %4223 = dma.done.wait (!%p3626_p6), %s2923_s24, 4096  }
 0x991   : > { %4225 = vsyncadd (!%p3626_p6), %s2923_s24, 4294963200  ;;  %p25_p11 = scmp.ge.s32.totalorder %s4506_s15, 4   ;;  %s5837_s27 = smov %s4232_s28 }
 0x992   : > { %s5838_s28 = smov %s4236_s29  ;;  %s5839_s29 = smov %s4518_s21 }
 0x993   : > { %s5840_s30 = smov %s4506_s15  ;;  %27 = sbr.rel (!%p25_p11) target bundleno = 9 (0x9), region = 126 }
 0x99a   :  { %2928 = vsyncpa [#allocation5], 1 }
 0x99b   :  { %2930 = vsyncpa [#allocation5 + $0x1], 1 }
 0x99c   :  { %2931 = vsyncpa [#allocation8], 1 }
 0x99d   :  { %2932 = vsyncpa [#allocation11], 1 }
 0x99e   :  { %2933 = vsyncpa [#allocation14], 1 }
 0x99f   :  { %2934 = vsyncpa [#allocation17], 1 }
 0x9a0   :  { %2935 = vsyncpa [#allocation6], 1 }
 0x9a1   :  { %2937 = vsyncpa [#allocation6 + $0x1], 1 }

</bundles_post_ra>
